<compile_context>
chip_gen: v7x
topology: tpu7x:2x2x1
jax: 0.10.0
libtpu: 0.0.40
codegen_flags: <defaults>
</compile_context>

<pallas_src>
import functools

import jax
import jax.numpy as jnp
from jax.experimental import pallas as pl
from jax.experimental.pallas import tpu as pltpu


# ----------------------------- static dims -------------------------------- #
FEAT_SMALL = 576            # tf_mobilenetv3_small_minimal_100 feature channels
FEAT_LARGE = 960            # tf_mobilenetv3_large_minimal_100 feature channels
KSIZE, CIN = 3, 3
K_RAW = KSIZE * KSIZE * CIN            # 27
K_PAD = 32                              # sublane-aligned contraction dim
CF_RAW = FEAT_SMALL + 2 * FEAT_LARGE    # 2496
CF_PAD = 2560                           # 128-lane aligned fused feature dim
PT_TARGET = 512                         # P-tile size (fits v5e/v6e/v7x VMEM)


def _round_up(x, m):
    return -(-x // m) * m


# ----------------------------- Pallas kernel ------------------------------ #
def _make_fused_kernel(pt, p_valid, p_pad):
    """Kernel: grid = (B, P_pad // pt); reduction over P tiles per image."""
    needs_mask = (p_pad != p_valid)

    def kernel(p_ref, wc_ref, bc_ref, wh_ref, bh_ref, out_ref, acc_ref):
        # p_ref:  (1, K_PAD, pt)   bf16 im2col tile (K in sublanes, P in lanes)
        # wc_ref: (K_PAD, CF_PAD)  bf16 fused backbone conv weight
        # bc_ref: (1, CF_PAD)      f32 fused conv bias
        # wh_ref: (CF_PAD, NOUTP)  f32 fused head weight (1/P pre-folded)
        # bh_ref: (1, NOUTP)       f32 fused head bias
        # out_ref:(1, 1, NOUTP)    f32 lane-dense output slab
        # acc_ref:(1, CF_PAD)      f32 pooled-feature accumulator (VMEM scratch)
        p_step = pl.program_id(1)

        @pl.when(p_step == 0)
        def _():
            acc_ref[...] = jnp.zeros_like(acc_ref)

        patches = p_ref[0]                                   # (K_PAD, pt)
        # contract over K (dim 0 of both operands) -> (pt, CF_PAD), f32 acc on MXU
        feat = jax.lax.dot_general(
            patches, wc_ref[...],
            dimension_numbers=(((0,), (0,)), ((), ())),
            preferred_element_type=jnp.float32)
        feat = jnp.maximum(feat + bc_ref[...], 0.0)          # conv bias + ReLU
        if needs_mask:
            # zero out padded spatial positions (bias would otherwise leak in)
            row = jax.lax.broadcasted_iota(jnp.int32, (pt, 1), 0) + p_step * pt
            feat = jnp.where(row < p_valid, feat, 0.0)
        acc_ref[...] += jnp.sum(feat, axis=0, keepdims=True)  # running pool-sum

        @pl.when(p_step == pl.num_programs(1) - 1)
        def _():
            # adaptive_avg_pool2d(1,1): 1/P already folded into wh.
            params = jnp.dot(acc_ref[...], wh_ref[...],
                             preferred_element_type=jnp.float32)
            out_ref[0] = params + bh_ref[...]

    return kernel


def run_fused_encoder(patches_kp, wc, bc, wh, bh, p_valid):
    """One pallas_call for all three encoders. patches_kp: (B, K_PAD, P_pad) bf16."""
    B, Kp, Pp = patches_kp.shape
    Cf = wc.shape[1]
    Nout = wh.shape[1]
    pt = Pp if Pp <= PT_TARGET else PT_TARGET
    assert Pp % pt == 0
    n_pt = Pp // pt

    kernel = _make_fused_kernel(pt, p_valid, Pp)
    out = pl.pallas_call(
        kernel,
        out_shape=jax.ShapeDtypeStruct((B, 1, Nout), jnp.float32),
        grid_spec=pltpu.PrefetchScalarGridSpec(
            num_scalar_prefetch=0,
            grid=(B, n_pt),
            in_specs=[
                pl.BlockSpec((1, Kp, pt), lambda b, p: (b, 0, p)),
                pl.BlockSpec((Kp, Cf), lambda b, p: (0, 0)),
                pl.BlockSpec((1, Cf), lambda b, p: (0, 0)),
                pl.BlockSpec((Cf, Nout), lambda b, p: (0, 0)),
                pl.BlockSpec((1, Nout), lambda b, p: (0, 0)),
            ],
            out_specs=pl.BlockSpec((1, 1, Nout), lambda b, p: (b, 0, 0)),
            scratch_shapes=[pltpu.VMEM((1, Cf), jnp.float32)],
        ),
        compiler_params=pltpu.CompilerParams(
            dimension_semantics=("parallel", "arbitrary"),
            vmem_limit_bytes=64 * 1024 * 1024,
        ),
    )(patches_kp, wc, bc, wh, bh)
    return out[:, 0, :]                                      # (B, Nout)


# ------------------------------- JAX glue --------------------------------- #
def im2col_kp(x_nhwc, ksize=3, stride=2, pad=1):
    """im2col producing (B, K, P) with K (=k*k*C) in the second-to-last dim."""
    B, H, W, C = x_nhwc.shape
    xp = jnp.pad(x_nhwc, ((0, 0), (pad, pad), (pad, pad), (0, 0)))
    OH = (H + 2 * pad - ksize) // stride + 1
    OW = (W + 2 * pad - ksize) // stride + 1
    cols = []
    for dy in range(ksize):
        for dx in range(ksize):
            cols.append(xp[:, dy:dy + stride * OH:stride,
                           dx:dx + stride * OW:stride, :])
    patches = jnp.concatenate(cols, axis=-1)                 # (B, OH, OW, K)
    patches = patches.reshape(B, OH * OW, ksize * ksize * C)
    return jnp.transpose(patches, (0, 2, 1)), OH * OW        # (B, K, P), P


def _uniform(key, shape, bound):
    return jax.random.uniform(key, shape, jnp.float32, -bound, bound)


def init_params(key, n_exp=50, n_shape=300):
    """Deterministic parameter init mirroring the PyTorch __init__/init_weights."""
    keys = jax.random.split(key, 12)

    def backbone(kw, kb, cf):
        bound = 1.0 / jnp.sqrt(K_RAW)
        return _uniform(kw, (K_RAW, cf), bound), _uniform(kb, (1, cf), bound)

    def linear(kw, kb, cin_, cout_):
        bound = 1.0 / jnp.sqrt(cin_)
        return _uniform(kw, (cin_, cout_), bound), _uniform(kb, (1, cout_), bound)

    # Pose encoder: small backbone + Linear(feat_small, 6)
    pose_wc, pose_bc = backbone(keys[0], keys[1], FEAT_SMALL)
    pose_wh, pose_bh = linear(keys[2], keys[3], FEAT_SMALL, 6)
    pose_wh = pose_wh * 0.001
    pose_bh = pose_bh * 0.001
    pose_wh = pose_wh.at[:, 3].set(0.0)     # torch: weight.data[3] = 0
    pose_bh = pose_bh.at[0, 3].set(7.0)     # torch: bias.data[3]   = 7

    # Shape encoder: large backbone + Linear(feat_large, n_shape), head zeroed
    shape_wc, shape_bc = backbone(keys[4], keys[5], FEAT_LARGE)
    shape_wh = jnp.zeros((FEAT_LARGE, n_shape), jnp.float32)
    shape_bh = jnp.zeros((1, n_shape), jnp.float32)

    # Expression encoder: large backbone + Linear(feat_large, n_exp + 2 + 3), *0.1
    expr_wc, expr_bc = backbone(keys[6], keys[7], FEAT_LARGE)
    expr_wh, expr_bh = linear(keys[8], keys[9], FEAT_LARGE, n_exp + 2 + 3)
    expr_wh = expr_wh * 0.1
    expr_bh = expr_bh * 0.1

    return dict(
        pose=(pose_wc, pose_bc, pose_wh, pose_bh),
        shape=(shape_wc, shape_bc, shape_wh, shape_bh),
        expr=(expr_wc, expr_bc, expr_wh, expr_bh),
    )


def fuse_params(params, n_exp, n_shape):
    """Pack the three encoders into one backbone matmul + one block head matmul."""
    pose_wc, pose_bc, pose_wh, pose_bh = params["pose"]
    shape_wc, shape_bc, shape_wh, shape_bh = params["shape"]
    expr_wc, expr_bc, expr_wh, expr_bh = params["expr"]

    n_out_raw = 6 + n_shape + (n_exp + 5)
    n_out_pad = _round_up(n_out_raw, 128)
    c0, c1, c2 = 0, FEAT_SMALL, FEAT_SMALL + FEAT_LARGE      # column offsets

    wc = jnp.zeros((K_PAD, CF_PAD), jnp.float32)
    wc = wc.at[:K_RAW, c0:c1].set(pose_wc)
    wc = wc.at[:K_RAW, c1:c2].set(shape_wc)
    wc = wc.at[:K_RAW, c2:CF_RAW].set(expr_wc)

    bc = jnp.zeros((1, CF_PAD), jnp.float32)
    bc = bc.at[:, c0:c1].set(pose_bc)
    bc = bc.at[:, c1:c2].set(shape_bc)
    bc = bc.at[:, c2:CF_RAW].set(expr_bc)

    wh = jnp.zeros((CF_PAD, n_out_pad), jnp.float32)
    wh = wh.at[c0:c1, 0:6].set(pose_wh)
    wh = wh.at[c1:c2, 6:6 + n_shape].set(shape_wh)
    wh = wh.at[c2:CF_RAW, 6 + n_shape:n_out_raw].set(expr_wh)

    bh = jnp.zeros((1, n_out_pad), jnp.float32)
    bh = bh.at[:, 0:6].set(pose_bh)
    bh = bh.at[:, 6:6 + n_shape].set(shape_bh)
    bh = bh.at[:, 6 + n_shape:n_out_raw].set(expr_bh)

    return wc.astype(jnp.bfloat16), bc, wh, bh


@functools.partial(jax.jit, static_argnames=("n_exp", "n_shape"))
def smirk_encoder_forward(img_nchw, params, n_exp=50, n_shape=300):
    # NCHW -> NHWC, im2col once (shared 3x3 / stride-2 geometry), K-in-sublanes.
    x = jnp.transpose(img_nchw, (0, 2, 3, 1)).astype(jnp.float32)
    patches_kp, P = im2col_kp(x, ksize=KSIZE, stride=2, pad=1)   # (B, K_RAW, P)

    # Pad K -> K_PAD (zero rows: no contribution) and P -> multiple of tile.
    B = patches_kp.shape[0]
    pt = P if P <= PT_TARGET else PT_TARGET
    p_pad = _round_up(P, pt)
    patches_pad = jnp.zeros((B, K_PAD, p_pad), jnp.bfloat16)
    patches_pad = patches_pad.at[:, :K_RAW, :P].set(patches_kp.astype(jnp.bfloat16))

    # Fused weights; fold the 1/P avg-pool scale into the head weights.
    wc, bc, wh, bh = fuse_params(params, n_exp, n_shape)
    wh = wh * (1.0 / float(P))

    out = run_fused_encoder(patches_pad, wc, bc, wh, bh, P)      # (B, n_out_pad)

    # Slice the lane-dense output slab into the three encoder heads.
    pose_cam = out[:, 0:6]
    pose_params = pose_cam[:, :3]
    cam = pose_cam[:, 3:6]
    shape_params = out[:, 6:6 + n_shape]
    p = out[:, 6 + n_shape:6 + n_shape + n_exp + 5]
    expression_params = p[:, :n_exp]
    eyelid_params = jnp.clip(p[:, n_exp:n_exp + 2], 0.0, 1.0)
    jaw_params = jnp.concatenate(
        [jnp.maximum(p[:, n_exp + 2:n_exp + 3], 0.0),
         jnp.clip(p[:, n_exp + 3:n_exp + 5], -0.2, 0.2)],
        axis=-1,
    )
    return pose_params, cam, shape_params, expression_params, eyelid_params, jaw_params


if __name__ == "__main__":
    key = jax.random.PRNGKey(0)
    k_img, k_par = jax.random.split(key)

    B, C, H, W = 2, 3, 16, 16
    img = jax.random.normal(k_img, (B, C, H, W), jnp.float32)
    params = init_params(k_par, n_exp=50, n_shape=300)

    outs = smirk_encoder_forward(img, params, n_exp=50, n_shape=300)
    outs = jax.block_until_ready(outs)

    pose_params, cam, shape_params, expression_params, eyelid_params, jaw_params = outs
    assert pose_params.shape == (B, 3)
    assert cam.shape == (B, 3)
    assert shape_params.shape == (B, 300)
    assert expression_params.shape == (B, 50)
    assert eyelid_params.shape == (B, 2)
    assert jaw_params.shape == (B, 3)
    assert bool(jnp.all(jnp.isfinite(pose_params)))
    print("KERNEL_OK")
</pallas_src>

<mosaic_0001>
module attributes {stable_mosaic.version = 11 : i64} {
  func.func @kernel(%arg0: i32, %arg1: i32, %arg2: memref<1x32x64xbf16, #tpu.memory_space<vmem>>, %arg3: memref<32x2560xbf16, #tpu.memory_space<vmem>>, %arg4: memref<1x2560xf32, #tpu.memory_space<vmem>>, %arg5: memref<2560x384xf32, #tpu.memory_space<vmem>>, %arg6: memref<1x384xf32, #tpu.memory_space<vmem>>, %arg7: memref<1x1x384xf32, #tpu.memory_space<vmem>>, %arg8: memref<1x2560xf32, #tpu.memory_space<vmem>>) attributes {dimension_semantics = [#tpu.dimension_semantics<parallel>, #tpu.dimension_semantics<arbitrary>], iteration_bounds = array<i64: 2, 1>, scalar_prefetch = 0 : i64, scratch_operands = 1 : i64, tpu.core_type = #tpu.core_type<tc>, window_params = [{transform_indices = @transform_0, window_bounds = array<i64: 1, 32, 64>}, {pipeline_mode = #tpu.pipeline_mode<synchronous>, transform_indices = @transform_1, window_bounds = array<i64: 32, 2560>}, {pipeline_mode = #tpu.pipeline_mode<synchronous>, transform_indices = @transform_2, window_bounds = array<i64: 1, 2560>}, {pipeline_mode = #tpu.pipeline_mode<synchronous>, transform_indices = @transform_3, window_bounds = array<i64: 2560, 384>}, {pipeline_mode = #tpu.pipeline_mode<synchronous>, transform_indices = @transform_4, window_bounds = array<i64: 1, 384>}, {transform_indices = @transform_5, window_bounds = array<i64: 1, 1, 384>}]} {
    %c0_i32 = arith.constant 0 : i32
    %0 = arith.cmpi eq, %arg1, %c0_i32 : i32
    %1 = arith.extui %0 : i1 to i32
    %c0_i32_0 = arith.constant 0 : i32
    %2 = arith.cmpi ne, %1, %c0_i32_0 : i32
    scf.if %2 {
      %cst_15 = arith.constant 0.000000e+00 : f32
      %20 = vector.broadcast %cst_15 : f32 to vector<1x2560xf32>
      %c0_16 = arith.constant 0 : index
      %c0_17 = arith.constant 0 : index
      %21 = vector.load %arg8[%c0_16, %c0_17] : memref<1x2560xf32, #tpu.memory_space<vmem>>, vector<1x2560xf32>
      tpu.vector_store %arg8[%c0_16, %c0_17], %20 {strides = array<i32>} : memref<1x2560xf32, #tpu.memory_space<vmem>>, vector<1x2560xf32>,
    } else {
    }
    %c0 = arith.constant 0 : index
    %c0_1 = arith.constant 0 : index
    %c0_2 = arith.constant 0 : index
    %3 = vector.load %arg2[%c0, %c0_1, %c0_2] : memref<1x32x64xbf16, #tpu.memory_space<vmem>>, vector<1x32x64xbf16>
    %4 = vector.shape_cast %3 : vector<1x32x64xbf16> to vector<32x64xbf16>
    %c0_3 = arith.constant 0 : index
    %c0_4 = arith.constant 0 : index
    %5 = vector.load %arg3[%c0_3, %c0_4] : memref<32x2560xbf16, #tpu.memory_space<vmem>>, vector<32x2560xbf16>
    %cst = arith.constant dense<0.000000e+00> : vector<64x2560xf32>
    %6 = tpu.matmul %4, %5, %cst {dimension_numbers = #tpu.dot_dimension_numbers<[0], [0], [1], [1], [0, 1, 1, 1], [], []>} : vector<32x64xbf16>, vector<32x2560xbf16>, vector<64x2560xf32> -> vector<64x2560xf32>
    %c0_5 = arith.constant 0 : index
    %c0_6 = arith.constant 0 : index
    %7 = vector.load %arg4[%c0_5, %c0_6] : memref<1x2560xf32, #tpu.memory_space<vmem>>, vector<1x2560xf32>
    %8 = vector.broadcast %7 : vector<1x2560xf32> to vector<64x2560xf32>
    %9 = arith.addf %6, %8 : vector<64x2560xf32>
    %cst_7 = arith.constant 0.000000e+00 : f32
    %10 = vector.broadcast %cst_7 : f32 to vector<64x2560xf32>
    %11 = arith.maximumf %9, %10 : vector<64x2560xf32>
    %c0_8 = arith.constant 0 : index
    %c0_9 = arith.constant 0 : index
    %12 = vector.load %arg8[%c0_8, %c0_9] : memref<1x2560xf32, #tpu.memory_space<vmem>>, vector<1x2560xf32>
    %cst_10 = arith.constant dense<0.000000e+00> : vector<2560xf32>
    %13 = vector.multi_reduction <add>, %11, %cst_10 [0] : vector<64x2560xf32> to vector<2560xf32>
    %14 = vector.shape_cast %13 : vector<2560xf32> to vector<1x2560xf32>
    %15 = arith.addf %12, %14 : vector<1x2560xf32>
    %c0_11 = arith.constant 0 : index
    %c0_12 = arith.constant 0 : index
    %16 = vector.load %arg8[%c0_11, %c0_12] : memref<1x2560xf32, #tpu.memory_space<vmem>>, vector<1x2560xf32>
    tpu.vector_store %arg8[%c0_11, %c0_12], %15 {strides = array<i32>} : memref<1x2560xf32, #tpu.memory_space<vmem>>, vector<1x2560xf32>,
    %c0_i32_13 = arith.constant 0 : i32
    %17 = arith.cmpi eq, %arg1, %c0_i32_13 : i32
    %18 = arith.extui %17 : i1 to i32
    %c0_i32_14 = arith.constant 0 : i32
    %19 = arith.cmpi ne, %18, %c0_i32_14 : i32
    scf.if %19 {
      %c0_15 = arith.constant 0 : index
      %c0_16 = arith.constant 0 : index
      %20 = vector.load %arg8[%c0_15, %c0_16] : memref<1x2560xf32, #tpu.memory_space<vmem>>, vector<1x2560xf32>
      %c0_17 = arith.constant 0 : index
      %c0_18 = arith.constant 0 : index
      %21 = vector.load %arg5[%c0_17, %c0_18] : memref<2560x384xf32, #tpu.memory_space<vmem>>, vector<2560x384xf32>
      %cst_19 = arith.constant dense<0.000000e+00> : vector<1x384xf32>
      %22 = tpu.matmul %20, %21, %cst_19 {dimension_numbers = #tpu.dot_dimension_numbers<[1], [0], [0], [1], [0, 0, 1, 1], [], []>} : vector<1x2560xf32>, vector<2560x384xf32>, vector<1x384xf32> -> vector<1x384xf32>
      %c0_20 = arith.constant 0 : index
      %c0_21 = arith.constant 0 : index
      %23 = vector.load %arg6[%c0_20, %c0_21] : memref<1x384xf32, #tpu.memory_space<vmem>>, vector<1x384xf32>
      %24 = arith.addf %22, %23 : vector<1x384xf32>
      %c0_22 = arith.constant 0 : index
      %c0_23 = arith.constant 0 : index
      %c0_24 = arith.constant 0 : index
      %25 = vector.load %arg7[%c0_22, %c0_23, %c0_24] : memref<1x1x384xf32, #tpu.memory_space<vmem>>, vector<1x1x384xf32>
      %26 = vector.shape_cast %25 : vector<1x1x384xf32> to vector<1x384xf32>
      %27 = vector.shape_cast %24 : vector<1x384xf32> to vector<1x1x384xf32>
      tpu.vector_store %arg7[%c0_22, %c0_23, %c0_24], %27 {strides = array<i32>} : memref<1x1x384xf32, #tpu.memory_space<vmem>>, vector<1x1x384xf32>,
    } else {
    }
    return
  }
  func.func @transform_0(%arg0: i32, %arg1: i32) -> (i32, i32, i32) {
    %c0_i32 = arith.constant 0 : i32
    %c0_i32_0 = arith.constant 0 : i32
    return %arg0, %c0_i32, %arg1 : i32, i32, i32
  }
  func.func @transform_1(%arg0: i32, %arg1: i32) -> (i32, i32) {
    %c0_i32 = arith.constant 0 : i32
    %c0_i32_0 = arith.constant 0 : i32
    %c0_i32_1 = arith.constant 0 : i32
    return %c0_i32, %c0_i32_0 : i32, i32
  }
  func.func @transform_2(%arg0: i32, %arg1: i32) -> (i32, i32) {
    %c0_i32 = arith.constant 0 : i32
    %c0_i32_0 = arith.constant 0 : i32
    %c0_i32_1 = arith.constant 0 : i32
    return %c0_i32, %c0_i32_0 : i32, i32
  }
  func.func @transform_3(%arg0: i32, %arg1: i32) -> (i32, i32) {
    %c0_i32 = arith.constant 0 : i32
    %c0_i32_0 = arith.constant 0 : i32
    %c0_i32_1 = arith.constant 0 : i32
    return %c0_i32, %c0_i32_0 : i32, i32
  }
  func.func @transform_4(%arg0: i32, %arg1: i32) -> (i32, i32) {
    %c0_i32 = arith.constant 0 : i32
    %c0_i32_0 = arith.constant 0 : i32
    %c0_i32_1 = arith.constant 0 : i32
    return %c0_i32, %c0_i32_0 : i32, i32
  }
  func.func @transform_5(%arg0: i32, %arg1: i32) -> (i32, i32, i32) {
    %c0_i32 = arith.constant 0 : i32
    %c0_i32_0 = arith.constant 0 : i32
    %c0_i32_1 = arith.constant 0 : i32
    return %arg0, %c0_i32, %c0_i32_0 : i32, i32, i32
  }
}

</mosaic_0001>

<bundles_post_ra>
// kernel: smirk_encoder_forward.1
= control target key start
LH: loop header
LB: loop body
LE: loop exit
PB: predicated region body
PF: predicated region fallthrough
CT: control target
= control target key end

     0   :  { %s7654_s0 = inlined_call_operand.hbm [shape: bf16[2,32,64], index: 0, kind: input, shape index: {}]   ;;  %s7655_s1 = inlined_call_operand.hbm [shape: bf16[32,2560], index: 1, kind: input, shape index: {}]   ;;  %s7656_s2 = inlined_call_operand.hbm [shape: f32[1,2560], index: 2, kind: input, shape index: {}]   ;;  %s7657_s3 = inlined_call_operand.hbm [shape: f32[2560,384], index: 3, kind: input, shape index: {}]   ;;  %s7658_s4 = inlined_call_operand.hbm [shape: f32[1,384], index: 4, kind: input, shape index: {}]   ;;  %s7659_s5 = inlined_call_operand.hbm [shape: f32[2,1,384], index: 5, kind: output, shape index: {}]  }
   0x1   :  { %7680 = sst [smem:[#allocation29_spill]] %s7655_s1 }
   0x2   :  { %10 = vsyncpa [#allocation4], 0 }
   0x3   :  { %12 = vsyncpa [#allocation4 + $0x1], 0 }
   0x4   :  { %13 = vsyncpa [#allocation7], 0 }
   0x5   :  { %14 = vsyncpa [#allocation10], 0 }
   0x6   :  { %15 = vsyncpa [#allocation5], 0 }
   0x7   :  { %17 = vsyncpa [#allocation5 + $0x1], 0  ;;  %s6573_s18 = smov 0   ;;  %s6575_s19 = smov 0  }
   0x8   :  { %s6577_s20 = smov 0   ;;  %s6579_s21 = smov 0  }
   0x9   :  { %s6581_s22 = smov 0   ;;  %s6583_s23 = smov 0  }
   0xa LB: > { %s4682_s24 = sadd.s32 4294967295, %s6526_s23   ;;  %s4683_s25 = sadd.s32 4294967294, %s6526_s23   ;;  %s6526_s23 = sphi %s6583_s23, %s23_s23   ;;  %s6522_s22 = sphi %s6581_s22, %s7742_s22   ;;  %s6518_s21 = sphi %s6579_s21, %s7741_s21   ;;  %s6514_s20 = sphi %s6577_s20, %s7740_s20   ;;  %s6510_s19 = sphi %s6575_s19, %s7739_s19   ;;  %s6506_s18 = sphi %s6573_s18, %s7738_s18  }
   0xb   : > { %p57_p0 = scmp.ne.s32.totalorder %s6510_s19, %s6506_s18  ;;  %p6607_p1 = scmp.eq.s32.totalorder %s4682_s24, 0 }
   0xc   : > { %p6611_p2 = scmp.eq.s32.totalorder %s4682_s24, 1  ;;  %p171_p3 = scmp.eq.s32.totalorder %s4683_s25, 1 }
   0xd   : > { %s7681_s26 = scalar_select %p6607_p1, 1, 0 }
   0xe   : > { %s7682_s27 = scalar_select %p6611_p2, 1, 0 }
   0xf   : > { %p6617_p4 = por %p6607_p1, %p57_p0  ;;  %p4684_p5 = scmp.ge.s32.totalorder %s6526_s23, 1 }
  0x10   : > { %p6622_p6 = por %p171_p3, %p57_p0  ;;  %p178_p7 = scmp.lt.s32.totalorder %s6526_s23, 3 }
  0x11   : > { %s7683_s28 = scalar_select %p6617_p4, 1, 0 }
  0x12   : > { %s7684_s29 = scalar_select %p6622_p6, 1, 0 }
  0x13   : > { %p6627_p8 = pnand %p4684_p5, %p178_p7  ;;  %s6528_s6 = smov [#allocation6]  }
  0x14   : > { %7685 = sst [smem:[#allocation17_spill]] %s7684_s29  ;;  %s190_s7 = sshll.u32 %s6528_s6, 4  ;;  %s6631_s7 = int_to_ptr.vmem [resolvable:$true] %s190_s7 }
  0x15   : > { %s7686_s30 = scalar_select %p6627_p8, 1, 0 }
  0x16   : > { %p6137_p9 = pneg %p6627_p8  ;;  %s6529_s9 = smov [#allocation9]  }
  0x17   : > { %s214_s10 = sshll.u32 %s6529_s9, 4  ;;  %s7688_s1 = sld [smem:[#allocation29_spill]]  ;;  %s6642_s10 = int_to_ptr.vmem [resolvable:$true] %s214_s10 }
  0x18   : > { %p6638_p11 = pnand %p6137_p9, %p6607_p1 }
  0x1a   : > { %p6652_p13 = pneg %p6638_p11 }
  0x1d   : > { %s6294_s13 = scalar_lea.hbm %s7688_s1, 5120 }
  0x1e   : > { %p6295_p12 = scmp.ne.s32.totalorder %s7688_s1, %s6294_s13  ;;  %p6301_p5 = scmp.lt.u32.totalorder %s6294_s13, %s7688_s1 }
  0x20   : > { %p6297_p0 = pnand %p6652_p13, %p6295_p12 }
  0x22   : > { %p6298_p3 = pneg %p6297_p0 }
  0x24   : > { %p6303_p7 = pnand %p6301_p5, %p6298_p3 }
  0x26   : > { %6306 = shalt.err (!%p6303_p7)
}
  0x27   : > { %s6307_s25 = scalar_lea.vmem %s6631_s7, 5120  ;;  %p6315_p1 = scmp.lt.s32.totalorder %s6631_s7, %s6631_s7 }
  0x28   : > { %p6308_p9 = scmp.ne.s32.totalorder %s6631_s7, %s6307_s25  ;;  %p6316_p4 = scmp.lt.s32.totalorder %s6307_s25, %s6307_s25 }
  0x2a   : > { %p6310_p10 = pnand %p6308_p9, %p6652_p13  ;;  %p6317_p12 = por %p6316_p4, %p6315_p1 }
  0x2c   : > { %p6311_p6 = pneg %p6310_p10 }
  0x2e   : > { %p6318_p0 = pnand %p6317_p12, %p6311_p6 }
  0x30   : > { %6321 = shalt.err (!%p6318_p0)
}
  0x31   : > { %s6530_s6 = smov 1280   ;;  %s6531_s9 = smov 80  }
  0x32   : > { %6140 = dma.hbm_to_vmem [thread:$0]  (!%p6638_p11), %s7688_s1, 5120, %s6631_s7, [#allocation7], %s6530_s6, %s6530_s6, %s6531_s9  }
  0x33   : > { %s6322_s15 = scalar_lea.hbm %s7657_s3, 122880 }
  0x34   : > { %p6323_p1 = scmp.ne.s32.totalorder %s7657_s3, %s6322_s15  ;;  %p6329_p10 = scmp.lt.u32.totalorder %s6322_s15, %s7657_s3 }
  0x36   : > { %p6325_p4 = pnand %p6323_p1, %p6652_p13 }
  0x38   : > { %p6326_p6 = pneg %p6325_p4 }
  0x3a   : > { %p6331_p3 = pnand %p6329_p10, %p6326_p6 }
  0x3c   : > { %6334 = shalt.err (!%p6331_p3)
}
  0x3d   : > { %s6335_s7 = scalar_lea.vmem %s6642_s10, 122880  ;;  %p6343_p12 = scmp.lt.s32.totalorder %s6642_s10, %s6642_s10 }
  0x3e   : > { %p6336_p5 = scmp.ne.s32.totalorder %s6642_s10, %s6335_s7  ;;  %p6344_p0 = scmp.lt.s32.totalorder %s6335_s7, %s6335_s7 }
  0x40   : > { %p6338_p7 = pnand %p6336_p5, %p6652_p13  ;;  %p6345_p1 = por %p6344_p0, %p6343_p12 }
  0x42   : > { %p6339_p9 = pneg %p6338_p7 }
  0x44   : > { %p6346_p4 = pnand %p6345_p1, %p6339_p9 }
  0x46   : > { %6349 = shalt.err (!%p6346_p4)
}
  0x47   : > { %s6532_s6 = smov 384   ;;  %s6533_s29 = smov 24  }
  0x48   : > { %6146 = dma.hbm_to_vmem [thread:$0]  (!%p6638_p11), %s7657_s3, 122880, %s6642_s10, [#allocation10], %s6532_s6, %s6532_s6, %s6533_s29  }
  0x49   : > { %s6534_s12 = smov [#allocation8]   ;;  %s6535_s14 = smov [#allocation11]  }
  0x4a   : > { %s204_s13 = sshll.u32 %s6534_s12, 4  ;;  %s228_s15 = sshll.u32 %s6535_s14, 4  ;;  %s205_s13 = int_to_ptr.vmem [resolvable:$true] %s204_s13  ;;  %s6696_s15 = int_to_ptr.vmem [resolvable:$true] %s228_s15 }
  0x4b   : > { %s6350_s25 = scalar_lea.hbm %s7656_s2, 320 }
  0x4c   : > { %p6351_p6 = scmp.ne.s32.totalorder %s7656_s2, %s6350_s25  ;;  %p6357_p5 = scmp.lt.u32.totalorder %s6350_s25, %s7656_s2 }
  0x4e   : > { %p6353_p10 = pnand %p6351_p6, %p6652_p13 }
  0x50   : > { %p6354_p3 = pneg %p6353_p10 }
  0x52   : > { %p6359_p7 = pnand %p6357_p5, %p6354_p3 }
  0x54   : > { %6362 = shalt.err (!%p6359_p7)
}
  0x55   : > { %s6363_s6 = scalar_lea.vmem %s205_s13, 320  ;;  %p6371_p1 = scmp.lt.s32.totalorder %s205_s13, %s205_s13 }
  0x56   : > { %p6364_p9 = scmp.ne.s32.totalorder %s205_s13, %s6363_s6  ;;  %p6372_p4 = scmp.lt.s32.totalorder %s6363_s6, %s6363_s6 }
  0x58   : > { %p6366_p12 = pnand %p6364_p9, %p6652_p13  ;;  %p6373_p8 = por %p6372_p4, %p6371_p1 }
  0x5a   : > { %p6367_p0 = pneg %p6366_p12 }
  0x5c   : > { %p6374_p2 = pnand %p6373_p8, %p6367_p0 }
  0x5e   : > { %6377 = shalt.err (!%p6374_p2)
}
  0x5f   : > { %6143 = dma.hbm_to_vmem [thread:$0]  (!%p6638_p11), %s7656_s2, 320, %s205_s13, [#allocation7]  }
  0x60   : > { %s6378_s14 = scalar_lea.hbm %s7658_s4, 48 }
  0x61   : > { %p6379_p6 = scmp.ne.s32.totalorder %s7658_s4, %s6378_s14  ;;  %p6385_p2 = scmp.lt.u32.totalorder %s6378_s14, %s7658_s4 }
  0x63   : > { %p6381_p10 = pnand %p6379_p6, %p6652_p13 }
  0x65   : > { %p6382_p3 = pneg %p6381_p10 }
  0x67   : > { %p6387_p8 = pnand %p6385_p2, %p6382_p3 }
  0x69   : > { %6390 = shalt.err (!%p6387_p8)
}
  0x6a   : > { %s6391_s13 = scalar_lea.vmem %s6696_s15, 48  ;;  %s6398_s9 = scalar_lea.vmem %s6696_s15, 64 }
  0x6b   : > { %p6392_p5 = scmp.ne.s32.totalorder %s6696_s15, %s6391_s13  ;;  %p6399_p12 = scmp.lt.s32.totalorder %s6696_s15, %s6696_s15 }
  0x6c   : > { %p6400_p0 = scmp.lt.s32.totalorder %s6398_s9, %s6391_s13 }
  0x6d   : > { %p6394_p7 = pnand %p6392_p5, %p6652_p13 }
  0x6e   : > { %p6401_p1 = por %p6400_p0, %p6399_p12 }
  0x6f   : > { %p6395_p9 = pneg %p6394_p7 }
  0x71   : > { %p6402_p4 = pnand %p6401_p1, %p6395_p9 }
  0x73   : > { %6405 = shalt.err (!%p6402_p4)
}
  0x74   : > { %6149 = dma.hbm_to_vmem [thread:$0]  (!%p6638_p11), %s7658_s4, 48, %s6696_s15, [#allocation10]  }
  0x75   : > { %s35_s16 = sadd.s32 1, %s6522_s22  ;;  %s44_s1 = sadd.s32 1, %s6514_s20 }
  0x76   : > { %p37_p13 = scmp.ge.s32.totalorder %s35_s16, 2  ;;  %p51_p6 = scmp.ne.s32.totalorder %s6514_s20, %s6510_s19 }
  0x77   : > { %p52_p10 = scmp.eq.s32.totalorder %s6526_s23, 0  ;;  %p6162_p3 = scmp.lt.s32.totalorder %s6526_s23, 2 }
  0x78   : > { %s7744_s16 = smov (%p37_p13, %s35_s16), 0  ;;  %p7690_p8 = scmp.ne.s32.totalorder %s7682_s27, 0 }
  0x79   : > { %p53_p2 = por %p52_p10, %p51_p6  ;;  %s39_s29 = ssub.s32 %s6522_s22, %s7744_s16 }
  0x7a   : > { %p6750_p5 = por %p7690_p8, %p51_p6  ;;  %s239_s11 = sand.u32 1, %s6514_s20  }
  0x7b   : > { %p42_p7 = scmp.eq.s32.totalorder %s39_s29, 0  ;;  %s4690_s15 = sshll.u32 %s239_s11, 4 }
  0x7c   : > { %s4784_s12 = sshll.u32 %s6522_s22, 8  ;;  %s243_s27 = scalar_lea.vmem [#allocation3], %s4690_s15 }
  0x7d   : > { %s6759_s14 = scalar_select %p42_p7, %s6514_s20, %s44_s1  }
  0x7e   : > { %s6764_s25 = scalar_lea.hbm %s7654_s0, %s4784_s12  ;;  %s251_s7 = sshll.u32 %s243_s27, 4  ;;  %s6772_s7 = int_to_ptr.vmem [resolvable:$true] %s251_s7 }
  0x7f   : > { %p6768_p11 = pnand %p6162_p3, %p53_p2  ;;  %s6774_s9 = scalar_lea.sflag [#allocation4], %s239_s11 }
  0x80   : > { %s6406_s10 = scalar_lea.hbm %s6764_s25, 256  ;;  %s6411_s29 = scalar_lea.hbm %s7654_s0, 512 }
  0x81   : > { %p6407_p9 = scmp.ne.s32.totalorder %s6764_s25, %s6406_s10  ;;  %p6408_p12 = pneg %p6768_p11 }
  0x82   : > { %p6412_p4 = scmp.lt.u32.totalorder %s6764_s25, %s7654_s0  ;;  %p6413_p13 = scmp.lt.u32.totalorder %s6411_s29, %s6406_s10 }
  0x83   : > { %p6409_p0 = pnand %p6408_p12, %p6407_p9  ;;  %p6415_p10 = scmp.lt.u32.totalorder %s6406_s10, %s6764_s25 }
  0x84   : > { %p6414_p6 = por %p6413_p13, %p6412_p4 }
  0x85   : > { %p6410_p1 = pneg %p6409_p0 }
  0x86   : > { %p6416_p3 = por %p6415_p10, %p6414_p6 }
  0x88   : > { %p6417_p2 = pnand %p6416_p3, %p6410_p1 }
  0x8a   : > { %6420 = shalt.err (!%p6417_p2)
}
  0x8b   : > { %s6421_s11 = scalar_lea.vmem %s6772_s7, 256  ;;  %s6536_s17 = smov [#allocation3]  }
  0x8c   : > { %p6422_p8 = scmp.ne.s32.totalorder %s6772_s7, %s6421_s11  ;;  %s6426_s24 = sshll.u32 %s6536_s17, 4  ;;  %s6427_s24 = int_to_ptr.vmem [resolvable:$false] %s6426_s24 }
  0x8d   : > { %s6428_s27 = scalar_lea.vmem %s6427_s24, 512  ;;  %p6429_p0 = scmp.lt.s32.totalorder %s6772_s7, %s6427_s24 }
  0x8e   : > { %p6424_p7 = pnand %p6422_p8, %p6408_p12  ;;  %p6430_p4 = scmp.lt.s32.totalorder %s6428_s27, %s6421_s11 }
  0x90   : > { %p6425_p9 = pneg %p6424_p7  ;;  %p6431_p13 = por %p6430_p4, %p6429_p0 }
  0x92   : > { %p6432_p6 = pnand %p6431_p13, %p6425_p9 }
  0x94   : > { %6435 = shalt.err (!%p6432_p6)
}
  0x95   : > { %s6537_s10 = smov 64   ;;  %s6538_s6 = smov 4  }
  0x96   : > { %6153 = dma.hbm_to_vmem [thread:$0]  (!%p6768_p11), %s6764_s25, 256, %s6772_s7, %s6774_s9, %s6537_s10, %s6537_s10, %s6538_s6  }
  0x97   : > { %p7693_p12 = scmp.ne.s32.totalorder %s7686_s30, 0 }
  0x99   : > { %263 = sbr.rel (%p7693_p12) target bundleno = 1306 (0x51a), region = 40 }
  0xa0   : > { %s6805_s1 = sand.u32 1, %s6510_s19   ;;  %p7694_p1 = scmp.ne.s32.totalorder %s7683_s28, 0 }
  0xa1   : > { %s4694_s29 = sshll.u32 %s6805_s1, 4  ;;  %s266_s15 = scalar_lea.sflag [#allocation4], %s6805_s1 }
  0xa2   : > { %s269_s12 = scalar_lea.vmem [#allocation3], %s4694_s29 }
  0xa3   : > { %6489 = dma.done.wait (%p7694_p1), %s266_s15, 256  }
  0xa4   : > { %6491 = vsyncadd (%p7694_p1), %s266_s15, 4294967040  ;;  %p7695_p10 = scmp.ne.s32.totalorder %s7681_s26, 0 }
  0xa6   : > { %6493 = dma.done.wait (%p7695_p10), [#allocation7], 5440  }
  0xa7   : > { %6495 = vsyncadd (%p7695_p10), [#allocation7], 4294961856 }
  0xa8   : > { %6497 = dma.done.wait (%p7695_p10), [#allocation10], 122928  }
  0xa9   : > { %6499 = vsyncadd (%p7695_p10), [#allocation10], 4294844368  ;;  %v6539_v0 = vmov 0   ;;  %v6229_v1 = vld [vmem:[%s269_s12] sm:$0xff]   ;;  %v6230_v2 = vld [vmem:[%s269_s12 + $0x8] sm:$0xff]   ;;  %vm702_vm0 = vcmask 261120  }
  0xaa   : > { %747 = vmatprep.mubr.bf16.mxu1 %v6539_v0  ;;  %893 = vmatprep.mubr.bf16.mxu0 %v6539_v0  ;;  %v6231_v3 = vld [vmem:[#allocation6 + $0x4] ss:$80 sps:$4 sm:$0xff]   ;;  %v6233_v4 = vld [vmem:[#allocation6] ss:$80 sps:$4 sm:$0xff]   ;;  %v6245_v11 = vld [vmem:[#allocation6 + $0xc] ss:$80 sps:$4 sm:$0xff]  }
  0xab   : > { %486 = vxpose.xlu0.c.b16.start [1/2] (short) (narrow) %v6229_v1, 64  ;;  %715 = vmatprep.subr.bf16.mxu1 %v6231_v3  ;;  %v6234_v5 = vld [vmem:[#allocation6 + $0x14] ss:$80 sps:$4 sm:$0xff]   ;;  %v6236_v6 = vld [vmem:[#allocation6 + $0x10] ss:$80 sps:$4 sm:$0xff]   ;;  %s6115_s26 = smul.u32 3, %s6805_s1 }
  0xac   : > { %716 = vmatpush1.bf16.msra.mxu1 %v6233_v4  ;;  %v6237_v7 = vld [vmem:[#allocation6 + $0xa4] ss:$80 sps:$4 sm:$0xff]   ;;  %v6239_v8 = vld [vmem:[#allocation6 + $0xa0] ss:$80 sps:$4 sm:$0xff]   ;;  %861 = vmatprep.subr.bf16.mxu0 %v6234_v5  ;;  %v6243_v13 = vld [vmem:[#allocation6 + $0x8] ss:$80 sps:$4 sm:$0xff]  }
  0xad   : > { %v6240_v9 = vld [vmem:[#allocation6 + $0xb4] ss:$80 sps:$4 sm:$0xff]   ;;  %862 = vmatpush1.bf16.msra.mxu0 %v6236_v6  ;;  %717 = vmatprep.subr.bf16.mxu1 %v6237_v7  ;;  %v6242_v10 = vld [vmem:[#allocation6 + $0xb0] ss:$80 sps:$4 sm:$0xff]   ;;  %v6248_v14 = vld [vmem:[#allocation6 + $0xac] ss:$80 sps:$4 sm:$0xff]  }
  0xae   : > { %863 = vmatprep.subr.bf16.mxu0 %v6240_v9  ;;  %v6251_v12 = vld [vmem:[#allocation6 + $0x24] ss:$80 sps:$4 sm:$0xff]   ;;  %v6249_v16 = vld [vmem:[#allocation6 + $0x20] ss:$80 sps:$4 sm:$0xff]   ;;  %v6246_v18 = vld [vmem:[#allocation6 + $0xa8] ss:$80 sps:$4 sm:$0xff]  }
  0xaf   : > { %487 = vxpose.xlu0.c.b16.end [2/2] (short) (narrow) %v6230_v2, 64  ;;  %v6254_v17 = vld [vmem:[#allocation6 + $0xc4] ss:$80 sps:$4 sm:$0xff]   ;;  %v6257_v19 = vld [vmem:[#allocation6 + $0x1c] ss:$80 sps:$4 sm:$0xff]   ;;  %s6116_s28 = smul.u32 48, %s6518_s21 }
  0xb0   : > { %718 = vmatpush1.bf16.msra.mxu1 %v6239_v8  ;;  %v6252_v20 = vld [vmem:[#allocation6 + $0xc0] ss:$80 sps:$4 sm:$0xff]   ;;  %v6263_v22 = vld [vmem:[#allocation6 + $0x34] ss:$80 sps:$4 sm:$0xff]   ;;  %v6255_v25 = vld [vmem:[#allocation6 + $0x18] ss:$80 sps:$4 sm:$0xff]  }
  0xb1   : > { %788 = vmatprep.subr.bf16.mxu1 %v6245_v11  ;;  %864 = vmatpush1.bf16.msra.mxu0 %v6242_v10  ;;  %v6260_v26 = vld [vmem:[#allocation6 + $0xbc] ss:$80 sps:$4 sm:$0xff]   ;;  %v6261_v27 = vld [vmem:[#allocation6 + $0x30] ss:$80 sps:$4 sm:$0xff]   ;;  %v6266_v28 = vld [vmem:[#allocation6 + $0xd4] ss:$80 sps:$4 sm:$0xff]   ;;  %s7605_s9 = scalar_lea.hbm %s7659_s5, %s6116_s28 }
  0xb2   : > { %1007 = vmatprep.subr.bf16.mxu0 %v6251_v12  ;;  %v6258_v29 = vld [vmem:[#allocation6 + $0xb8] ss:$80 sps:$4 sm:$0xff]   ;;  %v6269_v30 = vld [vmem:[#allocation6 + $0x2c] ss:$80 sps:$4 sm:$0xff]   ;;  %v6264_v31 = vld [vmem:[#allocation6 + $0xd0] ss:$80 sps:$4 sm:$0xff]  }
  0xb3   : > { %v6272_v32 = vld [vmem:[#allocation6 + $0x44] ss:$80 sps:$4 sm:$0xff]   ;;  %v6267_v33 = vld [vmem:[#allocation6 + $0x28] ss:$80 sps:$4 sm:$0xff]   ;;  %v6270_v34 = vld [vmem:[#allocation6 + $0x40] ss:$80 sps:$4 sm:$0xff]  }
  0xb4   : > { %v6275_v35 = vld [vmem:[#allocation6 + $0xcc] ss:$80 sps:$4 sm:$0xff]   ;;  %v6278_v36 = vld [vmem:[#allocation6 + $0xe4] ss:$80 sps:$4 sm:$0xff]   ;;  %v6273_v37 = vld [vmem:[#allocation6 + $0xc8] ss:$80 sps:$4 sm:$0xff]  }
  0xb5   : > { %v6276_v38 = vld [vmem:[#allocation6 + $0xe0] ss:$80 sps:$4 sm:$0xff]   ;;  %v6281_v39 = vld [vmem:[#allocation6 + $0x3c] ss:$80 sps:$4 sm:$0xff]   ;;  %v6279_v40 = vld [vmem:[#allocation6 + $0x38] ss:$80 sps:$4 sm:$0xff]  }
  0xb6   : > { %v6284_v41 = vld [vmem:[#allocation6 + $0xdc] ss:$80 sps:$4 sm:$0xff]   ;;  %v6282_v42 = vld [vmem:[#allocation6 + $0xd8] ss:$80 sps:$4 sm:$0xff]   ;;  %s311_s30 = scalar_lea.vmem [#allocation12], %s6115_s26  ;;  %s4550_s11 = scalar_lea.sflag [#allocation5], %s6805_s1 }
  0xb7   : > { %v6287_v43 = vld [vmem:[#allocation6 + $0x4c] ss:$80 sps:$4 sm:$0xff]   ;;  %v6285_v44 = vld [vmem:[#allocation6 + $0x48] ss:$80 sps:$4 sm:$0xff]   ;;  %s4564_s25 = sshll.u32 %s311_s30, 4  ;;  %s6542_s17 = smov [#allocation12]   ;;  %s7607_s25 = int_to_ptr.vmem [resolvable:$true] %s4564_s25 }
  0xb8   : > { %v6290_v45 = vld [vmem:[#allocation6 + $0xec] ss:$80 sps:$4 sm:$0xff]   ;;  %v6288_v46 = vld [vmem:[#allocation6 + $0xe8] ss:$80 sps:$4 sm:$0xff]   ;;  %s6436_s21 = scalar_lea.vmem %s7607_s25, 48  ;;  %s6440_s24 = sshll.u32 %s6542_s17, 4  ;;  %s6441_s24 = int_to_ptr.vmem [resolvable:$false] %s6440_s24 }
  0xb9   : > { %v2030_v47 = vld [vmem:[#allocation9 + $0x8] sm:$0xff]  ;;  %v2033_v48 = vld [vmem:[#allocation9 + $0x20] sm:$0xff]  ;;  %v2224_v54 = vld [vmem:[#allocation9 + $0x618] sm:$0xff]  ;;  %p6437_p11 = scmp.ne.s32.totalorder %s7607_s25, %s6436_s21  ;;  %s6442_s27 = scalar_lea.vmem %s6441_s24, 96 }
  0xba   : > { %v2222_v49 = vld [vmem:[#allocation9 + $0x608] sm:$0xff]  ;;  %v5135_v50 = vpack.c.bf16 %v2033_v48, %v2030_v47  ;;  %v2225_v51 = vld [vmem:[#allocation9 + $0x620] sm:$0xff]  ;;  %v2228_v56 = vld [vmem:[#allocation9 + $0x638] sm:$0xff]  ;;  %p6443_p8 = scmp.lt.s32.totalorder %s7607_s25, %s6441_s24  ;;  %p6444_p7 = scmp.lt.s32.totalorder %s6442_s27, %s6436_s21 }
  0xbb   : > { %v5263_v52 = vpack.c.bf16 %v2225_v51, %v2222_v49  ;;  %v2221_v53 = vld [vmem:[#allocation9 + $0x600] sm:$0xff]  ;;  %v2231_v57 = vld [vmem:[#allocation9 + $0x650] sm:$0xff]  ;;  %v2230_v60 = vld [vmem:[#allocation9 + $0x648] sm:$0xff]  ;;  %p6438_p3 = pnand %p6437_p11, %p6750_p5 }
  0xbc   : > { %v5265_v55 = vpack.c.bf16 %v2224_v54, %v2221_v53  ;;  %v5267_v58 = vpack.c.bf16 %v2231_v57, %v2228_v56  ;;  %v2227_v59 = vld [vmem:[#allocation9 + $0x630] sm:$0xff]  ;;  %v2029_v62 = vld [vmem:[#allocation9] sm:$0xff]  ;;  %v2234_v63 = vld [vmem:[#allocation9 + $0x668] sm:$0xff]  ;;  %p6445_p9 = por %p6444_p7, %p6443_p8 }
  0xbd   : > { %v5269_v61 = vpack.c.bf16 %v2230_v60, %v2227_v59  ;;  %v2032_v1 = vld [vmem:[#allocation9 + $0x18] sm:$0xff]  ;;  %v2237_v3 = vld [vmem:[#allocation9 + $0x680] sm:$0xff]  ;;  %v2039_v4 = vld [vmem:[#allocation9 + $0x50] sm:$0xff]  ;;  %p6439_p2 = pneg %p6438_p3 }
  0xbe   : > { %v2036_v2 = vld [vmem:[#allocation9 + $0x38] sm:$0xff]  ;;  %v5271_v5 = vpack.c.bf16 %v2237_v3, %v2234_v63  ;;  %v2233_v6 = vld [vmem:[#allocation9 + $0x660] sm:$0xff]  ;;  %v5137_v9 = vpack.c.bf16 %v2032_v1, %v2029_v62  ;;  %v2035_v10 = vld [vmem:[#allocation9 + $0x30] sm:$0xff] }
  0xbf   : > { %v2236_v7 = vld [vmem:[#allocation9 + $0x678] sm:$0xff]  ;;  %v5139_v12 = vpack.c.bf16 %v2039_v4, %v2036_v2  ;;  %v2053_v49 = vld [vmem:[#allocation9 + $0xc0] sm:$0xff]  ;;  %v2059_v60 = vld [vmem:[#allocation9 + $0xf0] sm:$0xff]  ;;  %p6446_p0 = pnand %p6445_p9, %p6439_p2 }
  0xc0   : > { %v5273_v8 = vpack.c.bf16 %v2236_v7, %v2233_v6  ;;  %v2240_v11 = vld [vmem:[#allocation9 + $0x698] sm:$0xff]  ;;  %v2261_v54 = vld [vmem:[#allocation9 + $0x740] sm:$0xff]  ;;  %v2062_v63 = vld [vmem:[#allocation9 + $0x108] sm:$0xff] }
  0xc1   : > { %v2060_v53 = vld [vmem:[#allocation9 + $0xf8] sm:$0xff]  ;;  %v2257_v57 = vld [vmem:[#allocation9 + $0x720] sm:$0xff]  ;;  %v2066_v1 = vld [vmem:[#allocation9 + $0x128] sm:$0xff] }
  0xc2   : > { %v2267_v2 = vld [vmem:[#allocation9 + $0x770] sm:$0xff]  ;;  %v2069_v3 = vld [vmem:[#allocation9 + $0x140] sm:$0xff]  ;;  %v2266_v6 = vld [vmem:[#allocation9 + $0x768] sm:$0xff] }
 0x111   : > { %v6823_v15 = vpop.trf.xlu0 }
 0x112   : > { %4741 = vmatmul.mubr.msk.bf16.vlgmr.msra.gmra.mrb[0].mxu1 %vm702_vm0, %v6823_v15  ;;  %4749 = vmatmul.mubr.msk.bf16.vlgmr.msra.gmra.mrb[0].mxu0 %vm702_vm0, %v6823_v15 }
 0x113   : > { %789 = vmatpush1.bf16.msra.mxu1 %v6243_v13  ;;  %757 = vmatprep.mubr.bf16.mxu1 %v6539_v0  ;;  %v2038_v13 = vld [vmem:[#allocation9 + $0x48] sm:$0xff] }
 0x114   : > { %903 = vmatprep.mubr.bf16.mxu0 %v6539_v0  ;;  %790 = vmatprep.subr.bf16.mxu1 %v6248_v14  ;;  %v2042_v14 = vld [vmem:[#allocation9 + $0x68] sm:$0xff] }
 0x115   : > { %1008 = vmatpush1.bf16.msra.mxu0 %v6249_v16  ;;  %v6831_v21 = vpop.trf.xlu0  ;;  %v2243_v16 = vld [vmem:[#allocation9 + $0x6b0] sm:$0xff] }
 0x116   : > { %1009 = vmatprep.subr.bf16.mxu0 %v6254_v17  ;;  %v2045_v17 = vld [vmem:[#allocation9 + $0x80] sm:$0xff] }
 0x117   : > { %791 = vmatpush1.bf16.msra.mxu1 %v6246_v18  ;;  %v5275_v18 = vpack.c.bf16 %v2243_v16, %v2240_v11  ;;  %v5159_v11 = vpack.c.bf16 %v2069_v3, %v2066_v1  ;;  %v2075_v16 = vld [vmem:[#allocation9 + $0x170] sm:$0xff]  ;;  %v2293_v1 = vld [vmem:[#allocation9 + $0x840] sm:$0xff]  ;;  %v7665_v3 = vlaneseq }
 0x118   : > { %934 = vmatprep.subr.bf16.mxu1 %v6257_v19  ;;  %v2239_v19 = vld [vmem:[#allocation9 + $0x690] sm:$0xff] }
 0x119   : > { %1010 = vmatpush1.bf16.msra.mxu0 %v6252_v20  ;;  %v6839_v23 = vpop.trf.xlu0  ;;  %v2242_v20 = vld [vmem:[#allocation9 + $0x6a8] sm:$0xff] }
 0x11a   : > { %4742 = vmatmul.mubr.msk.bf16.gmra.mrb[4].mxu1 %vm702_vm0, %v6831_v21  ;;  %4750 = vmatmul.mubr.msk.bf16.gmra.mrb[4].mxu0 %vm702_vm0, %v6831_v21 }
 0x11b   : > { %767 = vmatprep.mubr.bf16.mxu1 %v6539_v0  ;;  %913 = vmatprep.mubr.bf16.mxu0 %v6539_v0 }
 0x11c   : > { %1153 = vmatprep.subr.bf16.mxu0 %v6263_v22  ;;  %v5277_v22 = vpack.c.bf16 %v2242_v20, %v2239_v19  ;;  %v2272_v19 = vld [vmem:[#allocation9 + $0x798] sm:$0xff] }
 0x11d   : > { %v6847_v24 = vpop.trf.xlu0 }
 0x122   : > { %4743 = vmatmul.mubr.msk.bf16.gmra.mrb[8].mxu1 %vm702_vm0, %v6839_v23  ;;  %4751 = vmatmul.mubr.msk.bf16.gmra.mrb[8].mxu0 %vm702_vm0, %v6839_v23 }
 0x123   : > { %777 = vmatprep.mubr.bf16.mxu1 %v6539_v0  ;;  %923 = vmatprep.mubr.bf16.mxu0 %v6539_v0 }
 0x12a   : > { %4744 = vmatmul.mubr.msk.bf16.gmra.mrb[12].mxu1 %vm702_vm0, %v6847_v24  ;;  %4752 = vmatmul.mubr.msk.bf16.gmra.mrb[12].mxu0 %vm702_vm0, %v6847_v24 }
 0x12b   : > { %820 = vmatprep.mubr.bf16.mxu1 %v6539_v0  ;;  %1039 = vmatprep.mubr.bf16.mxu0 %v6539_v0 }
 0x132   : > { %4745 = vmatmul.mubr.msk.bf16.vlgmr.msra.gmra.mrb[16].mxu1 %vm702_vm0, %v6823_v15  ;;  %4757 = vmatmul.mubr.msk.bf16.vlgmr.msra.gmra.mrb[16].mxu0 %vm702_vm0, %v6823_v15 }
 0x133   : > { %935 = vmatpush1.bf16.msra.mxu1 %v6255_v25  ;;  %830 = vmatprep.mubr.bf16.mxu1 %v6539_v0  ;;  %v5141_v25 = vpack.c.bf16 %v2038_v13, %v2035_v10  ;;  %v2270_v10 = vld [vmem:[#allocation9 + $0x788] sm:$0xff]  ;;  %v2072_v13 = vld [vmem:[#allocation9 + $0x158] sm:$0xff] }
 0x134   : > { %1049 = vmatprep.mubr.bf16.mxu0 %v6539_v0  ;;  %936 = vmatprep.subr.bf16.mxu1 %v6260_v26  ;;  %v2041_v26 = vld [vmem:[#allocation9 + $0x60] sm:$0xff] }
 0x135   : > { %1154 = vmatpush1.bf16.msra.mxu0 %v6261_v27  ;;  %v2246_v27 = vld [vmem:[#allocation9 + $0x6c8] sm:$0xff] }
 0x136   : > { %1155 = vmatprep.subr.bf16.mxu0 %v6266_v28  ;;  %v5143_v28 = vpack.c.bf16 %v2045_v17, %v2042_v14  ;;  %v2273_v14 = vld [vmem:[#allocation9 + $0x7a0] sm:$0xff] }
 0x137   : > { %937 = vmatpush1.bf16.msra.mxu1 %v6258_v29  ;;  %v2044_v29 = vld [vmem:[#allocation9 + $0x78] sm:$0xff]  ;;  %v5295_v17 = vpack.c.bf16 %v2273_v14, %v2270_v10  ;;  %v2102_v10 = vld [vmem:[#allocation9 + $0x248] sm:$0xff]  ;;  %v2299_v14 = vld [vmem:[#allocation9 + $0x870] sm:$0xff] }
 0x138   : > { %1080 = vmatprep.subr.bf16.mxu1 %v6269_v30  ;;  %v2048_v30 = vld [vmem:[#allocation9 + $0x98] sm:$0xff] }
 0x139   : > { %1156 = vmatpush1.bf16.msra.mxu0 %v6264_v31  ;;  %v2249_v31 = vld [vmem:[#allocation9 + $0x6e0] sm:$0xff] }
 0x13a   : > { %4746 = vmatmul.mubr.msk.bf16.gmra.mrb[20].mxu1 %vm702_vm0, %v6831_v21  ;;  %4758 = vmatmul.mubr.msk.bf16.gmra.mrb[20].mxu0 %vm702_vm0, %v6831_v21 }
 0x13b   : > { %840 = vmatprep.mubr.bf16.mxu1 %v6539_v0  ;;  %1059 = vmatprep.mubr.bf16.mxu0 %v6539_v0 }
 0x13c   : > { %1299 = vmatprep.subr.bf16.mxu0 %v6272_v32  ;;  %v2051_v32 = vld [vmem:[#allocation9 + $0xb0] sm:$0xff] }
 0x142   : > { %4747 = vmatmul.mubr.msk.bf16.gmra.mrb[24].mxu1 %vm702_vm0, %v6839_v23  ;;  %4759 = vmatmul.mubr.msk.bf16.gmra.mrb[24].mxu0 %vm702_vm0, %v6839_v23 }
 0x143   : > { %850 = vmatprep.mubr.bf16.mxu1 %v6539_v0  ;;  %1069 = vmatprep.mubr.bf16.mxu0 %v6539_v0 }
 0x14a   : > { %4748 = vmatmul.mubr.msk.bf16.gmra.mrb[28].mxu1 %vm702_vm0, %v6847_v24  ;;  %4760 = vmatmul.mubr.msk.bf16.gmra.mrb[28].mxu0 %vm702_vm0, %v6847_v24 }
 0x14b   : > { %966 = vmatprep.mubr.bf16.mxu1 %v6539_v0  ;;  %1185 = vmatprep.mubr.bf16.mxu0 %v6539_v0 }
 0x152   : > { %4753 = vmatmul.mubr.msk.bf16.vlgmr.msra.gmra.mrb[32].mxu1 %vm702_vm0, %v6823_v15  ;;  %4765 = vmatmul.mubr.msk.bf16.vlgmr.msra.gmra.mrb[32].mxu0 %vm702_vm0, %v6823_v15 }
 0x153   : > { %976 = vmatprep.mubr.bf16.mxu1 %v6539_v0  ;;  %1195 = vmatprep.mubr.bf16.mxu0 %v6539_v0 }
 0x154   : > { %1081 = vmatpush1.bf16.msra.mxu1 %v6267_v33  ;;  %1300 = vmatpush1.bf16.msra.mxu0 %v6270_v34  ;;  %v5279_v33 = vpack.c.bf16 %v2249_v31, %v2246_v27  ;;  %v2245_v34 = vld [vmem:[#allocation9 + $0x6c0] sm:$0xff]  ;;  %v2078_v27 = vld [vmem:[#allocation9 + $0x188] sm:$0xff]  ;;  %v2275_v31 = vld [vmem:[#allocation9 + $0x7b0] sm:$0xff] }
 0x155   : > { %1082 = vmatprep.subr.bf16.mxu1 %v6275_v35  ;;  %1301 = vmatprep.subr.bf16.mxu0 %v6278_v36  ;;  %v2248_v35 = vld [vmem:[#allocation9 + $0x6d8] sm:$0xff] }
 0x156   : > { %v5281_v36 = vpack.c.bf16 %v2248_v35, %v2245_v34  ;;  %v2077_v35 = vld [vmem:[#allocation9 + $0x180] sm:$0xff] }
 0x158   : > { %1083 = vmatpush1.bf16.msra.mxu1 %v6273_v37  ;;  %1302 = vmatpush1.bf16.msra.mxu0 %v6276_v38  ;;  %v2047_v37 = vld [vmem:[#allocation9 + $0x90] sm:$0xff]  ;;  %v2252_v38 = vld [vmem:[#allocation9 + $0x6f8] sm:$0xff] }
 0x159   : > { %1226 = vmatprep.subr.bf16.mxu1 %v6281_v39  ;;  %5264 = vmatprep.subr.bf16.mxu0 %v5263_v52  ;;  %v5147_v39 = vpack.c.bf16 %v2051_v32, %v2048_v30  ;;  %v2056_v52 = vld [vmem:[#allocation9 + $0xd8] sm:$0xff]  ;;  %v2278_v32 = vld [vmem:[#allocation9 + $0x7c8] sm:$0xff] }
 0x15a   : > { %4754 = vmatmul.mubr.msk.bf16.gmra.mrb[36].mxu1 %vm702_vm0, %v6831_v21  ;;  %4766 = vmatmul.mubr.msk.bf16.gmra.mrb[36].mxu0 %vm702_vm0, %v6831_v21 }
 0x15b   : > { %986 = vmatprep.mubr.bf16.mxu1 %v6539_v0  ;;  %1205 = vmatprep.mubr.bf16.mxu0 %v6539_v0 }
 0x162   : > { %4755 = vmatmul.mubr.msk.bf16.gmra.mrb[40].mxu1 %vm702_vm0, %v6839_v23  ;;  %4767 = vmatmul.mubr.msk.bf16.gmra.mrb[40].mxu0 %vm702_vm0, %v6839_v23 }
 0x163   : > { %996 = vmatprep.mubr.bf16.mxu1 %v6539_v0  ;;  %1215 = vmatprep.mubr.bf16.mxu0 %v6539_v0 }
 0x16a   : > { %4756 = vmatmul.mubr.msk.bf16.gmra.mrb[44].mxu1 %vm702_vm0, %v6847_v24  ;;  %4768 = vmatmul.mubr.msk.bf16.gmra.mrb[44].mxu0 %vm702_vm0, %v6847_v24 }
 0x16b   : > { %1112 = vmatprep.mubr.bf16.mxu1 %v6539_v0  ;;  %1331 = vmatprep.mubr.bf16.mxu0 %v6539_v0 }
 0x172   : > { %4761 = vmatmul.mubr.msk.bf16.vlgmr.msra.gmra.mrb[48].mxu1 %vm702_vm0, %v6823_v15  ;;  %4773 = vmatmul.mubr.msk.bf16.vlgmr.msra.gmra.mrb[48].mxu0 %vm702_vm0, %v6823_v15 }
 0x173   : > { %1122 = vmatprep.mubr.bf16.mxu1 %v6539_v0  ;;  %1341 = vmatprep.mubr.bf16.mxu0 %v6539_v0 }
 0x174   : > { %1227 = vmatpush1.bf16.msra.mxu1 %v6279_v40  ;;  %5266 = vmatpush1.bf16.msra.mxu0 %v5265_v55  ;;  %v2050_v40 = vld [vmem:[#allocation9 + $0xa8] sm:$0xff]  ;;  %v2063_v55 = vld [vmem:[#allocation9 + $0x110] sm:$0xff] }
 0x175   : > { %1228 = vmatprep.subr.bf16.mxu1 %v6284_v41  ;;  %5268 = vmatprep.subr.bf16.mxu0 %v5267_v58  ;;  %v2054_v41 = vld [vmem:[#allocation9 + $0xc8] sm:$0xff]  ;;  %v5149_v48 = vpack.c.bf16 %v2050_v40, %v2047_v37  ;;  %v2260_v58 = vld [vmem:[#allocation9 + $0x738] sm:$0xff]  ;;  %v5155_v62 = vpack.c.bf16 %v2063_v55, %v2060_v53  ;;  %v2087_v40 = vld [vmem:[#allocation9 + $0x1d0] sm:$0xff] }
 0x176   : > { %v5289_v59 = vpack.c.bf16 %v2260_v58, %v2257_v57  ;;  %v2080_v37 = vld [vmem:[#allocation9 + $0x198] sm:$0xff]  ;;  %v2287_v53 = vld [vmem:[#allocation9 + $0x810] sm:$0xff]  ;;  %v2089_v57 = vld [vmem:[#allocation9 + $0x1e0] sm:$0xff] }
 0x177   : > { %v2294_v58 = vld [vmem:[#allocation9 + $0x848] sm:$0xff] }
 0x178   : > { %1229 = vmatpush1.bf16.msra.mxu1 %v6282_v42  ;;  %5270 = vmatpush1.bf16.msra.mxu0 %v5269_v61  ;;  %v2255_v42 = vld [vmem:[#allocation9 + $0x710] sm:$0xff]  ;;  %v2264_v61 = vld [vmem:[#allocation9 + $0x758] sm:$0xff] }
 0x179   : > { %1372 = vmatprep.subr.bf16.mxu1 %v6287_v43  ;;  %5272 = vmatprep.subr.bf16.mxu0 %v5271_v5  ;;  %v2057_v43 = vld [vmem:[#allocation9 + $0xe0] sm:$0xff]  ;;  %v5291_v4 = vpack.c.bf16 %v2267_v2, %v2264_v61  ;;  %v2263_v5 = vld [vmem:[#allocation9 + $0x750] sm:$0xff]  ;;  %v2296_v2 = vld [vmem:[#allocation9 + $0x858] sm:$0xff] }
 0x17a   : > { %4762 = vmatmul.mubr.msk.bf16.gmra.mrb[52].mxu1 %vm702_vm0, %v6831_v21  ;;  %4774 = vmatmul.mubr.msk.bf16.gmra.mrb[52].mxu0 %vm702_vm0, %v6831_v21  ;;  %v5151_v51 = vpack.c.bf16 %v2057_v43, %v2054_v41  ;;  %v5293_v7 = vpack.c.bf16 %v2266_v6, %v2263_v5  ;;  %v2284_v43 = vld [vmem:[#allocation9 + $0x7f8] sm:$0xff]  ;;  %v2297_v61 = vld [vmem:[#allocation9 + $0x860] sm:$0xff]  ;;  %v2095_v6 = vld [vmem:[#allocation9 + $0x210] sm:$0xff] }
 0x17b   : > { %1132 = vmatprep.mubr.bf16.mxu1 %v6539_v0  ;;  %1351 = vmatprep.mubr.bf16.mxu0 %v6539_v0 }
 0x17c   : > { %5274 = vmatpush1.bf16.msra.mxu0 %v5273_v8  ;;  %v5157_v8 = vpack.c.bf16 %v2062_v63, %v2059_v60  ;;  %v2096_v60 = vld [vmem:[#allocation9 + $0x218] sm:$0xff]  ;;  %v5311_v63 = vpack.c.bf16 %v2297_v61, %v2294_v58 }
 0x17d   : > { %5276 = vmatprep.subr.bf16.mxu0 %v5275_v18  ;;  %v2269_v18 = vld [vmem:[#allocation9 + $0x780] sm:$0xff] }
 0x17e   : > { %v5297_v20 = vpack.c.bf16 %v2272_v19, %v2269_v18 }
 0x180   : > { %5278 = vmatpush1.bf16.msra.mxu0 %v5277_v22  ;;  %v2071_v22 = vld [vmem:[#allocation9 + $0x150] sm:$0xff] }
 0x181   : > { %5280 = vmatprep.subr.bf16.mxu0 %v5279_v33  ;;  %v5301_v33 = vpack.c.bf16 %v2278_v32, %v2275_v31 }
 0x182   : > { %4763 = vmatmul.mubr.msk.bf16.gmra.mrb[56].mxu1 %vm702_vm0, %v6839_v23  ;;  %4775 = vmatmul.mubr.msk.bf16.gmra.mrb[56].mxu0 %vm702_vm0, %v6839_v23 }
 0x183   : > { %1142 = vmatprep.mubr.bf16.mxu1 %v6539_v0  ;;  %1361 = vmatprep.mubr.bf16.mxu0 %v6539_v0 }
 0x184   : > { %5282 = vmatpush1.bf16.msra.mxu0 %v5281_v36  ;;  %v2282_v36 = vld [vmem:[#allocation9 + $0x7e8] sm:$0xff] }
 0x18a   : > { %4764 = vmatmul.mubr.msk.bf16.gmra.mrb[60].mxu1 %vm702_vm0, %v6847_v24  ;;  %4776 = vmatmul.mubr.msk.bf16.gmra.mrb[60].mxu0 %vm702_vm0, %v6847_v24 }
 0x18b   : > { %1258 = vmatprep.mubr.bf16.mxu1 %v6539_v0 }
 0x192   : > { %4769 = vmatmul.mubr.msk.bf16.vlgmr.msra.gmra.mrb[64].mxu1 %vm702_vm0, %v6823_v15 }
 0x193   : > { %1268 = vmatprep.mubr.bf16.mxu1 %v6539_v0  ;;  %1373 = vmatpush1.bf16.msra.mxu1 %v6285_v44  ;;  %v5283_v44 = vpack.c.bf16 %v2255_v42, %v2252_v38  ;;  %v2084_v38 = vld [vmem:[#allocation9 + $0x1b8] sm:$0xff]  ;;  %v2281_v42 = vld [vmem:[#allocation9 + $0x7e0] sm:$0xff] }
 0x194   : > { %1374 = vmatprep.subr.bf16.mxu1 %v6290_v45  ;;  %v2251_v45 = vld [vmem:[#allocation9 + $0x6f0] sm:$0xff] }
 0x195   : > { %5284 = vmatprep.subr.bf16.mxu0 %v5283_v44  ;;  %v5305_v44 = vpack.c.bf16 %v2284_v43, %v2281_v42  ;;  %v2315_v42 = vld [vmem:[#allocation9 + $0x8f0] sm:$0xff]  ;;  %v2117_v43 = vld [vmem:[#allocation9 + $0x2c0] sm:$0xff] }
 0x197   : > { %1375 = vmatpush1.bf16.msra.mxu1 %v6288_v46  ;;  %v2254_v46 = vld [vmem:[#allocation9 + $0x708] sm:$0xff] }
 0x198   : > { %5136 = vmatprep.subr.bf16.mxu1 %v5135_v50  ;;  %v5285_v47 = vpack.c.bf16 %v2254_v46, %v2251_v45  ;;  %v2258_v50 = vld [vmem:[#allocation9 + $0x728] sm:$0xff]  ;;  %v5169_v45 = vpack.c.bf16 %v2080_v37, %v2077_v35  ;;  %v2288_v46 = vld [vmem:[#allocation9 + $0x818] sm:$0xff]  ;;  %v2107_v37 = vld [vmem:[#allocation9 + $0x270] sm:$0xff] }
 0x199   : > { %v5287_v56 = vpack.c.bf16 %v2261_v54, %v2258_v50  ;;  %v2291_v50 = vld [vmem:[#allocation9 + $0x830] sm:$0xff]  ;;  %v2290_v54 = vld [vmem:[#allocation9 + $0x828] sm:$0xff] }
 0x19a   : > { %4770 = vmatmul.mubr.msk.bf16.gmra.mrb[68].mxu1 %vm702_vm0, %v6831_v21  ;;  %5286 = vmatpush1.bf16.msra.mxu0 %v5285_v47  ;;  %v5171_v47 = vpack.c.bf16 %v2087_v40, %v2084_v38  ;;  %v5309_v55 = vpack.c.bf16 %v2290_v54, %v2287_v53  ;;  %v2312_v38 = vld [vmem:[#allocation9 + $0x8d8] sm:$0xff]  ;;  %v2110_v40 = vld [vmem:[#allocation9 + $0x288] sm:$0xff]  ;;  %v2113_v54 = vld [vmem:[#allocation9 + $0x2a0] sm:$0xff] }
 0x19b   : > { %1278 = vmatprep.mubr.bf16.mxu1 %v6539_v0  ;;  %5288 = vmatprep.subr.bf16.mxu0 %v5287_v56 }
 0x19e   : > { %5290 = vmatpush1.bf16.msra.mxu0 %v5289_v59 }
 0x19f   : > { %5292 = vmatprep.subr.bf16.mxu0 %v5291_v4  ;;  %v5313_v4 = vpack.c.bf16 %v2296_v2, %v2293_v1  ;;  %v2119_v2 = vld [vmem:[#allocation9 + $0x2d0] sm:$0xff] }
 0x1a2   : > { %4771 = vmatmul.mubr.msk.bf16.gmra.mrb[72].mxu1 %vm702_vm0, %v6839_v23  ;;  %5294 = vmatpush1.bf16.msra.mxu0 %v5293_v7  ;;  %v2300_v7 = vld [vmem:[#allocation9 + $0x878] sm:$0xff] }
 0x1a3   : > { %1288 = vmatprep.mubr.bf16.mxu1 %v6539_v0  ;;  %5296 = vmatprep.subr.bf16.mxu0 %v5295_v17  ;;  %v6950_v17 = vshrl.u32 %v7665_v3, 7 }
 0x1a5   : > { %v6953_v31 = vsub.s32 0, %v6950_v17  ;;  %v6956_v32 = vsub.s32 4, %v6950_v17  ;;  %v6961_v35 = vsub.s32 1, %v6950_v17 }
 0x1a6   : > { %5298 = vmatpush1.bf16.msra.mxu0 %v5297_v20  ;;  %v2101_v20 = vld [vmem:[#allocation9 + $0x240] sm:$0xff] }
 0x1aa   : > { %4772 = vmatmul.mubr.msk.bf16.gmra.mrb[76].mxu1 %vm702_vm0, %v6847_v24 }
 0x1ab   : > { %1404 = vmatprep.mubr.bf16.mxu1 %v6539_v0 }
 0x1b2   : > { %4777 = vmatmul.mubr.msk.bf16.vlgmr.msra.gmra.mrb[80].mxu1 %vm702_vm0, %v6823_v15  ;;  %v5145_v15 = vpack.c.bf16 %v2044_v29, %v2041_v26  ;;  %v2074_v26 = vld [vmem:[#allocation9 + $0x168] sm:$0xff]  ;;  %v2081_v29 = vld [vmem:[#allocation9 + $0x1a0] sm:$0xff] }
 0x1b3   : > { %1414 = vmatprep.mubr.bf16.mxu1 %v6539_v0  ;;  %5138 = vmatpush1.bf16.msra.mxu1 %v5137_v9  ;;  %v2065_v9 = vld [vmem:[#allocation9 + $0x120] sm:$0xff]  ;;  %v5165_v34 = vpack.c.bf16 %v2074_v26, %v2071_v22 }
 0x1b4   : > { %5140 = vmatprep.subr.bf16.mxu1 %v5139_v12  ;;  %v2068_v12 = vld [vmem:[#allocation9 + $0x138] sm:$0xff]  ;;  %v2309_v26 = vld [vmem:[#allocation9 + $0x8c0] sm:$0xff] }
 0x1b7   : > { %5142 = vmatpush1.bf16.msra.mxu1 %v5141_v25  ;;  %v5163_v25 = vpack.c.bf16 %v2075_v16, %v2072_v13  ;;  %v2302_v16 = vld [vmem:[#allocation9 + $0x888] sm:$0xff] }
 0x1b8   : > { %5144 = vmatprep.subr.bf16.mxu1 %v5143_v28  ;;  %v2279_v28 = vld [vmem:[#allocation9 + $0x7d0] sm:$0xff]  ;;  %v5317_v18 = vpack.c.bf16 %v2302_v16, %v2299_v14 }
 0x1ba   : > { %4778 = vmatmul.mubr.msk.bf16.gmra.mrb[84].mxu1 %vm702_vm0, %v6831_v21  ;;  %v5153_v21 = vpack.c.bf16 %v2056_v52, %v2053_v49  ;;  %v2090_v49 = vld [vmem:[#allocation9 + $0x1e8] sm:$0xff]  ;;  %v5307_v52 = vpack.c.bf16 %v2291_v50, %v2288_v46 }
 0x1bb   : > { %1424 = vmatprep.mubr.bf16.mxu1 %v6539_v0  ;;  %5146 = vmatpush1.bf16.msra.mxu1 %v5145_v15  ;;  %v5167_v15 = vpack.c.bf16 %v2081_v29, %v2078_v27  ;;  %v2111_v27 = vld [vmem:[#allocation9 + $0x290] sm:$0xff]  ;;  %v2305_v29 = vld [vmem:[#allocation9 + $0x8a0] sm:$0xff] }
 0x1bc   : > { %5148 = vmatprep.subr.bf16.mxu1 %v5147_v39  ;;  %v2285_v39 = vld [vmem:[#allocation9 + $0x800] sm:$0xff] }
 0x1bd   : > { %v5303_v41 = vpack.c.bf16 %v2285_v39, %v2282_v36  ;;  %v6964_v36 = vsub.s32 5, %v6950_v17 }
 0x1bf   : > { %5150 = vmatpush1.bf16.msra.mxu1 %v5149_v48  ;;  %v2086_v48 = vld [vmem:[#allocation9 + $0x1c8] sm:$0xff] }
 0x1c0   : > { %5152 = vmatprep.subr.bf16.mxu1 %v5151_v51  ;;  %v2093_v51 = vld [vmem:[#allocation9 + $0x200] sm:$0xff] }
 0x1c1   : > { %v5175_v59 = vpack.c.bf16 %v2093_v51, %v2090_v49  ;;  %v5189_v51 = vpack.c.bf16 %v2110_v40, %v2107_v37 }
 0x1c2   : > { %4779 = vmatmul.mubr.msk.bf16.gmra.mrb[88].mxu1 %vm702_vm0, %v6839_v23  ;;  %v5161_v23 = vpack.c.bf16 %v2068_v12, %v2065_v9  ;;  %v2098_v9 = vld [vmem:[#allocation9 + $0x228] sm:$0xff]  ;;  %v2105_v12 = vld [vmem:[#allocation9 + $0x260] sm:$0xff] }
 0x1c3   : > { %1434 = vmatprep.mubr.bf16.mxu1 %v6539_v0  ;;  %5154 = vmatpush1.bf16.msra.mxu1 %v5153_v21  ;;  %v2276_v0 = vld [vmem:[#allocation9 + $0x7b8] sm:$0xff]  ;;  %v5181_v19 = vpack.c.bf16 %v2098_v9, %v2095_v6  ;;  %v5183_v22 = vpack.c.bf16 %v2105_v12, %v2102_v10 }
 0x1c4   : > { %5156 = vmatprep.subr.bf16.mxu1 %v5155_v62  ;;  %v5299_v30 = vpack.c.bf16 %v2279_v28, %v2276_v0  ;;  %v2092_v21 = vld [vmem:[#allocation9 + $0x1f8] sm:$0xff]  ;;  %v2099_v62 = vld [vmem:[#allocation9 + $0x230] sm:$0xff] }
 0x1c5   : > { %v5177_v5 = vpack.c.bf16 %v2092_v21, %v2089_v57  ;;  %v2104_v0 = vld [vmem:[#allocation9 + $0x258] sm:$0xff]  ;;  %v2123_v21 = vld [vmem:[#allocation9 + $0x2f0] sm:$0xff] }
 0x1c6   : > { %5300 = vmatprep.subr.bf16.mxu0 %v5299_v30  ;;  %v2308_v30 = vld [vmem:[#allocation9 + $0x8b8] sm:$0xff] }
 0x1c7   : > { %5158 = vmatpush1.bf16.msra.mxu1 %v5157_v8  ;;  %5302 = vmatpush1.bf16.msra.mxu0 %v5301_v33  ;;  %v5179_v8 = vpack.c.bf16 %v2099_v62, %v2096_v60  ;;  %v5321_v33 = vpack.c.bf16 %v2308_v30, %v2305_v29 }
 0x1c8   : > { %5160 = vmatprep.subr.bf16.mxu1 %v5159_v11  ;;  %5304 = vmatprep.subr.bf16.mxu0 %v5303_v41  ;;  %v2303_v11 = vld [vmem:[#allocation9 + $0x890] sm:$0xff]  ;;  %v2114_v41 = vld [vmem:[#allocation9 + $0x2a8] sm:$0xff] }
 0x1c9   : > { %v5315_v13 = vpack.c.bf16 %v2303_v11, %v2300_v7  ;;  %v5191_v53 = vpack.c.bf16 %v2117_v43, %v2114_v41 }
 0x1ca   : > { %4780 = vmatmul.mubr.msk.bf16.gmra.mrb[92].mxu1 %vm702_vm0, %v6847_v24  ;;  %v2083_v24 = vld [vmem:[#allocation9 + $0x1b0] sm:$0xff] }
 0x1cb   : > { %5162 = vmatpush1.bf16.msra.mxu1 %v5161_v23  ;;  %5306 = vmatpush1.bf16.msra.mxu0 %v5305_v44  ;;  %v5173_v56 = vpack.c.bf16 %v2086_v48, %v2083_v24  ;;  %v2306_v23 = vld [vmem:[#allocation9 + $0x8a8] sm:$0xff]  ;;  %v5323_v44 = vpack.c.bf16 %v2315_v42, %v2312_v38 }
 0x1cc   : > { %5164 = vmatprep.subr.bf16.mxu1 %v5163_v25  ;;  %5308 = vmatprep.subr.bf16.mxu0 %v5307_v52  ;;  %v2108_v25 = vld [vmem:[#allocation9 + $0x278] sm:$0xff]  ;;  %v5319_v28 = vpack.c.bf16 %v2309_v26, %v2306_v23  ;;  %v2314_v24 = vld [vmem:[#allocation9 + $0x8e8] sm:$0xff]  ;;  %v2129_v23 = vld [vmem:[#allocation9 + $0x320] sm:$0xff] }
 0x1cd   : > { %v5187_v39 = vpack.c.bf16 %v2111_v27, %v2108_v25  ;;  %v2318_v52 = vld [vmem:[#allocation9 + $0x908] sm:$0xff] }
 0x1cf   : > { %5166 = vmatpush1.bf16.msra.mxu1 %v5165_v34  ;;  %5310 = vmatpush1.bf16.msra.mxu0 %v5309_v55  ;;  %v6958_v34 = vld [vmem:[#allocation8] sm:$0xff]  ;;  %v2116_v55 = vld [vmem:[#allocation9 + $0x2b8] sm:$0xff] }
 0x1d0   : > { %5168 = vmatprep.subr.bf16.mxu1 %v5167_v15  ;;  %5312 = vmatprep.subr.bf16.mxu0 %v5311_v63  ;;  %v5185_v15 = vpack.c.bf16 %v2104_v0, %v2101_v20  ;;  %v6968_v46 = vrot.slane %v6958_v34, %v6953_v31  ;;  %v6976_v49 = vrot.slane %v6958_v34, %v6961_v35  ;;  %v2126_v20 = vld [vmem:[#allocation9 + $0x308] sm:$0xff] }
 0x1d1   : > { %v6980_v50 = vrot.slane %v6958_v34, %v6964_v36  ;;  %v5193_v9 = vpack.c.bf16 %v2116_v55, %v2113_v54  ;;  %v5199_v37 = vpack.c.bf16 %v2129_v23, %v2126_v20 }
 0x1d3   : > { %5170 = vmatpush1.bf16.msra.mxu1 %v5169_v45  ;;  %5314 = vmatpush1.bf16.msra.mxu0 %v5313_v4  ;;  %v2311_v45 = vld [vmem:[#allocation9 + $0x8d0] sm:$0xff]  ;;  %v2122_v4 = vld [vmem:[#allocation9 + $0x2e8] sm:$0xff] }
 0x1d4   : > { %5172 = vmatprep.subr.bf16.mxu1 %v5171_v47  ;;  %5316 = vmatprep.subr.bf16.mxu0 %v5315_v13  ;;  %v6972_v47 = vrot.slane %v6958_v34, %v6956_v32  ;;  %v5325_v48 = vpack.c.bf16 %v2314_v24, %v2311_v45 }
 0x1d7   : > { %5174 = vmatpush1.bf16.msra.mxu1 %v5173_v56  ;;  %5318 = vmatpush1.bf16.msra.mxu0 %v5317_v18  ;;  %v2321_v56 = vld [vmem:[#allocation9 + $0x920] sm:$0xff] }
 0x1d8   : > { %5176 = vmatprep.subr.bf16.mxu1 %v5175_v59  ;;  %5320 = vmatprep.subr.bf16.mxu0 %v5319_v28  ;;  %v2120_v59 = vld [vmem:[#allocation9 + $0x2d8] sm:$0xff]  ;;  %v5327_v60 = vpack.c.bf16 %v2321_v56, %v2318_v52 }
 0x1d9   : > { %v5195_v14 = vpack.c.bf16 %v2123_v21, %v2120_v59 }
 0x1db   : > { %5178 = vmatpush1.bf16.msra.mxu1 %v5177_v5  ;;  %5322 = vmatpush1.bf16.msra.mxu0 %v5321_v33 }
 0x1dc   : > { %5180 = vmatprep.subr.bf16.mxu1 %v5179_v8  ;;  %5324 = vmatprep.subr.bf16.mxu0 %v5323_v44 }
 0x1df   : > { %5182 = vmatpush1.bf16.msra.mxu1 %v5181_v19  ;;  %5326 = vmatpush1.bf16.msra.mxu0 %v5325_v48  ;;  %v5197_v19 = vpack.c.bf16 %v2122_v4, %v2119_v2 }
 0x1e0   : > { %5184 = vmatprep.subr.bf16.mxu1 %v5183_v22  ;;  %5328 = vmatprep.subr.bf16.mxu0 %v5327_v60 }
 0x1e3   : > { %5186 = vmatpush1.bf16.msra.mxu1 %v5185_v15 }
 0x1e4   : > { %5188 = vmatprep.subr.bf16.mxu1 %v5187_v39 }
 0x1e5   : > { %v749_v57 = vpop.f32.mrb[0].mxu1  ;;  %v895_v58 = vpop.f32.mrb[0].mxu0 }
 0x1e6   : > { %v750_v61 = vadd.f32 %v749_v57, %v6968_v46  ;;  %v896_v62 = vadd.f32 %v895_v58, %v6972_v47  ;;  %v751_v63 = vpop.f32.mrb[1].mxu1  ;;  %v897_v1 = vpop.f32.mrb[1].mxu0 }
 0x1e7   : > { %v752_v5 = vadd.f32 %v751_v63, %v6976_v49  ;;  %v898_v6 = vadd.f32 %v897_v1, %v6980_v50  ;;  %v753_v7 = vpop.f32.mrb[2].mxu1  ;;  %v899_v8 = vpop.f32.mrb[2].mxu0  ;;  %5190 = vmatpush1.bf16.msra.mxu1 %v5189_v51 }
 0x1e8   : > { %v754_v10 = vadd.f32 %v753_v7, %v6968_v46  ;;  %v900_v11 = vadd.f32 %v899_v8, %v6972_v47  ;;  %v755_v12 = vpop.f32.mrb[3].mxu1  ;;  %v901_v13 = vpop.f32.mrb[3].mxu0  ;;  %5192 = vmatprep.subr.bf16.mxu1 %v5191_v53  ;;  %v1445_v22 = vmax.f32 %v750_v61, 0.0  ;;  %v1449_v0 = vmax.f32 %v896_v62, 0.0 }
 0x1e9   : > { %v756_v16 = vadd.f32 %v755_v12, %v6976_v49  ;;  %v902_v18 = vadd.f32 %v901_v13, %v6980_v50  ;;  %v1446_v27 = vmax.f32 %v752_v5, 0.0  ;;  %v1450_v28 = vmax.f32 %v898_v6, 0.0 }
 0x1ea   : > { %v1465_v25 = vmax.f32 %v754_v10, 0.0  ;;  %v1469_v26 = vmax.f32 %v900_v11, 0.0  ;;  %v6540_v53 = vmov 1966171168  }
 0x1eb   : > { %v1466_v29 = vmax.f32 %v756_v16, 0.0  ;;  %v1470_v30 = vmax.f32 %v902_v18, 0.0  ;;  %5194 = vmatpush1.bf16.msra.mxu1 %v5193_v9  ;;  %v6994_v54 = vunpack.c.l.s4 %v6540_v53 }
 0x1ec   : > { %v1608_v33 = vadd.f32 %v1465_v25, %v1445_v22  ;;  %v1660_v15 = vadd.f32 %v1469_v26, %v1449_v0  ;;  %5196 = vmatprep.subr.bf16.mxu1 %v5195_v14  ;;  %v7003_v22 = vsub.s32 2, %v6950_v17 }
 0x1ed   : > { %v1621_v38 = vadd.f32 %v1466_v29, %v1446_v27  ;;  %v1673_v39 = vadd.f32 %v1470_v30, %v1450_v28  ;;  %v759_v40 = vpop.f32.mrb[4].mxu1  ;;  %v905_v41 = vpop.f32.mrb[4].mxu0  ;;  %v1894_v28 = vunpack.c.0.s8 %v6994_v54  ;;  %v7009_v29 = vsub.s32 3, %v6950_v17 }
 0x1ee   : > { %v760_v42 = vadd.f32 %v759_v40, %v6968_v46  ;;  %v906_v43 = vadd.f32 %v905_v41, %v6972_v47  ;;  %v761_v44 = vpop.f32.mrb[5].mxu1  ;;  %v907_v45 = vpop.f32.mrb[5].mxu0  ;;  %7696 = vst [vmem:[#allocation18_spill] sm:$0xff] %v7003_v22 }
 0x1ef   : > { %v762_v24 = vadd.f32 %v761_v44, %v6976_v49  ;;  %v908_v48 = vadd.f32 %v907_v45, %v6980_v50  ;;  %v763_v51 = vpop.f32.mrb[6].mxu1  ;;  %v909_v52 = vpop.f32.mrb[6].mxu0  ;;  %5198 = vmatpush1.bf16.msra.mxu1 %v5197_v19 }
 0x1f0   : > { %v1485_v55 = vmax.f32 %v760_v42, 0.0  ;;  %v1489_v56 = vmax.f32 %v906_v43, 0.0  ;;  %v764_v57 = vadd.f32 %v763_v51, %v6968_v46  ;;  %v910_v58 = vadd.f32 %v909_v52, %v6972_v47  ;;  %v765_v59 = vpop.f32.mrb[7].mxu1  ;;  %v911_v21 = vpop.f32.mrb[7].mxu0  ;;  %5200 = vmatprep.subr.bf16.mxu1 %v5199_v37  ;;  %v7015_v51 = vld [vmem:[#allocation8 + $0x8] sm:$0xff] }
 0x1f1   : > { %v1486_v60 = vmax.f32 %v762_v24, 0.0  ;;  %v1490_v61 = vmax.f32 %v908_v48, 0.0  ;;  %v766_v62 = vadd.f32 %v765_v59, %v6976_v49  ;;  %v912_v63 = vadd.f32 %v911_v21, %v6980_v50 }
 0x1f2   : > { %v1609_v1 = vadd.f32 %v1608_v33, %v1485_v55  ;;  %v1661_v2 = vadd.f32 %v1660_v15, %v1489_v56  ;;  %v1505_v4 = vmax.f32 %v764_v57, 0.0  ;;  %v1509_v5 = vmax.f32 %v910_v58, 0.0 }
 0x1f3   : > { %v1622_v6 = vadd.f32 %v1621_v38, %v1486_v60  ;;  %v1674_v7 = vadd.f32 %v1673_v39, %v1490_v61  ;;  %v1506_v8 = vmax.f32 %v766_v62, 0.0  ;;  %v1510_v9 = vmax.f32 %v912_v63, 0.0 }
 0x1f4   : > { %v1610_v10 = vadd.f32 %v1609_v1, %v1505_v4  ;;  %v1662_v11 = vadd.f32 %v1661_v2, %v1509_v5  ;;  %v7019_v58 = vrot.slane %v6958_v34, %v7003_v22  ;;  %v7023_v62 = vrot.slane %v7015_v51, %v6953_v31 }
 0x1f5   : > { %v1623_v12 = vadd.f32 %v1622_v6, %v1506_v8  ;;  %v1675_v13 = vadd.f32 %v1674_v7, %v1510_v9  ;;  %v769_v14 = vpop.f32.mrb[8].mxu1  ;;  %v915_v16 = vpop.f32.mrb[8].mxu0  ;;  %v7027_v63 = vrot.slane %v6958_v34, %v7009_v29  ;;  %v7032_v6 = vsub.s32 %v1894_v28, %v6950_v17 }
 0x1f6   : > { %v770_v18 = vadd.f32 %v769_v14, %v6968_v46  ;;  %v916_v19 = vadd.f32 %v915_v16, %v6972_v47  ;;  %v771_v20 = vpop.f32.mrb[9].mxu1  ;;  %v917_v23 = vpop.f32.mrb[9].mxu0  ;;  %v7036_v7 = vrot.slane %v7015_v51, %v6961_v35 }
 0x1f7   : > { %v772_v0 = vadd.f32 %v771_v20, %v6976_v49  ;;  %v918_v25 = vadd.f32 %v917_v23, %v6980_v50  ;;  %v773_v26 = vpop.f32.mrb[10].mxu1  ;;  %v919_v27 = vpop.f32.mrb[10].mxu0 }
 0x1f8   : > { %v1525_v30 = vmax.f32 %v770_v18, 0.0  ;;  %v1529_v33 = vmax.f32 %v916_v19, 0.0  ;;  %v774_v15 = vadd.f32 %v773_v26, %v6968_v46  ;;  %v920_v37 = vadd.f32 %v919_v27, %v6972_v47  ;;  %v775_v38 = vpop.f32.mrb[11].mxu1  ;;  %v921_v39 = vpop.f32.mrb[11].mxu0 }
 0x1f9   : > { %v1526_v40 = vmax.f32 %v772_v0, 0.0  ;;  %v1530_v41 = vmax.f32 %v918_v25, 0.0  ;;  %v776_v42 = vadd.f32 %v775_v38, %v6976_v49  ;;  %v922_v43 = vadd.f32 %v921_v39, %v6980_v50 }
 0x1fa   : > { %v1611_v44 = vadd.f32 %v1610_v10, %v1525_v30  ;;  %v1663_v45 = vadd.f32 %v1662_v11, %v1529_v33  ;;  %v1545_v24 = vmax.f32 %v774_v15, 0.0  ;;  %v1549_v48 = vmax.f32 %v920_v37, 0.0 }
 0x1fb   : > { %v1624_v52 = vadd.f32 %v1623_v12, %v1526_v40  ;;  %v1676_v53 = vadd.f32 %v1675_v13, %v1530_v41  ;;  %v1546_v54 = vmax.f32 %v776_v42, 0.0  ;;  %v1550_v55 = vmax.f32 %v922_v43, 0.0 }
 0x1fc   : > { %v1612_v56 = vadd.f32 %v1611_v44, %v1545_v24  ;;  %v1664_v57 = vadd.f32 %v1663_v45, %v1549_v48  ;;  %v7041_v12 = vsub.s32 6, %v6950_v17  ;;  %v7044_v13 = vsub.s32 7, %v6950_v17 }
 0x1fd   : > { %v1625_v59 = vadd.f32 %v1624_v52, %v1546_v54  ;;  %v1677_v21 = vadd.f32 %v1676_v53, %v1550_v55  ;;  %v779_v60 = vpop.f32.mrb[12].mxu1  ;;  %v925_v61 = vpop.f32.mrb[12].mxu0  ;;  %v7056_v41 = vrot.slane %v7015_v51, %v6956_v32  ;;  %v7064_v45 = vrot.slane %v7015_v51, %v6964_v36 }
 0x1fe   : > { %v780_v1 = vadd.f32 %v779_v60, %v6968_v46  ;;  %v926_v2 = vadd.f32 %v925_v61, %v6972_v47  ;;  %v781_v4 = vpop.f32.mrb[13].mxu1  ;;  %v927_v5 = vpop.f32.mrb[13].mxu0  ;;  %7697 = vst [vmem:[#allocation19_spill] sm:$0xff] %v7041_v12  ;;  %v7060_v44 = vrot.slane %v6958_v34, %v7044_v13 }
 0x1ff   : > { %v782_v8 = vadd.f32 %v781_v4, %v6976_v49  ;;  %v928_v9 = vadd.f32 %v927_v5, %v6980_v50  ;;  %v783_v10 = vpop.f32.mrb[14].mxu1  ;;  %v929_v11 = vpop.f32.mrb[14].mxu0 }
 0x200   : > { %v1565_v14 = vmax.f32 %v780_v1, 0.0  ;;  %v1569_v16 = vmax.f32 %v926_v2, 0.0  ;;  %v784_v18 = vadd.f32 %v783_v10, %v6968_v46  ;;  %v930_v19 = vadd.f32 %v929_v11, %v6972_v47  ;;  %v785_v20 = vpop.f32.mrb[15].mxu1  ;;  %v931_v23 = vpop.f32.mrb[15].mxu0 }
 0x201   : > { %v1566_v0 = vmax.f32 %v782_v8, 0.0  ;;  %v1570_v25 = vmax.f32 %v928_v9, 0.0  ;;  %v786_v26 = vadd.f32 %v785_v20, %v6976_v49  ;;  %v932_v27 = vadd.f32 %v931_v23, %v6980_v50 }
 0x202   : > { %v1613_v28 = vadd.f32 %v1612_v56, %v1565_v14  ;;  %v1665_v30 = vadd.f32 %v1664_v57, %v1569_v16  ;;  %v1585_v33 = vmax.f32 %v784_v18, 0.0  ;;  %v1589_v15 = vmax.f32 %v930_v19, 0.0 }
 0x203   : > { %v1626_v17 = vadd.f32 %v1625_v59, %v1566_v0  ;;  %v1678_v37 = vadd.f32 %v1677_v21, %v1570_v25  ;;  %v1586_v38 = vmax.f32 %v786_v26, 0.0  ;;  %v1590_v39 = vmax.f32 %v932_v27, 0.0 }
 0x204   : > { %v1614_v40 = vadd.f32 %v1613_v28, %v1585_v33  ;;  %v1666_v46 = vadd.f32 %v1665_v30, %v1589_v15  ;;  %v7052_v47 = vrot.slane %v6958_v34, %v7041_v12 }
 0x205   : > { %v1627_v49 = vadd.f32 %v1626_v17, %v1586_v38  ;;  %v1679_v50 = vadd.f32 %v1678_v37, %v1590_v39  ;;  %v822_v42 = vpop.f32.mrb[16].mxu1  ;;  %v1041_v43 = vpop.f32.mrb[16].mxu0 }
 0x206   : > { %v1615_v24 = vrot.slane %v1614_v40, 4  ;;  %v1667_v48 = vrot.slane %v1666_v46, 4  ;;  %v823_v52 = vadd.f32 %v822_v42, %v7019_v58  ;;  %v1042_v53 = vadd.f32 %v1041_v43, %v7023_v62  ;;  %v824_v54 = vpop.f32.mrb[17].mxu1  ;;  %v1043_v55 = vpop.f32.mrb[17].mxu0 }
 0x207   : > { %v1628_v56 = vrot.slane %v1627_v49, 4  ;;  %v1680_v57 = vrot.slane %v1679_v50, 4  ;;  %v825_v59 = vadd.f32 %v824_v54, %v7027_v63  ;;  %v1044_v21 = vadd.f32 %v1043_v55, %v7036_v7  ;;  %v826_v34 = vpop.f32.mrb[18].mxu1  ;;  %v1045_v60 = vpop.f32.mrb[18].mxu0 }
 0x208   : > { %v1616_v61 = vadd.f32 %v1615_v24, %v1614_v40  ;;  %v1668_v1 = vadd.f32 %v1667_v48, %v1666_v46  ;;  %v1447_v2 = vmax.f32 %v823_v52, 0.0  ;;  %v1453_v4 = vmax.f32 %v1042_v53, 0.0  ;;  %v828_v5 = vpop.f32.mrb[19].mxu1  ;;  %v1047_v8 = vpop.f32.mrb[19].mxu0 }
 0x209   : > { %v1629_v9 = vadd.f32 %v1628_v56, %v1627_v49  ;;  %v1681_v10 = vadd.f32 %v1680_v57, %v1679_v50  ;;  %v1448_v11 = vmax.f32 %v825_v59, 0.0  ;;  %v1454_v14 = vmax.f32 %v1044_v21, 0.0 }
 0x20a   : > { %v1617_v16 = vrot.slane %v1616_v61, 2  ;;  %v1669_v18 = vrot.slane %v1668_v1, 2  ;;  %v827_v19 = vadd.f32 %v826_v34, %v7019_v58  ;;  %v1046_v20 = vadd.f32 %v1045_v60, %v7023_v62 }
 0x20b   : > { %v1630_v23 = vrot.slane %v1629_v9, 2  ;;  %v1682_v0 = vrot.slane %v1681_v10, 2  ;;  %v829_v25 = vadd.f32 %v828_v5, %v7027_v63  ;;  %v1048_v26 = vadd.f32 %v1047_v8, %v7036_v7 }
 0x20c   : > { %v1618_v27 = vadd.f32 %v1617_v16, %v1616_v61  ;;  %v1670_v28 = vadd.f32 %v1669_v18, %v1668_v1  ;;  %v1467_v30 = vmax.f32 %v827_v19, 0.0  ;;  %v1473_v33 = vmax.f32 %v1046_v20, 0.0 }
 0x20d   : > { %v1631_v15 = vadd.f32 %v1630_v23, %v1629_v9  ;;  %v1683_v17 = vadd.f32 %v1682_v0, %v1681_v10  ;;  %v1468_v37 = vmax.f32 %v829_v25, 0.0  ;;  %v1474_v38 = vmax.f32 %v1048_v26, 0.0  ;;  %v832_v39 = vpop.f32.mrb[20].mxu1  ;;  %v1051_v40 = vpop.f32.mrb[20].mxu0 }
 0x20e   : > { %v1619_v46 = vrot.slane %v1618_v27, 1  ;;  %v1671_v49 = vrot.slane %v1670_v28, 1  ;;  %v1634_v50 = vadd.f32 %v1467_v30, %v1447_v2  ;;  %v1712_v42 = vadd.f32 %v1473_v33, %v1453_v4  ;;  %v834_v43 = vpop.f32.mrb[21].mxu1  ;;  %v1053_v24 = vpop.f32.mrb[21].mxu0 }
 0x20f   : > { %v1632_v48 = vrot.slane %v1631_v15, 1  ;;  %v1684_v52 = vrot.slane %v1683_v17, 1  ;;  %v1647_v53 = vadd.f32 %v1468_v37, %v1448_v11  ;;  %v1725_v54 = vadd.f32 %v1474_v38, %v1454_v14  ;;  %v836_v55 = vpop.f32.mrb[22].mxu1  ;;  %v1055_v56 = vpop.f32.mrb[22].mxu0  ;;  %v370_v14 = vld [vmem:[#allocation8 + $0x10] sm:$0xf] }
 0x210   : > { %v7074_v57 = vadd.f32 %v1619_v46, %v1618_v27  ;;  %v7076_v59 = vadd.f32 %v1671_v49, %v1670_v28  ;;  %v833_v21 = vadd.f32 %v832_v39, %v7019_v58  ;;  %v1052_v34 = vadd.f32 %v1051_v40, %v7023_v62  ;;  %v838_v60 = vpop.f32.mrb[23].mxu1  ;;  %v1057_v61 = vpop.f32.mrb[23].mxu0 }
 0x211   : > { %v7080_v1 = vadd.f32 %v1632_v48, %v1631_v15  ;;  %v7082_v2 = vadd.f32 %v1684_v52, %v1683_v17  ;;  %v835_v4 = vadd.f32 %v834_v43, %v7027_v63  ;;  %v1054_v5 = vadd.f32 %v1053_v24, %v7036_v7 }
 0x212   : > { %v1487_v8 = vmax.f32 %v833_v21, 0.0  ;;  %v1493_v9 = vmax.f32 %v1052_v34, 0.0  ;;  %v837_v10 = vadd.f32 %v836_v55, %v7019_v58  ;;  %v1056_v11 = vadd.f32 %v1055_v56, %v7023_v62 }
 0x213   : > { %v1488_v19 = vmax.f32 %v835_v4, 0.0  ;;  %v1494_v20 = vmax.f32 %v1054_v5, 0.0  ;;  %v7094_v15 = vrot.slane %v7015_v51, %v7003_v22  ;;  %v7097_v17 = vrot.slane %v370_v14, %v6953_v31 }
 0x214   : > { %v1635_v23 = vadd.f32 %v1634_v50, %v1487_v8  ;;  %v1713_v0 = vadd.f32 %v1712_v42, %v1493_v9  ;;  %v1507_v25 = vmax.f32 %v837_v10, 0.0  ;;  %v1513_v26 = vmax.f32 %v1056_v11, 0.0 }
 0x215   : > { %v1648_v27 = vadd.f32 %v1647_v53, %v1488_v19  ;;  %v1726_v28 = vadd.f32 %v1725_v54, %v1494_v20  ;;  %v842_v30 = vpop.f32.mrb[24].mxu1  ;;  %v1061_v33 = vpop.f32.mrb[24].mxu0  ;;  %v839_v39 = vadd.f32 %v838_v60, %v7027_v63  ;;  %v1058_v40 = vadd.f32 %v1057_v61, %v7036_v7 }
 0x216   : > { %v1636_v37 = vadd.f32 %v1635_v23, %v1507_v25  ;;  %v1714_v38 = vadd.f32 %v1713_v0, %v1513_v26  ;;  %v844_v46 = vpop.f32.mrb[25].mxu1  ;;  %v1063_v49 = vpop.f32.mrb[25].mxu0  ;;  %v843_v50 = vadd.f32 %v842_v30, %v7019_v58  ;;  %v1062_v42 = vadd.f32 %v1061_v33, %v7023_v62  ;;  %v7109_v25 = vld [vmem:[#allocation9 + $0x300] sm:$0xff]  ;;  %v7111_v26 = vld [vmem:[#allocation9 + $0x318] sm:$0xff] }
 0x217   : > { %v845_v43 = vadd.f32 %v844_v46, %v7027_v63  ;;  %v1064_v24 = vadd.f32 %v1063_v49, %v7036_v7  ;;  %v846_v48 = vpop.f32.mrb[26].mxu1  ;;  %v1065_v52 = vpop.f32.mrb[26].mxu0  ;;  %v1508_v53 = vmax.f32 %v839_v39, 0.0  ;;  %v1514_v54 = vmax.f32 %v1058_v40, 0.0 }
 0x218   : > { %v847_v55 = vadd.f32 %v846_v48, %v7019_v58  ;;  %v1066_v56 = vadd.f32 %v1065_v52, %v7023_v62  ;;  %v848_v21 = vpop.f32.mrb[27].mxu1  ;;  %v1067_v34 = vpop.f32.mrb[27].mxu0  ;;  %v1527_v60 = vmax.f32 %v843_v50, 0.0  ;;  %v1533_v61 = vmax.f32 %v1062_v42, 0.0 }
 0x219   : > { %v1528_v4 = vmax.f32 %v845_v43, 0.0  ;;  %v1534_v5 = vmax.f32 %v1064_v24, 0.0  ;;  %v1649_v8 = vadd.f32 %v1648_v27, %v1508_v53  ;;  %v1727_v9 = vadd.f32 %v1726_v28, %v1514_v54 }
 0x21a   : > { %v1547_v10 = vmax.f32 %v847_v55, 0.0  ;;  %v1553_v11 = vmax.f32 %v1066_v56, 0.0  ;;  %v1637_v19 = vadd.f32 %v1636_v37, %v1527_v60  ;;  %v1715_v20 = vadd.f32 %v1714_v38, %v1533_v61 }
 0x21b   : > { %v849_v23 = vadd.f32 %v848_v21, %v7027_v63  ;;  %v1068_v0 = vadd.f32 %v1067_v34, %v7036_v7  ;;  %v1650_v30 = vadd.f32 %v1649_v8, %v1528_v4  ;;  %v1728_v33 = vadd.f32 %v1727_v9, %v1534_v5 }
 0x21c   : > { %v7115_v39 = vrot.slane %v7015_v51, %v7009_v29  ;;  %v7118_v27 = vrot.slane %v370_v14, %v6961_v35  ;;  %v1638_v28 = vadd.f32 %v1637_v19, %v1547_v10  ;;  %v1716_v37 = vadd.f32 %v1715_v20, %v1553_v11  ;;  %v7130_v19 = vld [vmem:[#allocation9 + $0x900] sm:$0xff]  ;;  %v7132_v20 = vld [vmem:[#allocation9 + $0x918] sm:$0xff] }
 0x21d   : > { %v1548_v38 = vmax.f32 %v849_v23, 0.0  ;;  %v1554_v40 = vmax.f32 %v1068_v0, 0.0  ;;  %v852_v46 = vpop.f32.mrb[28].mxu1  ;;  %v1071_v49 = vpop.f32.mrb[28].mxu0 }
 0x21e   : > { %v853_v50 = vadd.f32 %v852_v46, %v7019_v58  ;;  %v1072_v42 = vadd.f32 %v1071_v49, %v7023_v62  ;;  %v854_v43 = vpop.f32.mrb[29].mxu1  ;;  %v1073_v24 = vpop.f32.mrb[29].mxu0 }
 0x21f   : > { %v1651_v52 = vadd.f32 %v1650_v30, %v1548_v38  ;;  %v1729_v53 = vadd.f32 %v1728_v33, %v1554_v40  ;;  %v855_v14 = vadd.f32 %v854_v43, %v7027_v63  ;;  %v1074_v54 = vadd.f32 %v1073_v24, %v7036_v7  ;;  %v856_v55 = vpop.f32.mrb[30].mxu1  ;;  %v1075_v56 = vpop.f32.mrb[30].mxu0  ;;  %v7134_v38 = vld [vmem:[#allocation9 + $0x338] sm:$0xff] }
 0x220   : > { %v1567_v21 = vmax.f32 %v853_v50, 0.0  ;;  %v1573_v34 = vmax.f32 %v1072_v42, 0.0  ;;  %v857_v60 = vadd.f32 %v856_v55, %v7019_v58  ;;  %v1076_v61 = vadd.f32 %v1075_v56, %v7023_v62  ;;  %v858_v4 = vpop.f32.mrb[31].mxu1  ;;  %v1077_v5 = vpop.f32.mrb[31].mxu0  ;;  %v7136_v58 = vld [vmem:[#allocation9 + $0x350] sm:$0xff] }
 0x221   : > { %v1568_v8 = vmax.f32 %v855_v14, 0.0  ;;  %v1574_v9 = vmax.f32 %v1074_v54, 0.0  ;;  %v859_v10 = vadd.f32 %v858_v4, %v7027_v63  ;;  %v1078_v11 = vadd.f32 %v1077_v5, %v7036_v7 }
 0x222   : > { %v1639_v23 = vadd.f32 %v1638_v28, %v1567_v21  ;;  %v1717_v0 = vadd.f32 %v1716_v37, %v1573_v34  ;;  %v1587_v30 = vmax.f32 %v857_v60, 0.0  ;;  %v1593_v33 = vmax.f32 %v1076_v61, 0.0 }
 0x223   : > { %v1652_v62 = vadd.f32 %v1651_v52, %v1568_v8  ;;  %v1730_v40 = vadd.f32 %v1729_v53, %v1574_v9  ;;  %v1588_v46 = vmax.f32 %v859_v10, 0.0  ;;  %v1594_v49 = vmax.f32 %v1078_v11, 0.0 }
 0x224   : > { %v1640_v50 = vadd.f32 %v1639_v23, %v1587_v30  ;;  %v1718_v63 = vadd.f32 %v1717_v0, %v1593_v33  ;;  %v7140_v7 = vrot.slane %v7015_v51, %v7041_v12  ;;  %v7146_v14 = vrot.slane %v7015_v51, %v7044_v13 }
 0x225   : > { %v1653_v37 = vadd.f32 %v1652_v62, %v1588_v46  ;;  %v1731_v42 = vadd.f32 %v1730_v40, %v1594_v49  ;;  %v968_v43 = vpop.f32.mrb[32].mxu1  ;;  %v1187_v24 = vpop.f32.mrb[32].mxu0 }
 0x226   : > { %v1641_v53 = vrot.slane %v1640_v50, 4  ;;  %v1719_v54 = vrot.slane %v1718_v63, 4  ;;  %v969_v55 = vadd.f32 %v968_v43, %v7052_v47  ;;  %v1188_v56 = vadd.f32 %v1187_v24, %v7056_v41  ;;  %v970_v21 = vpop.f32.mrb[33].mxu1  ;;  %v1189_v34 = vpop.f32.mrb[33].mxu0 }
 0x227   : > { %v1654_v60 = vrot.slane %v1653_v37, 4  ;;  %v1732_v61 = vrot.slane %v1731_v42, 4  ;;  %v971_v4 = vadd.f32 %v970_v21, %v7060_v44  ;;  %v1190_v5 = vadd.f32 %v1189_v34, %v7064_v45  ;;  %v972_v8 = vpop.f32.mrb[34].mxu1  ;;  %v1191_v51 = vpop.f32.mrb[34].mxu0 }
 0x228   : > { %v1642_v9 = vadd.f32 %v1641_v53, %v1640_v50  ;;  %v1720_v10 = vadd.f32 %v1719_v54, %v1718_v63  ;;  %v1451_v11 = vmax.f32 %v969_v55, 0.0  ;;  %v1457_v23 = vmax.f32 %v1188_v56, 0.0  ;;  %v974_v0 = vpop.f32.mrb[35].mxu1  ;;  %v1193_v30 = vpop.f32.mrb[35].mxu0 }
 0x229   : > { %v1655_v33 = vadd.f32 %v1654_v60, %v1653_v37  ;;  %v1733_v62 = vadd.f32 %v1732_v61, %v1731_v42  ;;  %v1452_v40 = vmax.f32 %v971_v4, 0.0  ;;  %v1458_v46 = vmax.f32 %v1190_v5, 0.0 }
 0x22a   : > { %v1643_v49 = vrot.slane %v1642_v9, 2  ;;  %v1721_v43 = vrot.slane %v1720_v10, 2  ;;  %v973_v24 = vadd.f32 %v972_v8, %v7052_v47  ;;  %v1192_v21 = vadd.f32 %v1191_v51, %v7056_v41 }
 0x22b   : > { %v1656_v52 = vrot.slane %v1655_v33, 2  ;;  %v1734_v34 = vrot.slane %v1733_v62, 2  ;;  %v975_v28 = vadd.f32 %v974_v0, %v7060_v44  ;;  %v1194_v50 = vadd.f32 %v1193_v30, %v7064_v45 }
 0x22c   : > { %v1644_v63 = vadd.f32 %v1643_v49, %v1642_v9  ;;  %v1722_v53 = vadd.f32 %v1721_v43, %v1720_v10  ;;  %v1471_v54 = vmax.f32 %v973_v24, 0.0  ;;  %v1477_v55 = vmax.f32 %v1192_v21, 0.0 }
 0x22d   : > { %v1657_v37 = vadd.f32 %v1656_v52, %v1655_v33  ;;  %v1735_v42 = vadd.f32 %v1734_v34, %v1733_v62  ;;  %v1472_v56 = vmax.f32 %v975_v28, 0.0  ;;  %v1478_v60 = vmax.f32 %v1194_v50, 0.0  ;;  %v978_v61 = vpop.f32.mrb[36].mxu1  ;;  %v1197_v4 = vpop.f32.mrb[36].mxu0 }
 0x22e   : > { %v1645_v5 = vrot.slane %v1644_v63, 1  ;;  %v1723_v8 = vrot.slane %v1722_v53, 1  ;;  %v1686_v48 = vadd.f32 %v1471_v54, %v1451_v11  ;;  %v1764_v51 = vadd.f32 %v1477_v55, %v1457_v23  ;;  %v980_v3 = vpop.f32.mrb[37].mxu1  ;;  %v1199_v18 = vpop.f32.mrb[37].mxu0 }
 0x22f   : > { %v1658_v16 = vrot.slane %v1657_v37, 1  ;;  %v1736_v0 = vrot.slane %v1735_v42, 1  ;;  %v1699_v12 = vadd.f32 %v1472_v56, %v1452_v40  ;;  %v1777_v30 = vadd.f32 %v1478_v60, %v1458_v46  ;;  %v982_v9 = vpop.f32.mrb[38].mxu1  ;;  %v1201_v10 = vpop.f32.mrb[38].mxu0 }
 0x230   : > { %v1646_v49 = vadd.f32 %v1645_v5, %v1644_v63  ;;  %v7158_v43 = vadd.f32 %v1723_v8, %v1722_v53  ;;  %v979_v28 = vadd.f32 %v978_v61, %v7052_v47  ;;  %v1198_v52 = vadd.f32 %v1197_v4, %v7056_v41  ;;  %v984_v33 = vpop.f32.mrb[39].mxu1  ;;  %v1203_v62 = vpop.f32.mrb[39].mxu0 }
 0x231   : > { %v1659_v24 = vadd.f32 %v1658_v16, %v1657_v37  ;;  %v7162_v11 = vadd.f32 %v1736_v0, %v1735_v42  ;;  %v981_v23 = vadd.f32 %v980_v3, %v7060_v44  ;;  %v1200_v21 = vadd.f32 %v1199_v18, %v7064_v45 }
 0x232   : > { %7698 = vst [vmem:[#allocation20_spill] sm:$0xff] %v7158_v43  ;;  %v1491_v40 = vmax.f32 %v979_v28, 0.0  ;;  %v1497_v46 = vmax.f32 %v1198_v52, 0.0  ;;  %v983_v34 = vadd.f32 %v982_v9, %v7052_v47  ;;  %v1202_v50 = vadd.f32 %v1201_v10, %v7056_v41  ;;  %v7181_v28 = vld [vmem:[#allocation9 + $0x938] sm:$0xff] }
 0x233   : > { %7699 = vst [vmem:[#allocation21_spill] sm:$0xff] %v7162_v11  ;;  %v1889_v63 = vcombine.low %v1646_v49, %v1659_v24  ;;  %v1492_v54 = vmax.f32 %v981_v23, 0.0  ;;  %v1498_v55 = vmax.f32 %v1200_v21, 0.0  ;;  %v7700_v3 = vcombine.low %v7074_v57, %v7080_v1  ;;  %v7183_v57 = vld [vmem:[#allocation9 + $0x950] sm:$0xff] }
 0x234   : > { %v1687_v56 = vadd.f32 %v1686_v48, %v1491_v40  ;;  %v1765_v16 = vadd.f32 %v1764_v51, %v1497_v46  ;;  %v1511_v37 = vmax.f32 %v983_v34, 0.0  ;;  %v1517_v42 = vmax.f32 %v1202_v50, 0.0 }
 0x235   : > { %v7174_v18 = vrot.slane %v7700_v3, %v7032_v6  ;;  %v7177_v60 = vrot.slane %v1889_v63, %v7032_v6  ;;  %v1700_v61 = vadd.f32 %v1699_v12, %v1492_v54  ;;  %v1778_v4 = vadd.f32 %v1777_v30, %v1498_v55  ;;  %v988_v5 = vpop.f32.mrb[40].mxu1  ;;  %v1207_v8 = vpop.f32.mrb[40].mxu0  ;;  %v7220_v55 = vld [vmem:[#allocation9 + $0x968] sm:$0xff] }
 0x236   : > { %v1688_v0 = vadd.f32 %v1687_v56, %v1511_v37  ;;  %v1766_v9 = vadd.f32 %v1765_v16, %v1517_v42  ;;  %v985_v48 = vadd.f32 %v984_v33, %v7060_v44  ;;  %v1204_v51 = vadd.f32 %v1203_v62, %v7064_v45  ;;  %v990_v10 = vpop.f32.mrb[41].mxu1  ;;  %v1209_v49 = vpop.f32.mrb[41].mxu0  ;;  %v7194_v56 = vld [vmem:[#allocation9 + $0x330] sm:$0xff]  ;;  %v7196_v16 = vld [vmem:[#allocation9 + $0x348] sm:$0xff]  ;;  %7702 = vst [vmem:[#allocation23_spill] sm:$0xff] %v7220_v55 }
 0x237   : > { %v989_v12 = vadd.f32 %v988_v5, %v7052_v47  ;;  %v1208_v30 = vadd.f32 %v1207_v8, %v7056_v41  ;;  %v991_v52 = vadd.f32 %v990_v10, %v7060_v44  ;;  %v992_v24 = vpop.f32.mrb[42].mxu1  ;;  %v1211_v23 = vpop.f32.mrb[42].mxu0  ;;  %v1210_v62 = vadd.f32 %v1209_v49, %v7064_v45  ;;  %v7198_v8 = vld [vmem:[#allocation9 + $0x930] sm:$0xff] }
 0x238   : > { %v1512_v33 = vmax.f32 %v985_v48, 0.0  ;;  %v1518_v21 = vmax.f32 %v1204_v51, 0.0  ;;  %v993_v40 = vadd.f32 %v992_v24, %v7052_v47  ;;  %v994_v46 = vpop.f32.mrb[43].mxu1  ;;  %v1213_v34 = vpop.f32.mrb[43].mxu0  ;;  %v7200_v48 = vld [vmem:[#allocation9 + $0x948] sm:$0xff]  ;;  %v1212_v49 = vadd.f32 %v1211_v23, %v7056_v41 }
 0x239   : > { %v1531_v50 = vmax.f32 %v989_v12, 0.0  ;;  %v1537_v63 = vmax.f32 %v1208_v30, 0.0  ;;  %v1532_v54 = vmax.f32 %v991_v52, 0.0  ;;  %v1538_v3 = vmax.f32 %v1210_v62, 0.0  ;;  %v7204_v30 = vld [vmem:[#allocation9 + $0x368] sm:$0xff]  ;;  %v7206_v52 = vld [vmem:[#allocation9 + $0x380] sm:$0xff] }
 0x23a   : > { %v1701_v37 = vadd.f32 %v1700_v61, %v1512_v33  ;;  %v1779_v42 = vadd.f32 %v1778_v4, %v1518_v21  ;;  %v1551_v5 = vmax.f32 %v993_v40, 0.0  ;;  %v995_v12 = vadd.f32 %v994_v46, %v7060_v44  ;;  %7701 = vst [vmem:[#allocation22_spill] sm:$0xff] %v7204_v30 }
 0x23b   : > { %v1689_v51 = vadd.f32 %v1688_v0, %v1531_v50  ;;  %v1767_v10 = vadd.f32 %v1766_v9, %v1537_v63  ;;  %v1214_v61 = vadd.f32 %v1213_v34, %v7064_v45  ;;  %v1557_v21 = vmax.f32 %v1212_v49, 0.0 }
 0x23c   : > { %v1702_v24 = vadd.f32 %v1701_v37, %v1532_v54  ;;  %v1780_v53 = vadd.f32 %v1779_v42, %v1538_v3  ;;  %v1552_v62 = vmax.f32 %v995_v12, 0.0 }
 0x23d   : > { %v1690_v33 = vadd.f32 %v1689_v51, %v1551_v5  ;;  %v998_v0 = vpop.f32.mrb[44].mxu1  ;;  %v1217_v9 = vpop.f32.mrb[44].mxu0  ;;  %v1558_v40 = vmax.f32 %v1214_v61, 0.0  ;;  %v1768_v37 = vadd.f32 %v1767_v10, %v1557_v21  ;;  %v7224_v21 = vld [vmem:[#allocation9 + $0x980] sm:$0xff] }
 0x23e   : > { %v999_v46 = vadd.f32 %v998_v0, %v7052_v47  ;;  %v1218_v50 = vadd.f32 %v1217_v9, %v7056_v41  ;;  %v1000_v63 = vpop.f32.mrb[45].mxu1  ;;  %v1219_v54 = vpop.f32.mrb[45].mxu0  ;;  %v1703_v42 = vadd.f32 %v1702_v24, %v1552_v62  ;;  %7703 = vst [vmem:[#allocation24_spill] sm:$0xff] %v7224_v21  ;;  %v7226_v62 = vld [vmem:[#allocation9 + $0x360] sm:$0xff] }
 0x23f   : > { %v1001_v3 = vadd.f32 %v1000_v63, %v7060_v44  ;;  %v1220_v5 = vadd.f32 %v1219_v54, %v7064_v45  ;;  %v1002_v51 = vpop.f32.mrb[46].mxu1  ;;  %v1221_v49 = vpop.f32.mrb[46].mxu0  ;;  %v1781_v12 = vadd.f32 %v1780_v53, %v1558_v40  ;;  %7704 = vst [vmem:[#allocation25_spill] sm:$0xff] %v7226_v62  ;;  %v7228_v63 = vld [vmem:[#allocation9 + $0x378] sm:$0xff] }
 0x240   : > { %v1571_v23 = vmax.f32 %v999_v46, 0.0  ;;  %v1577_v61 = vmax.f32 %v1218_v50, 0.0  ;;  %v1003_v0 = vadd.f32 %v1002_v51, %v7052_v47  ;;  %v1004_v4 = vpop.f32.mrb[47].mxu1  ;;  %v1223_v9 = vpop.f32.mrb[47].mxu0  ;;  %v1222_v10 = vadd.f32 %v1221_v49, %v7056_v41  ;;  %7705 = vst [vmem:[#allocation26_spill] sm:$0xff] %v7228_v63  ;;  %v7231_v50 = vld [vmem:[#allocation9 + $0x960] sm:$0xff] }
 0x241   : > { %v1572_v1 = vmax.f32 %v1001_v3, 0.0  ;;  %v1578_v22 = vmax.f32 %v1220_v5, 0.0  ;;  %v1005_v24 = vadd.f32 %v1004_v4, %v7060_v44  ;;  %v1224_v47 = vadd.f32 %v1223_v9, %v7064_v45  ;;  %7706 = vst [vmem:[#allocation27_spill] sm:$0xff] %v7231_v50  ;;  %v7233_v54 = vld [vmem:[#allocation9 + $0x978] sm:$0xff] }
 0x242   : > { %v1691_v53 = vadd.f32 %v1690_v33, %v1571_v23  ;;  %v1769_v40 = vadd.f32 %v1768_v37, %v1577_v61  ;;  %v1591_v46 = vmax.f32 %v1003_v0, 0.0  ;;  %7707 = vst [vmem:[#allocation28_spill] sm:$0xff] %v7233_v54  ;;  %v1597_v41 = vmax.f32 %v1222_v10, 0.0 }
 0x243   : > { %v1704_v3 = vadd.f32 %v1703_v42, %v1572_v1  ;;  %v1782_v5 = vadd.f32 %v1781_v12, %v1578_v22  ;;  %v1592_v51 = vmax.f32 %v1005_v24, 0.0  ;;  %v1598_v4 = vmax.f32 %v1224_v47, 0.0 }
 0x244   : > { %v1692_v44 = vadd.f32 %v1691_v53, %v1591_v46  ;;  %v7708_v45 = vcombine.low %v7076_v59, %v7082_v2  ;;  %v1770_v37 = vadd.f32 %v1769_v40, %v1597_v41 }
 0x245   : > { %v1705_v61 = vadd.f32 %v1704_v3, %v1592_v51  ;;  %v1114_v1 = vpop.f32.mrb[48].mxu1  ;;  %v1333_v22 = vpop.f32.mrb[48].mxu0  ;;  %v1783_v0 = vadd.f32 %v1782_v5, %v1598_v4 }
 0x246   : > { %v7243_v23 = vrot.slane %v7708_v45, %v7032_v6  ;;  %v1693_v12 = vrot.slane %v1692_v44, 4  ;;  %v1115_v9 = vadd.f32 %v1114_v1, %v7094_v15  ;;  %v1334_v10 = vadd.f32 %v1333_v22, %v7097_v17  ;;  %v1116_v24 = vpop.f32.mrb[49].mxu1  ;;  %v1335_v53 = vpop.f32.mrb[49].mxu0 }
 0x247   : > { %v1771_v46 = vrot.slane %v1770_v37, 4  ;;  %v1706_v47 = vrot.slane %v1705_v61, 4  ;;  %v1117_v59 = vadd.f32 %v1116_v24, %v7115_v39  ;;  %v1336_v2 = vadd.f32 %v1335_v53, %v7118_v27  ;;  %v1118_v40 = vpop.f32.mrb[50].mxu1  ;;  %v1337_v3 = vpop.f32.mrb[50].mxu0 }
 0x248   : > { %v1694_v41 = vadd.f32 %v1693_v12, %v1692_v44  ;;  %v1784_v51 = vrot.slane %v1783_v0, 4  ;;  %v1455_v45 = vmax.f32 %v1115_v9, 0.0  ;;  %v1461_v42 = vmax.f32 %v1334_v10, 0.0  ;;  %v1120_v33 = vpop.f32.mrb[51].mxu1  ;;  %v1339_v5 = vpop.f32.mrb[51].mxu0 }
 0x249   : > { %v1772_v4 = vadd.f32 %v1771_v46, %v1770_v37  ;;  %v1707_v1 = vadd.f32 %v1706_v47, %v1705_v61  ;;  %v1456_v49 = vmax.f32 %v1117_v59, 0.0  ;;  %v1462_v22 = vmax.f32 %v1336_v2, 0.0 }
 0x24a   : > { %v1695_v34 = vrot.slane %v1694_v41, 2  ;;  %v1785_v11 = vadd.f32 %v1784_v51, %v1783_v0  ;;  %v1119_v43 = vadd.f32 %v1118_v40, %v7094_v15  ;;  %v1338_v24 = vadd.f32 %v1337_v3, %v7097_v17 }
 0x24b   : > { %v1773_v50 = vrot.slane %v1772_v4, 2  ;;  %v1708_v53 = vrot.slane %v1707_v1, 2  ;;  %v1121_v54 = vadd.f32 %v1120_v33, %v7115_v39  ;;  %v1340_v44 = vadd.f32 %v1339_v5, %v7118_v27 }
 0x24c   : > { %v1696_v12 = vadd.f32 %v1695_v34, %v1694_v41  ;;  %v1786_v9 = vrot.slane %v1785_v11, 2  ;;  %v1475_v10 = vmax.f32 %v1119_v43, 0.0  ;;  %v1481_v62 = vmax.f32 %v1338_v24, 0.0 }
 0x24d   : > { %v1774_v37 = vadd.f32 %v1773_v50, %v1772_v4  ;;  %v1709_v61 = vadd.f32 %v1708_v53, %v1707_v1  ;;  %v1476_v46 = vmax.f32 %v1121_v54, 0.0  ;;  %v1482_v47 = vmax.f32 %v1340_v44, 0.0  ;;  %v1124_v59 = vpop.f32.mrb[52].mxu1  ;;  %v1343_v0 = vpop.f32.mrb[52].mxu0 }
 0x24e   : > { %v1697_v2 = vrot.slane %v1696_v12, 1  ;;  %v1787_v40 = vadd.f32 %v1786_v9, %v1785_v11  ;;  %v1738_v51 = vadd.f32 %v1475_v10, %v1455_v45  ;;  %v1816_v3 = vadd.f32 %v1481_v62, %v1461_v42  ;;  %v1126_v63 = vpop.f32.mrb[53].mxu1  ;;  %v1345_v55 = vpop.f32.mrb[53].mxu0 }
 0x24f   : > { %v1775_v21 = vrot.slane %v1774_v37, 1  ;;  %v1710_v33 = vrot.slane %v1709_v61, 1  ;;  %v1751_v30 = vadd.f32 %v1476_v46, %v1456_v49  ;;  %v1829_v5 = vadd.f32 %v1482_v47, %v1462_v22  ;;  %v1128_v34 = vpop.f32.mrb[54].mxu1  ;;  %v1347_v41 = vpop.f32.mrb[54].mxu0 }
 0x250   : > { %v1698_v43 = vadd.f32 %v1697_v2, %v1696_v12  ;;  %v1788_v24 = vrot.slane %v1787_v40, 1  ;;  %v1125_v50 = vadd.f32 %v1124_v59, %v7094_v15  ;;  %v1344_v54 = vadd.f32 %v1343_v0, %v7097_v17  ;;  %v1130_v4 = vpop.f32.mrb[55].mxu1  ;;  %v1349_v1 = vpop.f32.mrb[55].mxu0 }
 0x251   : > { %v7257_v53 = vadd.f32 %v1775_v21, %v1774_v37  ;;  %v1711_v11 = vadd.f32 %v1710_v33, %v1709_v61  ;;  %v1127_v62 = vadd.f32 %v1126_v63, %v7115_v39  ;;  %v1346_v42 = vadd.f32 %v1345_v55, %v7118_v27 }
 0x252   : > { %v7261_v45 = vadd.f32 %v1788_v24, %v1787_v40  ;;  %v1495_v49 = vmax.f32 %v1125_v50, 0.0  ;;  %v1501_v22 = vmax.f32 %v1344_v54, 0.0  ;;  %v1129_v44 = vadd.f32 %v1128_v34, %v7094_v15 }
 0x253   : > { %v1891_v12 = vcombine.low %v1698_v43, %v1711_v11  ;;  %v1496_v9 = vmax.f32 %v1127_v62, 0.0  ;;  %v1502_v10 = vmax.f32 %v1346_v42, 0.0  ;;  %v1348_v46 = vadd.f32 %v1347_v41, %v7097_v17 }
 0x254   : > { %v1939_v21 = vcombine.low %v7257_v53, %v7261_v45  ;;  %v1739_v37 = vadd.f32 %v1738_v51, %v1495_v49  ;;  %v1817_v61 = vadd.f32 %v1816_v3, %v1501_v22  ;;  %v1515_v47 = vmax.f32 %v1129_v44, 0.0 }
 0x255   : > { %v1919_v63 = vrot.slane %v1891_v12, %v7032_v6  ;;  %v1752_v55 = vadd.f32 %v1751_v30, %v1496_v9  ;;  %v1830_v59 = vadd.f32 %v1829_v5, %v1502_v10  ;;  %v1521_v0 = vmax.f32 %v1348_v46, 0.0  ;;  %v1134_v2 = vpop.f32.mrb[56].mxu1  ;;  %v1353_v40 = vpop.f32.mrb[56].mxu0 }
 0x256   : > { %v7709_v33 = vcombine.low %v7174_v18, %v7177_v60  ;;  %v1740_v43 = vadd.f32 %v1739_v37, %v1515_v47  ;;  %v1131_v41 = vadd.f32 %v1130_v4, %v7115_v39  ;;  %v1350_v24 = vadd.f32 %v1349_v1, %v7118_v27  ;;  %v1136_v51 = vpop.f32.mrb[57].mxu1  ;;  %v1355_v3 = vpop.f32.mrb[57].mxu0  ;;  %v7283_v47 = vld [vmem:[#allocation9 + $0x3b0] sm:$0xff] }
 0x257   : > { %v1921_v50 = vcombine.low %v7243_v23, %v1919_v63  ;;  %v1818_v54 = vadd.f32 %v1817_v61, %v1521_v0  ;;  %v1135_v30 = vadd.f32 %v1134_v2, %v7094_v15  ;;  %v1354_v5 = vadd.f32 %v1353_v40, %v7097_v17  ;;  %v1138_v11 = vpop.f32.mrb[58].mxu1  ;;  %v1357_v62 = vpop.f32.mrb[58].mxu0  ;;  %v7281_v61 = vld [vmem:[#allocation9 + $0x398] sm:$0xff] }
 0x258   : > { %v1928_v34 = vrot.slane %v7709_v33, %v7032_v6  ;;  %v1516_v42 = vmax.f32 %v1131_v41, 0.0  ;;  %v1522_v49 = vmax.f32 %v1350_v24, 0.0  ;;  %v1137_v18 = vadd.f32 %v1136_v51, %v7115_v39  ;;  %v1140_v4 = vpop.f32.mrb[59].mxu1  ;;  %v1359_v22 = vpop.f32.mrb[59].mxu0 }
 0x259   : > { %v1356_v60 = vadd.f32 %v1355_v3, %v7118_v27  ;;  %v1935_v1 = vrot.slane %v1921_v50, %v7032_v6  ;;  %v1535_v44 = vmax.f32 %v1135_v30, 0.0  ;;  %v1541_v12 = vmax.f32 %v1354_v5, 0.0 }
 0x25a   : > { %v1139_v23 = vadd.f32 %v1138_v11, %v7094_v15  ;;  %v1753_v9 = vadd.f32 %v1752_v55, %v1516_v42  ;;  %v1831_v10 = vadd.f32 %v1830_v59, %v1522_v49  ;;  %v1536_v46 = vmax.f32 %v1137_v18, 0.0 }
 0x25b   : > { %v1542_v37 = vmax.f32 %v1356_v60, 0.0  ;;  %v7285_v63 = vcombine.low %v1928_v34, %v1935_v1  ;;  %v1741_v0 = vadd.f32 %v1740_v43, %v1535_v44  ;;  %v1819_v2 = vadd.f32 %v1818_v54, %v1541_v12 }
 0x25c   : > { %v1555_v40 = vmax.f32 %v1139_v23, 0.0  ;;  %v1754_v33 = vadd.f32 %v1753_v9, %v1536_v46  ;;  %v1358_v24 = vadd.f32 %v1357_v62, %v7097_v17  ;;  %v1141_v51 = vadd.f32 %v1140_v4, %v7115_v39 }
 0x25d   : > { %v1832_v41 = vadd.f32 %v1831_v10, %v1542_v37  ;;  %v1360_v55 = vadd.f32 %v1359_v22, %v7118_v27  ;;  %v1144_v59 = vpop.f32.mrb[60].mxu1  ;;  %v1363_v50 = vpop.f32.mrb[60].mxu0  ;;  %v5211_v30 = vpack.c.bf16 %v7283_v47, %v7281_v61  ;;  %v7298_v22 = vrot.slane %v7285_v63, %v6961_v35 }
 0x25e   : > { %v1742_v3 = vadd.f32 %v1741_v0, %v1555_v40  ;;  %v1561_v5 = vmax.f32 %v1358_v24, 0.0  ;;  %v1556_v34 = vmax.f32 %v1141_v51, 0.0  ;;  %v1145_v43 = vadd.f32 %v1144_v59, %v7094_v15  ;;  %v1146_v11 = vpop.f32.mrb[61].mxu1  ;;  %v1365_v42 = vpop.f32.mrb[61].mxu0 }
 0x25f   : > { %v1364_v54 = vadd.f32 %v1363_v50, %v7097_v17  ;;  %v1562_v49 = vmax.f32 %v1360_v55, 0.0  ;;  %v1147_v62 = vadd.f32 %v1146_v11, %v7115_v39  ;;  %v1366_v18 = vadd.f32 %v1365_v42, %v7118_v27  ;;  %v1148_v60 = vpop.f32.mrb[62].mxu1  ;;  %v1367_v4 = vpop.f32.mrb[62].mxu0  ;;  %3173 = vmatprep.mubr.f32.mxu1 %v7298_v22  ;;  %v7321_v11 = vld [vmem:[#allocation9 + $0x998] sm:$0xff]  ;;  %v7323_v42 = vld [vmem:[#allocation9 + $0x9b0] sm:$0xff] }
 0x260   : > { %v1820_v1 = vadd.f32 %v1819_v2, %v1561_v5  ;;  %v1755_v44 = vadd.f32 %v1754_v33, %v1556_v34  ;;  %v1575_v12 = vmax.f32 %v1145_v43, 0.0  ;;  %v1150_v9 = vpop.f32.mrb[63].mxu1  ;;  %v1369_v10 = vpop.f32.mrb[63].mxu0  ;;  %v1149_v40 = vadd.f32 %v1148_v60, %v7094_v15 }
 0x261   : > { %v1581_v23 = vmax.f32 %v1364_v54, 0.0  ;;  %v1833_v46 = vadd.f32 %v1832_v41, %v1562_v49  ;;  %v1576_v37 = vmax.f32 %v1147_v62, 0.0  ;;  %v1582_v0 = vmax.f32 %v1366_v18, 0.0 }
 0x262   : > { %v1743_v24 = vadd.f32 %v1742_v3, %v1575_v12  ;;  %v1368_v55 = vadd.f32 %v1367_v4, %v7097_v17  ;;  %v1151_v59 = vadd.f32 %v1150_v9, %v7115_v39  ;;  %v1595_v33 = vmax.f32 %v1149_v40, 0.0  ;;  %v7328_v4 = vld [vmem:[#allocation9 + $0x390] sm:$0xff]  ;;  %v2464_v12 = vld [vmem:[#allocation9 + $0xd98] sm:$0xff] }
 0x263   : > { %v1821_v51 = vadd.f32 %v1820_v1, %v1581_v23  ;;  %v1756_v50 = vadd.f32 %v1755_v44, %v1576_v37  ;;  %v1834_v2 = vadd.f32 %v1833_v46, %v1582_v0  ;;  %v1370_v5 = vadd.f32 %v1369_v10, %v7118_v27  ;;  %v7330_v1 = vld [vmem:[#allocation9 + $0x3a8] sm:$0xff] }
 0x264   : > { %v1601_v34 = vmax.f32 %v1368_v55, 0.0  ;;  %v1596_v43 = vmax.f32 %v1151_v59, 0.0  ;;  %v7307_v41 = vrot.slane %v7285_v63, %v6964_v36  ;;  %v7311_v15 = vrot.slane %v7285_v63, %v6953_v31 }
 0x265   : > { %v1744_v3 = vadd.f32 %v1743_v24, %v1595_v33  ;;  %v1602_v54 = vmax.f32 %v1370_v5, 0.0  ;;  %v1260_v17 = vpop.f32.mrb[64].mxu1  ;;  %v7315_v39 = vrot.slane %v7285_v63, %v6956_v32  ;;  %v7319_v27 = vrot.slane %v7285_v63, %v7009_v29 }
 0x266   : > { %v1822_v49 = vadd.f32 %v1821_v51, %v1601_v34  ;;  %v1757_v62 = vadd.f32 %v1756_v50, %v1596_v43  ;;  %v1261_v18 = vadd.f32 %v1260_v17, %v7140_v7  ;;  %v1262_v60 = vpop.f32.mrb[65].mxu1  ;;  %3315 = vmatprep.mubr.f32.mxu0 %v7307_v41  ;;  %3174 = vmatmul.mubr.f32.vlgmr.msra.gmra.mrb[96].mxu1 %v7311_v15  ;;  %v7710_v44 = vlaneseq }
 0x267   : > { %v1745_v23 = vrot.slane %v1744_v3, 4  ;;  %v1835_v9 = vadd.f32 %v1834_v2, %v1602_v54  ;;  %v1263_v10 = vadd.f32 %v1262_v60, %v7146_v14  ;;  %v1264_v46 = vpop.f32.mrb[66].mxu1  ;;  %v7713_v37 = vpack.c.bf16 %v7111_v26, %v7109_v25  ;;  %3316 = vmatmul.mubr.f32.vlgmr.msra.gmra.mrb[64].mxu0 %v7315_v39  ;;  %3244 = vmatprep.mubr.f32.mxu1 %v7319_v27  ;;  %v7371_v60 = vld [vmem:[#allocation9 + $0x3e0] sm:$0xff] }
 0x268   : > { %vm7333_vm1 = vcmp.lt.s32.totalorder %v7710_v44, 512  ;;  %v7344_v0 = vrot.slane %v7285_v63, %v7044_v13  ;;  %v6541_v40 = vmov 0.0   ;;  %v1823_v24 = vrot.slane %v1822_v49, 4  ;;  %v1266_v59 = vpop.f32.mrb[67].mxu1 }
 0x269   : > { %5202 = vmatpush1.bf16.msra.mxu1 %v7713_v37  ;;  %323 = vst.msk [vmem:[#allocation2 + $0x10] sm:$0xf] %vm7333_vm1, %v6541_v40  ;;  %v1758_v51 = vrot.slane %v1757_v62, 4  ;;  %v1265_v55 = vadd.f32 %v1264_v46, %v7140_v7  ;;  %v7714_v50 = vpack.c.bf16 %v7132_v20, %v7130_v19  ;;  %v5339_v25 = vpack.c.bf16 %v7323_v42, %v7321_v11  ;;  %v7362_v19 = vld [vmem:[#allocation9 + $0x990] sm:$0xff]  ;;  %v7364_v20 = vld [vmem:[#allocation9 + $0x9a8] sm:$0xff] }
 0x26a   : > { %v1746_v26 = vadd.f32 %v1745_v23, %v1744_v3  ;;  %v1836_v2 = vrot.slane %v1835_v9, 4  ;;  %v1267_v33 = vadd.f32 %v1266_v59, %v7146_v14  ;;  %3386 = vmatprep.mubr.f32.mxu0 %v7344_v0  ;;  %v7715_v5 = vpack.c.bf16 %v7136_v58, %v7134_v38  ;;  %v7369_v42 = vld [vmem:[#allocation9 + $0x3c8] sm:$0xff] }
 0x26b   : > { %5330 = vmatpush1.bf16.msra.mxu0 %v7714_v50  ;;  %v5213_v34 = vpack.c.bf16 %v7330_v1, %v7328_v4  ;;  %v1824_v43 = vadd.f32 %v1823_v24, %v1822_v49  ;;  %v1759_v54 = vadd.f32 %v1758_v51, %v1757_v62  ;;  %v1459_v17 = vmax.f32 %v1261_v18, 0.0  ;;  %v7376_v49 = vld [vmem:[#allocation9 + $0x9c8] sm:$0xff]  ;;  %v7378_v62 = vld [vmem:[#allocation9 + $0x9e0] sm:$0xff] }
 0x26c   : > { %5204 = vmatprep.subr.bf16.mxu1 %v7715_v5  ;;  %v1479_v3 = vmax.f32 %v1265_v55, 0.0  ;;  %v7716_v11 = vpack.c.bf16 %v7183_v57, %v7181_v28  ;;  %v1747_v38 = vrot.slane %v1746_v26, 2  ;;  %v1837_v58 = vadd.f32 %v1836_v2, %v1835_v9  ;;  %v7719_v24 = vld [vmem:[#allocation22_spill] sm:$0xff]  ;;  %v7721_v2 = vld [vmem:[#allocation24_spill] sm:$0xff] }
 0x26d   : > { %v1460_v23 = vmax.f32 %v1263_v10, 0.0  ;;  %v1480_v46 = vmax.f32 %v1267_v33, 0.0  ;;  %v7717_v37 = vpack.c.bf16 %v7196_v16, %v7194_v56  ;;  %v1825_v18 = vrot.slane %v1824_v43, 2  ;;  %v7388_v56 = vld [vmem:[#allocation9 + $0x3c0] sm:$0xff]  ;;  %v7390_v16 = vld [vmem:[#allocation9 + $0x3d8] sm:$0xff]  ;;  %v1270_v50 = vpop.f32.mrb[68].mxu1 }
 0x26e   : > { %5332 = vmatprep.subr.bf16.mxu0 %v7716_v11  ;;  %v1760_v40 = vrot.slane %v1759_v54, 2  ;;  %v1790_v28 = vadd.f32 %v1479_v3, %v1459_v17  ;;  %v7718_v57 = vpack.c.bf16 %v7200_v48, %v7198_v8  ;;  %v7720_v9 = vpack.c.bf16 %v7206_v52, %v7719_v24  ;;  %v7722_v33 = vld [vmem:[#allocation23_spill] sm:$0xff]  ;;  %v2165_v4 = vld [vmem:[#allocation9 + $0x440] sm:$0xff] }
 0x26f   : > { %5206 = vmatpush1.bf16.msra.mxu1 %v7717_v37  ;;  %v5341_v10 = vpack.c.bf16 %v7364_v20, %v7362_v19  ;;  %v1748_v51 = vadd.f32 %v1747_v38, %v1746_v26  ;;  %v1838_v55 = vrot.slane %v1837_v58, 2  ;;  %v1803_v59 = vadd.f32 %v1480_v46, %v1460_v23  ;;  %v1272_v19 = vpop.f32.mrb[69].mxu1  ;;  %v7724_v23 = vld [vmem:[#allocation26_spill] sm:$0xff]  ;;  %v7725_v46 = vld [vmem:[#allocation25_spill] sm:$0xff]  ;;  %v2344_v24 = vld [vmem:[#allocation9 + $0x9d8] sm:$0xff] }
 0x270   : > { %5334 = vmatpush1.bf16.msra.mxu0 %v7718_v57  ;;  %5208 = vmatprep.subr.bf16.mxu1 %v7720_v9  ;;  %v7723_v5 = vpack.c.bf16 %v7721_v2, %v7722_v33  ;;  %v5215_v8 = vpack.c.bf16 %v7371_v60, %v7369_v42  ;;  %v1826_v48 = vadd.f32 %v1825_v18, %v1824_v43  ;;  %v1274_v38 = vpop.f32.mrb[70].mxu1  ;;  %v7727_v57 = vld [vmem:[#allocation28_spill] sm:$0xff]  ;;  %v2159_v2 = vld [vmem:[#allocation9 + $0x410] sm:$0xff]  ;;  %vm4546_vm2 = vcmp.lt.s32.totalorder %v7710_v44, 384 }
 0x271   : > { %v1761_v52 = vadd.f32 %v1760_v40, %v1759_v54  ;;  %v1271_v17 = vadd.f32 %v1270_v50, %v7140_v7  ;;  %v5343_v20 = vpack.c.bf16 %v7378_v62, %v7376_v49  ;;  %v1749_v3 = vrot.slane %v1748_v51, 1  ;;  %v1276_v40 = vpop.f32.mrb[71].mxu1  ;;  %v7728_v49 = vld [vmem:[#allocation27_spill] sm:$0xff]  ;;  %v7730_v1 = vld [vmem:[#allocation20_spill] sm:$0xff] }
 0x272   : > { %5336 = vmatprep.subr.bf16.mxu0 %v7723_v5  ;;  %v1839_v26 = vadd.f32 %v1838_v55, %v1837_v58  ;;  %v1273_v11 = vadd.f32 %v1272_v19, %v7146_v14  ;;  %v7726_v37 = vpack.c.bf16 %v7724_v23, %v7725_v46  ;;  %v5217_v42 = vpack.c.bf16 %v7390_v16, %v7388_v56  ;;  %v2341_v58 = vld [vmem:[#allocation9 + $0x9c0] sm:$0xff]  ;;  %v2156_v16 = vld [vmem:[#allocation9 + $0x3f8] sm:$0xff]  ;;  %v2351_v23 = vld [vmem:[#allocation9 + $0xa10] sm:$0xff] }
 0x273   : > { %v1827_v43 = vrot.slane %v1826_v48, 1  ;;  %v1762_v54 = vrot.slane %v1761_v52, 1  ;;  %v1499_v60 = vmax.f32 %v1271_v17, 0.0  ;;  %v1275_v18 = vadd.f32 %v1274_v38, %v7140_v7  ;;  %v2348_v38 = vld [vmem:[#allocation9 + $0x9f8] sm:$0xff] }
 0x274   : > { %5210 = vmatpush1.bf16.msra.mxu1 %v7726_v37  ;;  %v7729_v62 = vpack.c.bf16 %v7727_v57, %v7728_v49  ;;  %v1750_v9 = vadd.f32 %v1749_v3, %v1748_v51  ;;  %v1840_v55 = vrot.slane %v1839_v26, 1  ;;  %v1500_v50 = vmax.f32 %v1273_v11, 0.0  ;;  %v2155_v51 = vld [vmem:[#allocation9 + $0x3f0] sm:$0xff]  ;;  %v2350_v11 = vld [vmem:[#allocation9 + $0xa08] sm:$0xff]  ;;  %v2357_v49 = vld [vmem:[#allocation9 + $0xa40] sm:$0xff] }
 0x275   : > { %5212 = vmatprep.subr.bf16.mxu1 %v5211_v30  ;;  %v1277_v56 = vadd.f32 %v1276_v40, %v7146_v14  ;;  %v7414_v33 = vadd.f32 %v1827_v43, %v1826_v48  ;;  %v1763_v5 = vadd.f32 %v1762_v54, %v1761_v52  ;;  %v1791_v17 = vadd.f32 %v1790_v28, %v1499_v60  ;;  %v2158_v52 = vld [vmem:[#allocation9 + $0x408] sm:$0xff]  ;;  %v2347_v28 = vld [vmem:[#allocation9 + $0x9f0] sm:$0xff] }
 0x276   : > { %5338 = vmatpush1.bf16.msra.mxu0 %v7729_v62  ;;  %v1519_v19 = vmax.f32 %v1275_v18, 0.0  ;;  %v7416_v46 = vadd.f32 %v1840_v55, %v1839_v26  ;;  %v1804_v61 = vadd.f32 %v1803_v59, %v1500_v50  ;;  %v5345_v30 = vpack.c.bf16 %v2344_v24, %v2341_v58  ;;  %v1280_v59 = vpop.f32.mrb[72].mxu1  ;;  %v2162_v54 = vld [vmem:[#allocation9 + $0x428] sm:$0xff] }
 0x277   : > { %5340 = vmatprep.subr.bf16.mxu0 %v5339_v25  ;;  %v1520_v47 = vmax.f32 %v1277_v56, 0.0  ;;  %v1938_v25 = vcombine.low %v1750_v9, %v1763_v5  ;;  %v5219_v48 = vpack.c.bf16 %v2159_v2, %v2156_v16  ;;  %v5347_v43 = vpack.c.bf16 %v2351_v23, %v2348_v38  ;;  %v1282_v40 = vpop.f32.mrb[73].mxu1  ;;  %v2354_v57 = vld [vmem:[#allocation9 + $0xa28] sm:$0xff]  ;;  %v2161_v2 = vld [vmem:[#allocation9 + $0x420] sm:$0xff]  ;;  %v2164_v5 = vld [vmem:[#allocation9 + $0x438] sm:$0xff] }
 0x278   : > { %5214 = vmatpush1.bf16.msra.mxu1 %v5213_v34  ;;  %v1792_v3 = vadd.f32 %v1791_v17, %v1519_v19  ;;  %v1986_v26 = vcombine.low %v7414_v33, %v7416_v46  ;;  %v7731_v34 = vld [vmem:[#allocation21_spill] sm:$0xff]  ;;  %v1283_v62 = vadd.f32 %v1282_v40, %v7146_v14  ;;  %v5221_v58 = vpack.c.bf16 %v2158_v52, %v2155_v51  ;;  %v2356_v23 = vld [vmem:[#allocation9 + $0xa38] sm:$0xff]  ;;  %v2067_v33 = vld [vmem:[#allocation9 + $0x130] sm:$0xff] }
 0x279   : > { %5216 = vmatprep.subr.bf16.mxu1 %v5215_v8  ;;  %v1805_v37 = vadd.f32 %v1804_v61, %v1520_v47  ;;  %v7732_v60 = vcombine.low %v7730_v1, %v7731_v34  ;;  %v1281_v8 = vadd.f32 %v1280_v59, %v7140_v7  ;;  %v5349_v24 = vpack.c.bf16 %v2350_v11, %v2347_v28  ;;  %v2353_v17 = vld [vmem:[#allocation9 + $0xa20] sm:$0xff]  ;;  %v2168_v61 = vld [vmem:[#allocation9 + $0x458] sm:$0xff]  ;;  %v2171_v47 = vld [vmem:[#allocation9 + $0x470] sm:$0xff] }
 0x27a   : > { %5342 = vmatpush1.bf16.msra.mxu0 %v5341_v10  ;;  %v7430_v10 = vrot.slane %v1938_v25, %v7032_v6  ;;  %v5223_v16 = vpack.c.bf16 %v2165_v4, %v2162_v54  ;;  %v1540_v19 = vmax.f32 %v1283_v62, 0.0  ;;  %v2360_v52 = vld [vmem:[#allocation9 + $0xa58] sm:$0xff]  ;;  %v2363_v28 = vld [vmem:[#allocation9 + $0xa70] sm:$0xff]  ;;  %v5353_v54 = vpack.c.bf16 %v2356_v23, %v2353_v17  ;;  %v2170_v34 = vld [vmem:[#allocation9 + $0x468] sm:$0xff] }
 0x27b   : > { %5344 = vmatprep.subr.bf16.mxu0 %v5343_v20  ;;  %v7427_v18 = vrot.slane %v7732_v60, %v7032_v6  ;;  %v1284_v20 = vpop.f32.mrb[74].mxu1  ;;  %v1539_v55 = vmax.f32 %v1281_v8, 0.0  ;;  %v5227_v4 = vpack.c.bf16 %v2171_v47, %v2168_v61  ;;  %v2167_v1 = vld [vmem:[#allocation9 + $0x450] sm:$0xff]  ;;  %v5355_v40 = vpack.c.bf16 %v2363_v28, %v2360_v52  ;;  %v2070_v46 = vld [vmem:[#allocation9 + $0x148] sm:$0xff] }
 0x27c   : > { %5218 = vmatpush1.bf16.msra.mxu1 %v5217_v42  ;;  %v1285_v50 = vadd.f32 %v1284_v20, %v7140_v7  ;;  %v1286_v56 = vpop.f32.mrb[75].mxu1  ;;  %v5351_v42 = vpack.c.bf16 %v2357_v49, %v2354_v57  ;;  %v1806_v11 = vadd.f32 %v1805_v37, %v1540_v19  ;;  %v2174_v57 = vld [vmem:[#allocation9 + $0x488] sm:$0xff]  ;;  %v2177_v49 = vld [vmem:[#allocation9 + $0x4a0] sm:$0xff]  ;;  %v2183_v52 = vld [vmem:[#allocation9 + $0x4d0] sm:$0xff] }
 0x27d   : > { %v1969_v9 = vcombine.low %v7427_v18, %v7430_v10  ;;  %5220 = vmatprep.subr.bf16.mxu1 %v5219_v48  ;;  %v1287_v38 = vadd.f32 %v1286_v56, %v7146_v14  ;;  %v1793_v51 = vadd.f32 %v1792_v3, %v1539_v55  ;;  %v1290_v8 = vpop.f32.mrb[76].mxu1  ;;  %v2362_v3 = vld [vmem:[#allocation9 + $0xa68] sm:$0xff]  ;;  %v5231_v17 = vpack.c.bf16 %v2177_v49, %v2174_v57  ;;  %v2173_v19 = vld [vmem:[#allocation9 + $0x480] sm:$0xff]  ;;  %v2371_v49 = vld [vmem:[#allocation9 + $0xab0] sm:$0xff] }
 0x27e   : > { %5346 = vmatpush1.bf16.msra.mxu0 %v5345_v30  ;;  %v1559_v25 = vmax.f32 %v1285_v50, 0.0  ;;  %v5225_v30 = vpack.c.bf16 %v2164_v5, %v2161_v2  ;;  %v1291_v37 = vadd.f32 %v1290_v8, %v7140_v7  ;;  %v1292_v62 = vpop.f32.mrb[77].mxu1  ;;  %v2366_v20 = vld [vmem:[#allocation9 + $0xa88] sm:$0xff]  ;;  %v5229_v50 = vpack.c.bf16 %v2170_v34, %v2167_v1  ;;  %v2179_v8 = vld [vmem:[#allocation9 + $0x4b0] sm:$0xff] }
 0x27f   : > { %5348 = vmatprep.subr.bf16.mxu0 %v5347_v43  ;;  %v1560_v59 = vmax.f32 %v1287_v38, 0.0  ;;  %v2359_v43 = vld [vmem:[#allocation9 + $0xa50] sm:$0xff]  ;;  %v1294_v55 = vpop.f32.mrb[78].mxu1  ;;  %v2176_v38 = vld [vmem:[#allocation9 + $0x498] sm:$0xff]  ;;  %v2182_v57 = vld [vmem:[#allocation9 + $0x4c8] sm:$0xff] }
 0x280   : > { %5222 = vmatpush1.bf16.msra.mxu1 %v5221_v58  ;;  %v1794_v48 = vadd.f32 %v1793_v51, %v1559_v25  ;;  %v2369_v58 = vld [vmem:[#allocation9 + $0xaa0] sm:$0xff]  ;;  %v1579_v56 = vmax.f32 %v1291_v37, 0.0  ;;  %v1296_v2 = vpop.f32.mrb[79].mxu1  ;;  %v5357_v5 = vpack.c.bf16 %v2362_v3, %v2359_v43  ;;  %v2368_v51 = vld [vmem:[#allocation9 + $0xa98] sm:$0xff]  ;;  %v2374_v37 = vld [vmem:[#allocation9 + $0xac8] sm:$0xff] }
 0x281   : > { %5224 = vmatprep.subr.bf16.mxu1 %v5223_v16  ;;  %v1807_v60 = vadd.f32 %v1806_v11, %v1560_v59  ;;  %v1295_v16 = vadd.f32 %v1294_v55, %v7140_v7  ;;  %v1297_v61 = vadd.f32 %v1296_v2, %v7146_v14  ;;  %v5359_v47 = vpack.c.bf16 %v2369_v58, %v2366_v20  ;;  %v2180_v25 = vld [vmem:[#allocation9 + $0x4b8] sm:$0xff]  ;;  %v7733_v7 = vld [vmem:[#allocation18_spill] sm:$0xff]  ;;  %v2381_v2 = vld [vmem:[#allocation9 + $0xb00] sm:$0xff] }
 0x282   : > { %5350 = vmatpush1.bf16.msra.mxu0 %v5349_v24  ;;  %v1293_v24 = vadd.f32 %v1292_v62, %v7146_v14  ;;  %v1795_v28 = vadd.f32 %v1794_v48, %v1579_v56  ;;  %v6291_v59 = vld [vmem:[#allocation8 + $0x10] sm:$0xf]  ;;  %v5233_v14 = vpack.c.bf16 %v2176_v38, %v2173_v19  ;;  %v5235_v48 = vpack.c.bf16 %v2183_v52, %v2180_v25 }
 0x283   : > { %5352 = vmatprep.subr.bf16.mxu0 %v5351_v42  ;;  %v2365_v42 = vld [vmem:[#allocation9 + $0xa80] sm:$0xff]  ;;  %v1599_v11 = vmax.f32 %v1295_v16, 0.0  ;;  %v1600_v34 = vmax.f32 %v1297_v61, 0.0  ;;  %v7446_v43 = vrot.slane %v6291_v59, %v7009_v29  ;;  %v2378_v16 = vld [vmem:[#allocation9 + $0xae8] sm:$0xff]  ;;  %v5237_v38 = vpack.c.bf16 %v2182_v57, %v2179_v8  ;;  %v2188_v61 = vld [vmem:[#allocation9 + $0x4f8] sm:$0xff] }
 0x284   : > { %5226 = vmatpush1.bf16.msra.mxu1 %v5225_v30  ;;  %v1580_v23 = vmax.f32 %v1293_v24, 0.0  ;;  %v7443_v30 = vrot.slane %v6291_v59, %v7733_v7  ;;  %v5361_v3 = vpack.c.bf16 %v2368_v51, %v2365_v42  ;;  %v2189_v24 = vld [vmem:[#allocation9 + $0x500] sm:$0xff]  ;;  %v5365_v42 = vpack.c.bf16 %v2374_v37, %v2371_v49  ;;  %v2387_v37 = vld [vmem:[#allocation9 + $0xb30] sm:$0xff] }
 0x285   : > { %5228 = vmatprep.subr.bf16.mxu1 %v5227_v4  ;;  %v2375_v4 = vld [vmem:[#allocation9 + $0xad0] sm:$0xff]  ;;  %v1406_v20 = vpop.f32.mrb[80].mxu1 }
 0x286   : > { %5354 = vmatpush1.bf16.msra.mxu0 %v5353_v54  ;;  %v2372_v54 = vld [vmem:[#allocation9 + $0xab8] sm:$0xff]  ;;  %v1808_v1 = vadd.f32 %v1807_v60, %v1580_v23  ;;  %v2186_v60 = vld [vmem:[#allocation9 + $0x4e8] sm:$0xff]  ;;  %v1407_v56 = vadd.f32 %v1406_v20, %v7443_v30  ;;  %v2185_v23 = vld [vmem:[#allocation9 + $0x4e0] sm:$0xff] }
 0x287   : > { %5356 = vmatprep.subr.bf16.mxu0 %v5355_v40  ;;  %v1796_v40 = vadd.f32 %v1795_v28, %v1599_v11  ;;  %v5363_v58 = vpack.c.bf16 %v2375_v4, %v2372_v54  ;;  %v5239_v52 = vpack.c.bf16 %v2189_v24, %v2186_v60  ;;  %v2377_v28 = vld [vmem:[#allocation9 + $0xae0] sm:$0xff]  ;;  %v2380_v11 = vld [vmem:[#allocation9 + $0xaf8] sm:$0xff]  ;;  %v5367_v4 = vpack.c.bf16 %v2381_v2, %v2378_v16  ;;  %v2191_v60 = vld [vmem:[#allocation9 + $0x510] sm:$0xff] }
 0x288   : > { %5230 = vmatpush1.bf16.msra.mxu1 %v5229_v50  ;;  %v1809_v62 = vadd.f32 %v1808_v1, %v1600_v34  ;;  %v1408_v50 = vpop.f32.mrb[81].mxu1  ;;  %v2192_v1 = vld [vmem:[#allocation9 + $0x518] sm:$0xff]  ;;  %v2195_v34 = vld [vmem:[#allocation9 + $0x530] sm:$0xff]  ;;  %v1463_v8 = vmax.f32 %v1407_v56, 0.0  ;;  %v5241_v49 = vpack.c.bf16 %v2188_v61, %v2185_v23  ;;  %v2386_v2 = vld [vmem:[#allocation9 + $0xb28] sm:$0xff] }
 0x289   : > { %5232 = vmatprep.subr.bf16.mxu1 %v5231_v17  ;;  %v1797_v55 = vrot.slane %v1796_v40, 4  ;;  %v1410_v17 = vpop.f32.mrb[82].mxu1  ;;  %v2383_v16 = vld [vmem:[#allocation9 + $0xb10] sm:$0xff]  ;;  %v2198_v61 = vld [vmem:[#allocation9 + $0x548] sm:$0xff] }
 0x28a   : > { %5358 = vmatpush1.bf16.msra.mxu0 %v5357_v5  ;;  %v1810_v19 = vrot.slane %v1809_v62, 4  ;;  %v1409_v5 = vadd.f32 %v1408_v50, %v7446_v43  ;;  %v1412_v25 = vpop.f32.mrb[83].mxu1  ;;  %v2194_v50 = vld [vmem:[#allocation9 + $0x528] sm:$0xff] }
 0x28b   : > { %5360 = vmatprep.subr.bf16.mxu0 %v5359_v47  ;;  %v1798_v51 = vadd.f32 %v1797_v55, %v1796_v40  ;;  %v1411_v47 = vadd.f32 %v1410_v17, %v7443_v30  ;;  %v1413_v54 = vadd.f32 %v1412_v25, %v7446_v43  ;;  %v2384_v40 = vld [vmem:[#allocation9 + $0xb18] sm:$0xff] }
 0x28c   : > { %5234 = vmatpush1.bf16.msra.mxu1 %v5233_v14  ;;  %v1811_v59 = vadd.f32 %v1810_v19, %v1809_v62  ;;  %v1464_v55 = vmax.f32 %v1409_v5, 0.0  ;;  %v5371_v23 = vpack.c.bf16 %v2387_v37, %v2384_v40  ;;  %v2200_v40 = vld [vmem:[#allocation9 + $0x558] sm:$0xff]  ;;  %v2389_v37 = vld [vmem:[#allocation9 + $0xb40] sm:$0xff] }
 0x28d   : > { %5236 = vmatprep.subr.bf16.mxu1 %v5235_v48  ;;  %v1799_v14 = vrot.slane %v1798_v51, 2  ;;  %v1483_v57 = vmax.f32 %v1411_v47, 0.0  ;;  %v5369_v48 = vpack.c.bf16 %v2380_v11, %v2377_v28  ;;  %v1416_v17 = vpop.f32.mrb[84].mxu1  ;;  %v2201_v47 = vld [vmem:[#allocation9 + $0x560] sm:$0xff]  ;;  %v2390_v28 = vld [vmem:[#allocation9 + $0xb48] sm:$0xff] }
 0x28e   : > { %5362 = vmatpush1.bf16.msra.mxu0 %v5361_v3  ;;  %v1812_v20 = vrot.slane %v1811_v59, 2  ;;  %v1484_v3 = vmax.f32 %v1413_v54, 0.0  ;;  %v1418_v25 = vpop.f32.mrb[85].mxu1  ;;  %v5245_v54 = vpack.c.bf16 %v2194_v50, %v2191_v60  ;;  %v2204_v60 = vld [vmem:[#allocation9 + $0x578] sm:$0xff]  ;;  %v2207_v50 = vld [vmem:[#allocation9 + $0x590] sm:$0xff] }
 0x28f   : > { %5364 = vmatprep.subr.bf16.mxu0 %v5363_v58  ;;  %v1800_v24 = vadd.f32 %v1799_v14, %v1798_v51  ;;  %v1842_v62 = vadd.f32 %v1483_v57, %v1463_v8  ;;  %v5243_v58 = vpack.c.bf16 %v2195_v34, %v2192_v1  ;;  %v2393_v51 = vld [vmem:[#allocation9 + $0xb60] sm:$0xff]  ;;  %v5373_v1 = vpack.c.bf16 %v2386_v2, %v2383_v16  ;;  %v2396_v2 = vld [vmem:[#allocation9 + $0xb78] sm:$0xff] }
 0x290   : > { %5238 = vmatpush1.bf16.msra.mxu1 %v5237_v38  ;;  %v1813_v19 = vadd.f32 %v1812_v20, %v1811_v59  ;;  %v1855_v56 = vadd.f32 %v1484_v3, %v1464_v55  ;;  %v1417_v38 = vadd.f32 %v1416_v17, %v7443_v30  ;;  %v5247_v8 = vpack.c.bf16 %v2201_v47, %v2198_v61  ;;  %v2197_v57 = vld [vmem:[#allocation9 + $0x540] sm:$0xff]  ;;  %v2203_v47 = vld [vmem:[#allocation9 + $0x570] sm:$0xff] }
 0x291   : > { %5240 = vmatprep.subr.bf16.mxu1 %v5239_v52  ;;  %v1801_v5 = vrot.slane %v1800_v24, 1  ;;  %v1420_v52 = vpop.f32.mrb[86].mxu1  ;;  %v5375_v17 = vpack.c.bf16 %v2393_v51, %v2390_v28  ;;  %v5249_v61 = vpack.c.bf16 %v2200_v40, %v2197_v57  ;;  %v2395_v28 = vld [vmem:[#allocation9 + $0xb70] sm:$0xff]  ;;  %v2398_v51 = vld [vmem:[#allocation9 + $0xb88] sm:$0xff] }
 0x292   : > { %5366 = vmatpush1.bf16.msra.mxu0 %v5365_v42  ;;  %v1814_v11 = vrot.slane %v1813_v19, 1  ;;  %v1419_v42 = vadd.f32 %v1418_v25, %v7446_v43  ;;  %v1503_v34 = vmax.f32 %v1417_v38, 0.0  ;;  %v1422_v14 = vpop.f32.mrb[87].mxu1  ;;  %v2206_v25 = vld [vmem:[#allocation9 + $0x588] sm:$0xff]  ;;  %v5381_v53 = vpack.c.bf16 %v2398_v51, %v2395_v28 }
 0x293   : > { %5368 = vmatprep.subr.bf16.mxu0 %v5367_v4  ;;  %v1802_v59 = vadd.f32 %v1801_v5, %v1800_v24  ;;  %v1421_v4 = vadd.f32 %v1420_v52, %v7443_v30  ;;  %v1423_v3 = vadd.f32 %v1422_v14, %v7446_v43  ;;  %v2399_v5 = vld [vmem:[#allocation9 + $0xb90] sm:$0xff] }
 0x294   : > { %5242 = vmatpush1.bf16.msra.mxu1 %v5241_v49  ;;  %v1815_v20 = vadd.f32 %v1814_v11, %v1813_v19  ;;  %v1504_v55 = vmax.f32 %v1419_v42, 0.0  ;;  %v2392_v49 = vld [vmem:[#allocation9 + $0xb58] sm:$0xff]  ;;  %v1843_v24 = vadd.f32 %v1842_v62, %v1503_v34  ;;  %v2210_v42 = vld [vmem:[#allocation9 + $0x5a8] sm:$0xff]  ;;  %v1961_v62 = vrot.slane %v1939_v21, %v7032_v6  ;;  %v2213_v34 = vld [vmem:[#allocation9 + $0x5c0] sm:$0xff] }
 0x295   : > { %5244 = vmatprep.subr.bf16.mxu1 %v5243_v58  ;;  %v1523_v16 = vmax.f32 %v1421_v4, 0.0  ;;  %v1524_v58 = vmax.f32 %v1423_v3, 0.0  ;;  %v5377_v11 = vpack.c.bf16 %v2392_v49, %v2389_v37  ;;  %v2402_v4 = vld [vmem:[#allocation9 + $0xba8] sm:$0xff]  ;;  %v5255_v3 = vpack.c.bf16 %v2213_v34, %v2210_v42  ;;  %v2209_v49 = vld [vmem:[#allocation9 + $0x5a0] sm:$0xff] }
 0x296   : > { %5370 = vmatpush1.bf16.msra.mxu0 %v5369_v48  ;;  %v1940_v38 = vcombine.low %v1802_v59, %v1815_v20  ;;  %v1856_v48 = vadd.f32 %v1855_v56, %v1504_v55  ;;  %v5379_v59 = vpack.c.bf16 %v2399_v5, %v2396_v2  ;;  %v5253_v20 = vpack.c.bf16 %v2206_v25, %v2203_v47  ;;  %v2408_v25 = vld [vmem:[#allocation9 + $0xbd8] sm:$0xff] }
 0x297   : > { %5372 = vmatprep.subr.bf16.mxu0 %v5371_v23  ;;  %v1844_v19 = vadd.f32 %v1843_v24, %v1523_v16  ;;  %v5251_v23 = vpack.c.bf16 %v2207_v50, %v2204_v60  ;;  %v2212_v60 = vld [vmem:[#allocation9 + $0x5b8] sm:$0xff]  ;;  %v2401_v50 = vld [vmem:[#allocation9 + $0xba0] sm:$0xff]  ;;  %v1977_v24 = vrot.slane %v1969_v9, %v7032_v6 }
 0x298   : > { %5246 = vmatpush1.bf16.msra.mxu1 %v5245_v54  ;;  %v1968_v56 = vrot.slane %v1940_v38, %v7032_v6  ;;  %v1857_v52 = vadd.f32 %v1856_v48, %v1524_v58  ;;  %v1426_v54 = vpop.f32.mrb[88].mxu1  ;;  %v2404_v38 = vld [vmem:[#allocation9 + $0xbb8] sm:$0xff]  ;;  %v2219_v58 = vld [vmem:[#allocation9 + $0x5f0] sm:$0xff]  ;;  %v5257_v18 = vpack.c.bf16 %v2212_v60, %v2209_v49  ;;  %v2034_v60 = vld [vmem:[#allocation9 + $0x28] sm:$0xff] }
 0x299   : > { %5248 = vmatprep.subr.bf16.mxu1 %v5247_v8  ;;  %v1427_v14 = vadd.f32 %v1426_v54, %v7443_v30  ;;  %v1428_v8 = vpop.f32.mrb[89].mxu1  ;;  %v2216_v48 = vld [vmem:[#allocation9 + $0x5d8] sm:$0xff]  ;;  %v5385_v9 = vpack.c.bf16 %v2404_v38, %v2401_v50  ;;  %v2407_v54 = vld [vmem:[#allocation9 + $0xbd0] sm:$0xff] }
 0x29a   : > { %5374 = vmatpush1.bf16.msra.mxu0 %v5373_v1  ;;  %v2405_v1 = vld [vmem:[#allocation9 + $0xbc0] sm:$0xff]  ;;  %v1970_v57 = vcombine.low %v1961_v62, %v1968_v56  ;;  %v1429_v40 = vadd.f32 %v1428_v8, %v7446_v43  ;;  %v1430_v37 = vpop.f32.mrb[90].mxu1  ;;  %v5259_v42 = vpack.c.bf16 %v2219_v58, %v2216_v48  ;;  %v2215_v62 = vld [vmem:[#allocation9 + $0x5d0] sm:$0xff]  ;;  %v2218_v56 = vld [vmem:[#allocation9 + $0x5e8] sm:$0xff] }
 0x29b   : > { %5376 = vmatprep.subr.bf16.mxu0 %v5375_v17  ;;  %v1543_v45 = vmax.f32 %v1427_v14, 0.0  ;;  %v1431_v21 = vadd.f32 %v1430_v37, %v7443_v30  ;;  %v1432_v55 = vpop.f32.mrb[91].mxu1  ;;  %v5383_v17 = vpack.c.bf16 %v2405_v1, %v2402_v4  ;;  %v2410_v4 = vld [vmem:[#allocation9 + $0xbe8] sm:$0xff]  ;;  %v2079_v1 = vld [vmem:[#allocation9 + $0x190] sm:$0xff]  ;;  %v2420_v58 = vld [vmem:[#allocation9 + $0xc38] sm:$0xff] }
 0x29c   : > { %5250 = vmatpush1.bf16.msra.mxu1 %v5249_v61  ;;  %v1984_v16 = vrot.slane %v1970_v57, %v7032_v6  ;;  %v1544_v2 = vmax.f32 %v1429_v40, 0.0  ;;  %v1433_v5 = vadd.f32 %v1432_v55, %v7446_v43  ;;  %v2082_v14 = vld [vmem:[#allocation9 + $0x1a8] sm:$0xff]  ;;  %v2417_v40 = vld [vmem:[#allocation9 + $0xc20] sm:$0xff]  ;;  %v2031_v49 = vld [vmem:[#allocation9 + $0x10] sm:$0xff] }
 0x29d   : > { %5252 = vmatprep.subr.bf16.mxu1 %v5251_v23  ;;  %v1845_v61 = vadd.f32 %v1844_v19, %v1543_v45  ;;  %v1563_v47 = vmax.f32 %v1431_v21, 0.0  ;;  %v1436_v34 = vpop.f32.mrb[92].mxu1  ;;  %v2414_v57 = vld [vmem:[#allocation9 + $0xc08] sm:$0xff] }
 0x29e   : > { %5378 = vmatpush1.bf16.msra.mxu0 %v5377_v11  ;;  %v2411_v11 = vld [vmem:[#allocation9 + $0xbf0] sm:$0xff]  ;;  %v7470_v23 = vcombine.low %v1977_v24, %v1984_v16  ;;  %v1858_v28 = vadd.f32 %v1857_v52, %v1544_v2  ;;  %v1564_v51 = vmax.f32 %v1433_v5, 0.0  ;;  %v1437_v52 = vadd.f32 %v1436_v34, %v7443_v30  ;;  %v1438_v8 = vpop.f32.mrb[93].mxu1  ;;  %v2413_v2 = vld [vmem:[#allocation9 + $0xc00] sm:$0xff]  ;;  %v2416_v5 = vld [vmem:[#allocation9 + $0xc18] sm:$0xff] }
 0x29f   : > { %5380 = vmatprep.subr.bf16.mxu0 %v5379_v59  ;;  %v1846_v10 = vadd.f32 %v1845_v61, %v1563_v47  ;;  %v5387_v19 = vpack.c.bf16 %v2411_v11, %v2408_v25  ;;  %v1439_v37 = vadd.f32 %v1438_v8, %v7446_v43  ;;  %v5391_v16 = vpack.c.bf16 %v2417_v40, %v2414_v57  ;;  %v2423_v61 = vld [vmem:[#allocation9 + $0xc50] sm:$0xff]  ;;  %v2426_v8 = vld [vmem:[#allocation9 + $0xc68] sm:$0xff]  ;;  %v2429_v57 = vld [vmem:[#allocation9 + $0xc80] sm:$0xff] }
 0x2a0   : > { %5254 = vmatpush1.bf16.msra.mxu1 %v5253_v20  ;;  %v1859_v59 = vadd.f32 %v1858_v28, %v1564_v51  ;;  %2017 = vst [vmem:[#allocation2 + $0x8] sm:$0xff] %v7470_v23  ;;  %v1440_v20 = vpop.f32.mrb[94].mxu1  ;;  %v1583_v45 = vmax.f32 %v1437_v52, 0.0  ;;  %v7479_v25 = vrot.slane %v7285_v63, %v7733_v7  ;;  %v5777_v11 = vpack.c.bf16 %v2034_v60, %v2031_v49  ;;  %v2085_v28 = vld [vmem:[#allocation9 + $0x1c0] sm:$0xff]  ;;  %v2088_v51 = vld [vmem:[#allocation9 + $0x1d8] sm:$0xff] }
 0x2a1   : > { %5256 = vmatprep.subr.bf16.mxu1 %v5255_v3  ;;  %v1441_v21 = vadd.f32 %v1440_v20, %v7443_v30  ;;  %v1442_v55 = vpop.f32.mrb[95].mxu1  ;;  %v5389_v3 = vpack.c.bf16 %v2410_v4, %v2407_v54  ;;  %v1584_v50 = vmax.f32 %v1439_v37, 0.0  ;;  %v7734_v54 = vld [vmem:[#allocation19_spill] sm:$0xff]  ;;  %v5395_v34 = vpack.c.bf16 %v2423_v61, %v2420_v58  ;;  %v2097_v60 = vld [vmem:[#allocation9 + $0x220] sm:$0xff] }
 0x2a2   : > { %5382 = vmatpush1.bf16.msra.mxu0 %v5381_v53  ;;  %v5261_v53 = vpack.c.bf16 %v2218_v56, %v2215_v62  ;;  %v1443_v24 = vadd.f32 %v1442_v55, %v7446_v43  ;;  %v1847_v38 = vadd.f32 %v1846_v10, %v1583_v45  ;;  %v5393_v43 = vpack.c.bf16 %v2416_v5, %v2413_v2  ;;  %v2040_v62 = vld [vmem:[#allocation9 + $0x58] sm:$0xff]  ;;  %v2091_v4 = vld [vmem:[#allocation9 + $0x1f0] sm:$0xff]  ;;  %v2425_v45 = vld [vmem:[#allocation9 + $0xc60] sm:$0xff] }
 0x2a3   : > { %5384 = vmatprep.subr.bf16.mxu0 %v5383_v17  ;;  %v5775_v17 = vpack.c.bf16 %v2082_v14, %v2079_v1  ;;  %v1603_v48 = vmax.f32 %v1441_v21, 0.0  ;;  %v1860_v47 = vadd.f32 %v1859_v59, %v1584_v50  ;;  %v7483_v10 = vrot.slane %v7470_v23, %v6961_v35  ;;  %v2094_v1 = vld [vmem:[#allocation9 + $0x208] sm:$0xff]  ;;  %v2043_v21 = vld [vmem:[#allocation9 + $0x70] sm:$0xff]  ;;  %v2428_v49 = vld [vmem:[#allocation9 + $0xc78] sm:$0xff] }
 0x2a4   : > { %5258 = vmatpush1.bf16.msra.mxu1 %v5257_v18  ;;  %v1604_v30 = vmax.f32 %v1443_v24, 0.0  ;;  %v7487_v59 = vrot.slane %v7285_v63, %v7734_v54  ;;  %v5779_v52 = vpack.c.bf16 %v2088_v51, %v2085_v28  ;;  %v2046_v55 = vld [vmem:[#allocation9 + $0x88] sm:$0xff]  ;;  %v2100_v50 = vld [vmem:[#allocation9 + $0x238] sm:$0xff]  ;;  %v2435_v2 = vld [vmem:[#allocation9 + $0xcb0] sm:$0xff]  ;;  %v5401_v58 = vpack.c.bf16 %v2428_v49, %v2425_v45 }
 0x2a5   : > { %5260 = vmatprep.subr.bf16.mxu1 %v5259_v42  ;;  %v1848_v18 = vadd.f32 %v1847_v38, %v1603_v48  ;;  %v2037_v42 = vld [vmem:[#allocation9 + $0x40] sm:$0xff]  ;;  %v5785_v38 = vpack.c.bf16 %v2046_v55, %v2043_v21  ;;  %v5787_v61 = vpack.c.bf16 %v2100_v50, %v2097_v60  ;;  %v2434_v51 = vld [vmem:[#allocation9 + $0xca8] sm:$0xff]  ;;  %v2447_v45 = vld [vmem:[#allocation9 + $0xd10] sm:$0xff] }
 0x2a6   : > { %5386 = vmatpush1.bf16.msra.mxu0 %v5385_v9  ;;  %v2419_v9 = vld [vmem:[#allocation9 + $0xc30] sm:$0xff]  ;;  %v1861_v56 = vadd.f32 %v1860_v47, %v1604_v30  ;;  %v5781_v37 = vpack.c.bf16 %v2040_v62, %v2037_v42  ;;  %v2049_v30 = vld [vmem:[#allocation9 + $0xa0] sm:$0xff]  ;;  %v2438_v42 = vld [vmem:[#allocation9 + $0xcc8] sm:$0xff] }
 0x2a7   : > { %5388 = vmatprep.subr.bf16.mxu0 %v5387_v19  ;;  %v2422_v19 = vld [vmem:[#allocation9 + $0xc48] sm:$0xff]  ;;  %v1849_v14 = vrot.slane %v1848_v18, 4  ;;  %v2431_v47 = vld [vmem:[#allocation9 + $0xc90] sm:$0xff]  ;;  %v2441_v62 = vld [vmem:[#allocation9 + $0xce0] sm:$0xff] }
 0x2a8   : > { %5262 = vmatpush1.bf16.msra.mxu1 %v5261_v53  ;;  %v1862_v40 = vrot.slane %v1861_v56, 4  ;;  %v5397_v63 = vpack.c.bf16 %v2422_v19, %v2419_v9  ;;  %v5783_v53 = vpack.c.bf16 %v2094_v1, %v2091_v4  ;;  %v5405_v4 = vpack.c.bf16 %v2434_v51, %v2431_v47  ;;  %v2443_v49 = vld [vmem:[#allocation9 + $0xcf0] sm:$0xff]  ;;  %v2061_v60 = vld [vmem:[#allocation9 + $0x100] sm:$0xff]  ;;  %v2064_v50 = vld [vmem:[#allocation9 + $0x118] sm:$0xff] }
 0x2a9   : > { %5776 = vmatprep.subr.bf16.mxu1 %v5775_v17  ;;  %v1850_v20 = vadd.f32 %v1849_v14, %v1848_v18  ;;  %v5399_v17 = vpack.c.bf16 %v2429_v57, %v2426_v8  ;;  %v2103_v18 = vld [vmem:[#allocation9 + $0x250] sm:$0xff]  ;;  %v2437_v14 = vld [vmem:[#allocation9 + $0xcc0] sm:$0xff]  ;;  %v2058_v8 = vld [vmem:[#allocation9 + $0xe8] sm:$0xff] }
 0x2aa   : > { %5390 = vmatpush1.bf16.msra.mxu0 %v5389_v3  ;;  %v1863_v3 = vadd.f32 %v1862_v40, %v1861_v56  ;;  %v5407_v40 = vpack.c.bf16 %v2441_v62, %v2438_v42  ;;  %v2124_v42 = vld [vmem:[#allocation9 + $0x2f8] sm:$0xff] }
 0x2ab   : > { %5392 = vmatprep.subr.bf16.mxu0 %v5391_v16  ;;  %3245 = vmatmul.mubr.f32.vlgmr.msra.gmra.mrb[96].mxu1 %v7479_v25  ;;  %v1851_v24 = vrot.slane %v1850_v20, 2  ;;  %v2432_v16 = vld [vmem:[#allocation9 + $0xc98] sm:$0xff] }
 0x2ac   : > { %5778 = vmatpush3.bf16.msra.mxu1 %v5777_v11  ;;  %3883 = vmatprep.mubr.f32.mxu1 %v7298_v22  ;;  %v1864_v5 = vrot.slane %v1863_v3, 2  ;;  %v2052_v22 = vld [vmem:[#allocation9 + $0xb8] sm:$0xff]  ;;  %v5403_v28 = vpack.c.bf16 %v2435_v2, %v2432_v16 }
 0x2ad   : > { %3387 = vmatmul.mubr.f32.vlgmr.msra.gmra.mrb[64].mxu0 %v7487_v59  ;;  %5780 = vmatprep.subr.bf16.mxu1 %v5779_v52  ;;  %v1852_v48 = vadd.f32 %v1851_v24, %v1850_v20  ;;  %v2055_v52 = vld [vmem:[#allocation9 + $0xd0] sm:$0xff]  ;;  %v2109_v20 = vld [vmem:[#allocation9 + $0x280] sm:$0xff]  ;;  %v1994_v24 = vrot.slane %v1986_v26, %v7032_v6  ;;  %v2456_v62 = vld [vmem:[#allocation9 + $0xd58] sm:$0xff] }
 0x2ae   : > { %5394 = vmatpush1.bf16.msra.mxu0 %v5393_v43  ;;  %3457 = vmatprep.mubr.f32.mxu0 %v7483_v10  ;;  %v1865_v11 = vadd.f32 %v1864_v5, %v1863_v3  ;;  %v2106_v43 = vld [vmem:[#allocation9 + $0x268] sm:$0xff]  ;;  %v5793_v55 = vpack.c.bf16 %v2058_v8, %v2055_v52  ;;  %v2073_v52 = vld [vmem:[#allocation9 + $0x160] sm:$0xff]  ;;  %v2076_v8 = vld [vmem:[#allocation9 + $0x178] sm:$0xff] }
 0x2af   : > { %5396 = vmatprep.subr.bf16.mxu0 %v5395_v34  ;;  %v1853_v9 = vrot.slane %v1852_v48, 1  ;;  %v5789_v34 = vpack.c.bf16 %v2052_v22, %v2049_v30  ;;  %v5791_v1 = vpack.c.bf16 %v2106_v43, %v2103_v18  ;;  %v2446_v5 = vld [vmem:[#allocation9 + $0xd08] sm:$0xff]  ;;  %v5797_v30 = vpack.c.bf16 %v2064_v50, %v2061_v60  ;;  %v2449_v22 = vld [vmem:[#allocation9 + $0xd20] sm:$0xff]  ;;  %v2452_v43 = vld [vmem:[#allocation9 + $0xd38] sm:$0xff] }
 0x2b0   : > { %5782 = vmatpush3.bf16.msra.mxu1 %v5781_v37  ;;  %v1866_v56 = vrot.slane %v1865_v11, 1  ;;  %v2440_v37 = vld [vmem:[#allocation9 + $0xcd8] sm:$0xff]  ;;  %v2181_v50 = vld [vmem:[#allocation9 + $0x4c0] sm:$0xff] }
 0x2b1   : > { %5784 = vmatprep.subr.bf16.mxu1 %v5783_v53  ;;  %v1854_v19 = vadd.f32 %v1853_v9, %v1852_v48  ;;  %v2444_v53 = vld [vmem:[#allocation9 + $0xcf8] sm:$0xff]  ;;  %v5409_v3 = vpack.c.bf16 %v2440_v37, %v2437_v14  ;;  %v2118_v48 = vld [vmem:[#allocation9 + $0x2c8] sm:$0xff]  ;;  %v2121_v9 = vld [vmem:[#allocation9 + $0x2e0] sm:$0xff] }
 0x2b2   : > { %5398 = vmatpush1.bf16.msra.mxu0 %v5397_v63  ;;  %v1867_v57 = vadd.f32 %v1866_v56, %v1865_v11  ;;  %v2112_v63 = vld [vmem:[#allocation9 + $0x298] sm:$0xff]  ;;  %v5411_v2 = vpack.c.bf16 %v2447_v45, %v2444_v53  ;;  %v1607_v11 = vld [vmem:[#allocation2 + $0x10] sm:$0xf]  ;;  %v2459_v56 = vld [vmem:[#allocation9 + $0xd70] sm:$0xff]  ;;  %v5805_v45 = vpack.c.bf16 %v2076_v8, %v2073_v52 }
 0x2b3   : > { %5400 = vmatprep.subr.bf16.mxu0 %v5399_v17  ;;  %v5795_v17 = vpack.c.bf16 %v2112_v63, %v2109_v20  ;;  %v2455_v14 = vld [vmem:[#allocation9 + $0xd50] sm:$0xff]  ;;  %v2178_v20 = vld [vmem:[#allocation9 + $0x4a8] sm:$0xff]  ;;  %v2465_v53 = vld [vmem:[#allocation9 + $0xda0] sm:$0xff] }
 0x2b4   : > { %5786 = vmatpush3.bf16.msra.mxu1 %v5785_v38  ;;  %v1987_v21 = vcombine.low %v1854_v19, %v1867_v57  ;;  %v2115_v38 = vld [vmem:[#allocation9 + $0x2b0] sm:$0xff]  ;;  %v5801_v19 = vpack.c.bf16 %v2070_v46, %v2067_v33  ;;  %v5419_v57 = vpack.c.bf16 %v2459_v56, %v2456_v62  ;;  %v2462_v63 = vld [vmem:[#allocation9 + $0xd88] sm:$0xff]  ;;  %v2477_v33 = vld [vmem:[#allocation9 + $0xe00] sm:$0xff] }
 0x2b5   : > { %5788 = vmatprep.subr.bf16.mxu1 %v5787_v61  ;;  %v2453_v61 = vld [vmem:[#allocation9 + $0xd40] sm:$0xff]  ;;  %v5799_v51 = vpack.c.bf16 %v2118_v48, %v2115_v38  ;;  %v2175_v37 = vld [vmem:[#allocation9 + $0x490] sm:$0xff]  ;;  %v5423_v60 = vpack.c.bf16 %v2465_v53, %v2462_v63  ;;  %v2476_v56 = vld [vmem:[#allocation9 + $0xdf8] sm:$0xff] }
 0x2b6   : > { %5402 = vmatpush1.bf16.msra.mxu0 %v5401_v58  ;;  %v2001_v16 = vrot.slane %v1987_v21, %v7032_v6  ;;  %v2450_v58 = vld [vmem:[#allocation9 + $0xd28] sm:$0xff]  ;;  %v2479_v52 = vld [vmem:[#allocation9 + $0xe10] sm:$0xff]  ;;  %v2145_v8 = vld [vmem:[#allocation9 + $0x3a0] sm:$0xff] }
 0x2b7   : > { %5404 = vmatprep.subr.bf16.mxu0 %v5403_v28  ;;  %v5413_v28 = vpack.c.bf16 %v2446_v5, %v2443_v49  ;;  %v5415_v18 = vpack.c.bf16 %v2453_v61, %v2450_v58  ;;  %v2130_v49 = vld [vmem:[#allocation9 + $0x328] sm:$0xff]  ;;  %v2467_v58 = vld [vmem:[#allocation9 + $0xdb0] sm:$0xff]  ;;  %v2133_v61 = vld [vmem:[#allocation9 + $0x340] sm:$0xff] }
 0x2b8   : > { %5790 = vmatpush3.bf16.msra.mxu1 %v5789_v34  ;;  %v2002_v47 = vcombine.low %v1994_v24, %v2001_v16  ;;  %v2184_v24 = vld [vmem:[#allocation9 + $0x4d8] sm:$0xff]  ;;  %v2202_v63 = vld [vmem:[#allocation9 + $0x568] sm:$0xff] }
 0x2b9   : > { %5792 = vmatprep.subr.bf16.mxu1 %v5791_v1  ;;  %v5803_v1 = vpack.c.bf16 %v2124_v42, %v2121_v9  ;;  %v2468_v16 = vld [vmem:[#allocation9 + $0xdb8] sm:$0xff]  ;;  %v5811_v48 = vpack.c.bf16 %v2184_v24, %v2181_v50  ;;  %v2139_v9 = vld [vmem:[#allocation9 + $0x370] sm:$0xff]  ;;  %v2142_v42 = vld [vmem:[#allocation9 + $0x388] sm:$0xff] }
 0x2ba   : > { %5406 = vmatpush1.bf16.msra.mxu0 %v5405_v4  ;;  %v2009_v26 = vrot.slane %v2002_v47, %v7032_v6  ;;  %v5417_v4 = vpack.c.bf16 %v2452_v43, %v2449_v22  ;;  %v2136_v47 = vld [vmem:[#allocation9 + $0x358] sm:$0xff]  ;;  %v2470_v22 = vld [vmem:[#allocation9 + $0xdc8] sm:$0xff]  ;;  %v2473_v43 = vld [vmem:[#allocation9 + $0xde0] sm:$0xff] }
 0x2bb   : > { %5408 = vmatprep.subr.bf16.mxu0 %v5407_v40  ;;  %v2458_v40 = vld [vmem:[#allocation9 + $0xd68] sm:$0xff]  ;;  %v5813_v46 = vpack.c.bf16 %v2136_v47, %v2133_v61  ;;  %v2488_v50 = vld [vmem:[#allocation9 + $0xe58] sm:$0xff]  ;;  %v2205_v24 = vld [vmem:[#allocation9 + $0x580] sm:$0xff] }
 0x2bc   : > { %5794 = vmatpush3.bf16.msra.mxu1 %v5793_v55  ;;  %v2015_v34 = vadd.f32 %v2009_v26, %v1607_v11  ;;  %v5421_v21 = vpack.c.bf16 %v2458_v40, %v2455_v14  ;;  %v5807_v55 = vpack.c.bf16 %v2178_v20, %v2175_v37  ;;  %v2187_v11 = vld [vmem:[#allocation9 + $0x4f0] sm:$0xff]  ;;  %v5429_v26 = vpack.c.bf16 %v2470_v22, %v2467_v58  ;;  %v2482_v37 = vld [vmem:[#allocation9 + $0xe28] sm:$0xff]  ;;  %v2157_v47 = vld [vmem:[#allocation9 + $0x400] sm:$0xff] }
 0x2bd   : > { %5796 = vmatprep.subr.bf16.mxu1 %v5795_v17  ;;  %v2127_v17 = vld [vmem:[#allocation9 + $0x310] sm:$0xff]  ;;  %v2486_v53 = vld [vmem:[#allocation9 + $0xe48] sm:$0xff] }
 0x2be   : > { %5410 = vmatpush1.bf16.msra.mxu0 %v5409_v3  ;;  %2022 = vst.msk [vmem:[#allocation2 + $0x10] sm:$0xf] %vm7333_vm1, %v2015_v34  ;;  %v2461_v3 = vld [vmem:[#allocation9 + $0xd80] sm:$0xff]  ;;  %v5809_v5 = vpack.c.bf16 %v2130_v49, %v2127_v17  ;;  %v2199_v20 = vld [vmem:[#allocation9 + $0x550] sm:$0xff] }
 0x2bf   : > { %5412 = vmatprep.subr.bf16.mxu0 %v5411_v2  ;;  %v2471_v2 = vld [vmem:[#allocation9 + $0xdd0] sm:$0xff]  ;;  %v5425_v38 = vpack.c.bf16 %v2464_v12, %v2461_v3  ;;  %v2193_v34 = vld [vmem:[#allocation9 + $0x520] sm:$0xff]  ;;  %v5823_v3 = vpack.c.bf16 %v2202_v63, %v2199_v20  ;;  %v2506_v20 = vld [vmem:[#allocation9 + $0xee8] sm:$0xff] }
 0x2c0   : > { %5798 = vmatpush3.bf16.msra.mxu1 %v5797_v30  ;;  %v5427_v30 = vpack.c.bf16 %v2471_v2, %v2468_v16  ;;  %v2485_v17 = vld [vmem:[#allocation9 + $0xe40] sm:$0xff]  ;;  %v2151_v49 = vld [vmem:[#allocation9 + $0x3d0] sm:$0xff]  ;;  %v2208_v16 = vld [vmem:[#allocation9 + $0x598] sm:$0xff] }
 0x2c1   : > { %5800 = vmatprep.subr.bf16.mxu1 %v5799_v51  ;;  %v2474_v51 = vld [vmem:[#allocation9 + $0xde8] sm:$0xff]  ;;  %v2492_v2 = vld [vmem:[#allocation9 + $0xe78] sm:$0xff]  ;;  %v5827_v58 = vpack.c.bf16 %v2208_v16, %v2205_v24  ;;  %v2491_v61 = vld [vmem:[#allocation9 + $0xe70] sm:$0xff] }
 0x2c2   : > { %5414 = vmatpush1.bf16.msra.mxu0 %v5413_v28  ;;  %v2190_v28 = vld [vmem:[#allocation9 + $0x508] sm:$0xff]  ;;  %v5431_v62 = vpack.c.bf16 %v2477_v33, %v2474_v51  ;;  %v2271_v63 = vld [vmem:[#allocation9 + $0x790] sm:$0xff]  ;;  %v2512_v24 = vld [vmem:[#allocation9 + $0xf18] sm:$0xff] }
 0x2c3   : > { %5416 = vmatprep.subr.bf16.mxu0 %v5415_v18  ;;  %v5815_v18 = vpack.c.bf16 %v2190_v28, %v2187_v11  ;;  %v2494_v11 = vld [vmem:[#allocation9 + $0xe88] sm:$0xff]  ;;  %v2211_v28 = vld [vmem:[#allocation9 + $0x5b0] sm:$0xff]  ;;  %v2516_v16 = vld [vmem:[#allocation9 + $0xf38] sm:$0xff] }
 0x2c4   : > { %5802 = vmatpush3.bf16.msra.mxu1 %v5801_v19  ;;  %v2196_v19 = vld [vmem:[#allocation9 + $0x538] sm:$0xff]  ;;  %v2214_v51 = vld [vmem:[#allocation9 + $0x5c8] sm:$0xff] }
 0x2c5   : > { %5804 = vmatprep.subr.bf16.mxu1 %v5803_v1  ;;  %v5817_v1 = vpack.c.bf16 %v2142_v42, %v2139_v9  ;;  %v5819_v14 = vpack.c.bf16 %v2196_v19, %v2193_v34  ;;  %v2498_v33 = vld [vmem:[#allocation9 + $0xea8] sm:$0xff]  ;;  %v2497_v9 = vld [vmem:[#allocation9 + $0xea0] sm:$0xff]  ;;  %v2163_v42 = vld [vmem:[#allocation9 + $0x430] sm:$0xff] }
 0x2c6   : > { %5418 = vmatpush1.bf16.msra.mxu0 %v5417_v4  ;;  %v2480_v4 = vld [vmem:[#allocation9 + $0xe18] sm:$0xff]  ;;  %v2217_v19 = vld [vmem:[#allocation9 + $0x5e0] sm:$0xff] }
 0x2c7   : > { %5420 = vmatprep.subr.bf16.mxu0 %v5419_v57  ;;  %v2148_v57 = vld [vmem:[#allocation9 + $0x3b8] sm:$0xff] }
 0x2c8   : > { %5806 = vmatpush3.bf16.msra.mxu1 %v5805_v45  ;;  %v2489_v45 = vld [vmem:[#allocation9 + $0xe60] sm:$0xff]  ;;  %v2500_v34 = vld [vmem:[#allocation9 + $0xeb8] sm:$0xff] }
 0x2c9   : > { %5808 = vmatprep.subr.bf16.mxu1 %v5807_v55  ;;  %v5437_v55 = vpack.c.bf16 %v2482_v37, %v2479_v52  ;;  %v5439_v12 = vpack.c.bf16 %v2489_v45, %v2486_v53  ;;  %v2274_v53 = vld [vmem:[#allocation9 + $0x7a8] sm:$0xff] }
 0x2ca   : > { %5422 = vmatpush1.bf16.msra.mxu0 %v5421_v21  ;;  %v5821_v21 = vpack.c.bf16 %v2148_v57, %v2145_v8  ;;  %v2503_v8 = vld [vmem:[#allocation9 + $0xed0] sm:$0xff]  ;;  %v2169_v57 = vld [vmem:[#allocation9 + $0x460] sm:$0xff]  ;;  %v2510_v45 = vld [vmem:[#allocation9 + $0xf08] sm:$0xff] }
 0x2cb   : > { %5424 = vmatprep.subr.bf16.mxu0 %v5423_v60  ;;  %3884 = vmatmul.mubr.f32.vlgmr.msra.gmra.mrb[98].mxu1 %v7311_v15  ;;  %v2483_v15 = vld [vmem:[#allocation9 + $0xe30] sm:$0xff]  ;;  %v2154_v60 = vld [vmem:[#allocation9 + $0x3e8] sm:$0xff] }
 0x2cc   : > { %5810 = vmatpush3.bf16.msra.mxu1 %v5809_v5  ;;  %3953 = vmatprep.mubr.f32.mxu1 %v7319_v27  ;;  %v5433_v27 = vpack.c.bf16 %v2476_v56, %v2473_v43  ;;  %v5435_v40 = vpack.c.bf16 %v2483_v15, %v2480_v4  ;;  %v2495_v5 = vld [vmem:[#allocation9 + $0xe90] sm:$0xff]  ;;  %v5831_v43 = vpack.c.bf16 %v2214_v51, %v2211_v28  ;;  %v2220_v4 = vld [vmem:[#allocation9 + $0x5f8] sm:$0xff]  ;;  %v2518_v28 = vld [vmem:[#allocation9 + $0xf48] sm:$0xff] }
 0x2cd   : > { %5812 = vmatprep.subr.bf16.mxu1 %v5811_v48  ;;  %v5441_v48 = vpack.c.bf16 %v2488_v50, %v2485_v17  ;;  %v5443_v22 = vpack.c.bf16 %v2495_v5, %v2492_v2  ;;  %v2504_v15 = vld [vmem:[#allocation9 + $0xed8] sm:$0xff]  ;;  %v5835_v52 = vpack.c.bf16 %v2220_v4, %v2217_v19  ;;  %v5839_v17 = vpack.c.bf16 %v2274_v53, %v2271_v63  ;;  %v2509_v50 = vld [vmem:[#allocation9 + $0xf00] sm:$0xff]  ;;  %v2519_v2 = vld [vmem:[#allocation9 + $0xf50] sm:$0xff] }
 0x2ce   : > { %5426 = vmatpush1.bf16.msra.mxu0 %v5425_v38  ;;  %v5825_v38 = vpack.c.bf16 %v2154_v60, %v2151_v49  ;;  %v2223_v49 = vld [vmem:[#allocation9 + $0x610] sm:$0xff]  ;;  %v2226_v60 = vld [vmem:[#allocation9 + $0x628] sm:$0xff]  ;;  %v2289_v4 = vld [vmem:[#allocation9 + $0x820] sm:$0xff] }
 0x2cf   : > { %5428 = vmatprep.subr.bf16.mxu0 %v5427_v30  ;;  %v2160_v30 = vld [vmem:[#allocation9 + $0x418] sm:$0xff]  ;;  %v5841_v5 = vpack.c.bf16 %v2226_v60, %v2223_v49  ;;  %v2283_v51 = vld [vmem:[#allocation9 + $0x7f0] sm:$0xff]  ;;  %v2238_v19 = vld [vmem:[#allocation9 + $0x688] sm:$0xff] }
 0x2d0   : > { %5814 = vmatpush3.bf16.msra.mxu1 %v5813_v46  ;;  %v2501_v46 = vld [vmem:[#allocation9 + $0xec0] sm:$0xff]  ;;  %v2295_v63 = vld [vmem:[#allocation9 + $0x850] sm:$0xff]  ;;  %v2298_v53 = vld [vmem:[#allocation9 + $0x868] sm:$0xff] }
 0x2d1   : > { %5816 = vmatprep.subr.bf16.mxu1 %v5815_v18  ;;  %v5445_v18 = vpack.c.bf16 %v2494_v11, %v2491_v61  ;;  %v5447_v56 = vpack.c.bf16 %v2501_v46, %v2498_v33  ;;  %v2515_v61 = vld [vmem:[#allocation9 + $0xf30] sm:$0xff]  ;;  %v5459_v11 = vpack.c.bf16 %v2519_v2, %v2516_v16  ;;  %v2286_v33 = vld [vmem:[#allocation9 + $0x808] sm:$0xff]  ;;  %v7510_v46 = vrot.slane %v7470_v23, %v7009_v29  ;;  %v2533_v49 = vld [vmem:[#allocation9 + $0xfc0] sm:$0xff] }
 0x2d2   : > { %5430 = vmatpush1.bf16.msra.mxu0 %v5429_v26  ;;  %v5829_v26 = vpack.c.bf16 %v2160_v30, %v2157_v47  ;;  %v2229_v47 = vld [vmem:[#allocation9 + $0x640] sm:$0xff]  ;;  %v2232_v30 = vld [vmem:[#allocation9 + $0x658] sm:$0xff]  ;;  %v2247_v60 = vld [vmem:[#allocation9 + $0x6d0] sm:$0xff] }
 0x2d3   : > { %5432 = vmatprep.subr.bf16.mxu0 %v5431_v62  ;;  %v2166_v62 = vld [vmem:[#allocation9 + $0x448] sm:$0xff]  ;;  %v2301_v16 = vld [vmem:[#allocation9 + $0x880] sm:$0xff]  ;;  %v2304_v2 = vld [vmem:[#allocation9 + $0x898] sm:$0xff] }
 0x2d4   : > { %5818 = vmatpush3.bf16.msra.mxu1 %v5817_v1  ;;  %v2507_v1 = vld [vmem:[#allocation9 + $0xef0] sm:$0xff] }
 0x2d5   : > { %5820 = vmatprep.subr.bf16.mxu1 %v5819_v14  ;;  %v5449_v14 = vpack.c.bf16 %v2500_v34, %v2497_v9  ;;  %v5451_v37 = vpack.c.bf16 %v2507_v1, %v2504_v15  ;;  %v5845_v9 = vpack.c.bf16 %v2232_v30, %v2229_v47  ;;  %v2235_v34 = vld [vmem:[#allocation9 + $0x670] sm:$0xff]  ;;  %v2292_v15 = vld [vmem:[#allocation9 + $0x838] sm:$0xff]  ;;  %v2253_v30 = vld [vmem:[#allocation9 + $0x700] sm:$0xff] }
 0x2d6   : > { %5434 = vmatpush1.bf16.msra.mxu0 %v5433_v27  ;;  %v5833_v27 = vpack.c.bf16 %v2166_v62, %v2163_v42  ;;  %v5461_v42 = vpack.c.bf16 %v2518_v28, %v2515_v61  ;;  %v5847_v62 = vpack.c.bf16 %v2286_v33, %v2283_v51  ;;  %v2528_v1 = vld [vmem:[#allocation9 + $0xf98] sm:$0xff]  ;;  %v5859_v61 = vpack.c.bf16 %v2304_v2, %v2301_v16  ;;  %v2539_v47 = vld [vmem:[#allocation9 + $0xff0] sm:$0xff]  ;;  %v2542_v51 = vld [vmem:[#allocation9 + $0x1008] sm:$0xff] }
 0x2d7   : > { %5436 = vmatprep.subr.bf16.mxu0 %v5435_v40  ;;  %v2172_v40 = vld [vmem:[#allocation9 + $0x478] sm:$0xff]  ;;  %v2307_v33 = vld [vmem:[#allocation9 + $0x8b0] sm:$0xff]  ;;  %v2373_v16 = vld [vmem:[#allocation9 + $0xac0] sm:$0xff] }
 0x2d8   : > { %5822 = vmatpush3.bf16.msra.mxu1 %v5821_v21  ;;  %v2513_v21 = vld [vmem:[#allocation9 + $0xf20] sm:$0xff]  ;;  %v2376_v2 = vld [vmem:[#allocation9 + $0xad8] sm:$0xff] }
 0x2d9   : > { %5824 = vmatprep.subr.bf16.mxu1 %v5823_v3  ;;  %v5453_v3 = vpack.c.bf16 %v2506_v20, %v2503_v8  ;;  %v5851_v8 = vpack.c.bf16 %v2292_v15, %v2289_v4  ;;  %v2313_v4 = vld [vmem:[#allocation9 + $0x8e0] sm:$0xff]  ;;  %v2316_v15 = vld [vmem:[#allocation9 + $0x8f8] sm:$0xff] }
 0x2da   : > { %5438 = vmatpush1.bf16.msra.mxu0 %v5437_v55  ;;  %v5837_v55 = vpack.c.bf16 %v2172_v40, %v2169_v57  ;;  %v2527_v57 = vld [vmem:[#allocation9 + $0xf90] sm:$0xff]  ;;  %v2241_v40 = vld [vmem:[#allocation9 + $0x6a0] sm:$0xff] }
 0x2db   : > { %5440 = vmatprep.subr.bf16.mxu0 %v5439_v12  ;;  %v5455_v12 = vpack.c.bf16 %v2513_v21, %v2510_v45  ;;  %v2534_v45 = vld [vmem:[#allocation9 + $0xfc8] sm:$0xff]  ;;  %v2537_v21 = vld [vmem:[#allocation9 + $0xfe0] sm:$0xff] }
 0x2dc   : > { %5826 = vmatpush3.bf16.msra.mxu1 %v5825_v38  ;;  %v2277_v38 = vld [vmem:[#allocation9 + $0x7c0] sm:$0xff] }
 0x2dd   : > { %5828 = vmatprep.subr.bf16.mxu1 %v5827_v58  ;;  %v5457_v58 = vpack.c.bf16 %v2512_v24, %v2509_v50  ;;  %v5471_v50 = vpack.c.bf16 %v2537_v21, %v2534_v45  ;;  %v2536_v24 = vld [vmem:[#allocation9 + $0xfd8] sm:$0xff]  ;;  %v2558_v45 = vld [vmem:[#allocation9 + $0x1088] sm:$0xff]  ;;  %v2561_v21 = vld [vmem:[#allocation9 + $0x10a0] sm:$0xff] }
 0x2de   : > { %5442 = vmatpush1.bf16.msra.mxu0 %v5441_v48  ;;  %v2280_v48 = vld [vmem:[#allocation9 + $0x7d8] sm:$0xff] }
 0x2df   : > { %5444 = vmatprep.subr.bf16.mxu0 %v5443_v22  ;;  %v7505_v22 = vrot.slane %v7470_v23, %v6953_v31 }
 0x2e0   : > { %5830 = vmatpush3.bf16.msra.mxu1 %v5829_v26  ;;  %v5843_v26 = vpack.c.bf16 %v2280_v48, %v2277_v38  ;;  %v2543_v38 = vld [vmem:[#allocation9 + $0x1010] sm:$0xff] }
 0x2e1   : > { %5832 = vmatprep.subr.bf16.mxu1 %v5831_v43  ;;  %v2525_v43 = vld [vmem:[#allocation9 + $0xf80] sm:$0xff] }
 0x2e2   : > { %5446 = vmatpush1.bf16.msra.mxu0 %v5445_v18  ;;  %v2522_v18 = vld [vmem:[#allocation9 + $0xf68] sm:$0xff] }
 0x2e3   : > { %5448 = vmatprep.subr.bf16.mxu0 %v5447_v56  ;;  %v2521_v56 = vld [vmem:[#allocation9 + $0xf60] sm:$0xff]  ;;  %v5463_v23 = vpack.c.bf16 %v2525_v43, %v2522_v18  ;;  %v2546_v18 = vld [vmem:[#allocation9 + $0x1028] sm:$0xff] }
 0x2e4   : > { %5834 = vmatpush3.bf16.msra.mxu1 %v5833_v27  ;;  %v2531_v27 = vld [vmem:[#allocation9 + $0xfb0] sm:$0xff]  ;;  %v2549_v43 = vld [vmem:[#allocation9 + $0x1040] sm:$0xff] }
 0x2e5   : > { %5836 = vmatprep.subr.bf16.mxu1 %v5835_v52  ;;  %v5467_v20 = vpack.c.bf16 %v2531_v27, %v2528_v1  ;;  %v2552_v1 = vld [vmem:[#allocation9 + $0x1058] sm:$0xff]  ;;  %v2555_v27 = vld [vmem:[#allocation9 + $0x1070] sm:$0xff] }
 0x2e6   : > { %5450 = vmatpush1.bf16.msra.mxu0 %v5449_v14  ;;  %v5849_v14 = vpack.c.bf16 %v2238_v19, %v2235_v34  ;;  %v2259_v34 = vld [vmem:[#allocation9 + $0x730] sm:$0xff]  ;;  %v2262_v19 = vld [vmem:[#allocation9 + $0x748] sm:$0xff] }
 0x2e7   : > { %5452 = vmatprep.subr.bf16.mxu0 %v5451_v37  ;;  %v2244_v37 = vld [vmem:[#allocation9 + $0x6b8] sm:$0xff] }
 0x2e8   : > { %5838 = vmatpush3.bf16.msra.mxu1 %v5837_v55  ;;  %v5853_v55 = vpack.c.bf16 %v2244_v37, %v2241_v40  ;;  %v2265_v40 = vld [vmem:[#allocation9 + $0x760] sm:$0xff]  ;;  %v2268_v37 = vld [vmem:[#allocation9 + $0x778] sm:$0xff] }
 0x2e9   : > { %5840 = vmatprep.subr.bf16.mxu1 %v5839_v17  ;;  %v5855_v17 = vpack.c.bf16 %v2298_v53, %v2295_v63  ;;  %v2367_v63 = vld [vmem:[#allocation9 + $0xa90] sm:$0xff]  ;;  %v2370_v53 = vld [vmem:[#allocation9 + $0xaa8] sm:$0xff] }
 0x2ea   : > { %5454 = vmatpush1.bf16.msra.mxu0 %v5453_v3 }
 0x2eb   : > { %5456 = vmatprep.subr.bf16.mxu0 %v5455_v12  ;;  %3954 = vmatmul.mubr.f32.vlgmr.msra.gmra.mrb[100].mxu1 %v7479_v25  ;;  %v2524_v25 = vld [vmem:[#allocation9 + $0xf78] sm:$0xff]  ;;  %v2250_v12 = vld [vmem:[#allocation9 + $0x6e8] sm:$0xff] }
 0x2ec   : > { %5842 = vmatpush3.bf16.msra.mxu1 %v5841_v5  ;;  %4023 = vmatprep.mubr.f32.mxu1 %v7307_v41  ;;  %v5465_v52 = vpack.c.bf16 %v2524_v25, %v2521_v56  ;;  %v2530_v41 = vld [vmem:[#allocation9 + $0xfa8] sm:$0xff]  ;;  %v2540_v5 = vld [vmem:[#allocation9 + $0xff8] sm:$0xff]  ;;  %v5857_v48 = vpack.c.bf16 %v2250_v12, %v2247_v60  ;;  %v2545_v56 = vld [vmem:[#allocation9 + $0x1020] sm:$0xff] }
 0x2ed   : > { %3458 = vmatmul.mubr.f32.vlgmr.msra.gmra.mrb[64].mxu0 %v7505_v22  ;;  %5844 = vmatprep.subr.bf16.mxu1 %v5843_v26  ;;  %v5469_v3 = vpack.c.bf16 %v2530_v41, %v2527_v57  ;;  %v5475_v28 = vpack.c.bf16 %v2543_v38, %v2540_v5  ;;  %v2310_v26 = vld [vmem:[#allocation9 + $0x8c8] sm:$0xff]  ;;  %v2548_v25 = vld [vmem:[#allocation9 + $0x1038] sm:$0xff]  ;;  %v2551_v57 = vld [vmem:[#allocation9 + $0x1050] sm:$0xff] }
 0x2ee   : > { %5458 = vmatpush1.bf16.msra.mxu0 %v5457_v58  ;;  %3528 = vmatprep.mubr.f32.mxu0 %v7510_v46  ;;  %v5473_v58 = vpack.c.bf16 %v2536_v24, %v2533_v49  ;;  %v2554_v41 = vld [vmem:[#allocation9 + $0x1068] sm:$0xff]  ;;  %v2557_v49 = vld [vmem:[#allocation9 + $0x1080] sm:$0xff]  ;;  %v2319_v60 = vld [vmem:[#allocation9 + $0x910] sm:$0xff] }
 0x2ef   : > { %5460 = vmatprep.subr.bf16.mxu0 %v5459_v11  ;;  %v2256_v11 = vld [vmem:[#allocation9 + $0x718] sm:$0xff]  ;;  %v2322_v12 = vld [vmem:[#allocation9 + $0x928] sm:$0xff]  ;;  %v2567_v38 = vld [vmem:[#allocation9 + $0x10d0] sm:$0xff] }
 0x2f0   : > { %5846 = vmatpush3.bf16.msra.mxu1 %v5845_v9  ;;  %v5861_v9 = vpack.c.bf16 %v2256_v11, %v2253_v30  ;;  %v2560_v24 = vld [vmem:[#allocation9 + $0x1098] sm:$0xff]  ;;  %v2325_v30 = vld [vmem:[#allocation9 + $0x940] sm:$0xff] }
 0x2f1   : > { %5848 = vmatprep.subr.bf16.mxu1 %v5847_v62  ;;  %v5863_v62 = vpack.c.bf16 %v2310_v26, %v2307_v33  ;;  %v2564_v5 = vld [vmem:[#allocation9 + $0x10b8] sm:$0xff]  ;;  %v2379_v33 = vld [vmem:[#allocation9 + $0xaf0] sm:$0xff]  ;;  %v2382_v26 = vld [vmem:[#allocation9 + $0xb08] sm:$0xff] }
 0x2f2   : > { %5462 = vmatpush1.bf16.msra.mxu0 %v5461_v42  ;;  %v5477_v42 = vpack.c.bf16 %v2542_v51, %v2539_v47  ;;  %v2563_v47 = vld [vmem:[#allocation9 + $0x10b0] sm:$0xff]  ;;  %v2328_v11 = vld [vmem:[#allocation9 + $0x958] sm:$0xff]  ;;  %v2566_v51 = vld [vmem:[#allocation9 + $0x10c8] sm:$0xff] }
 0x2f3   : > { %5464 = vmatprep.subr.bf16.mxu0 %v5463_v23  ;;  %v5479_v23 = vpack.c.bf16 %v2549_v43, %v2546_v18  ;;  %v2570_v18 = vld [vmem:[#allocation9 + $0x10e8] sm:$0xff]  ;;  %v2573_v43 = vld [vmem:[#allocation9 + $0x1100] sm:$0xff] }
 0x2f4   : > { %5850 = vmatpush3.bf16.msra.mxu1 %v5849_v14  ;;  %v5865_v14 = vpack.c.bf16 %v2262_v19, %v2259_v34  ;;  %v2331_v34 = vld [vmem:[#allocation9 + $0x970] sm:$0xff]  ;;  %v2334_v19 = vld [vmem:[#allocation9 + $0x988] sm:$0xff] }
 0x2f5   : > { %5852 = vmatprep.subr.bf16.mxu1 %v5851_v8  ;;  %v5867_v8 = vpack.c.bf16 %v2316_v15, %v2313_v4  ;;  %v2385_v4 = vld [vmem:[#allocation9 + $0xb20] sm:$0xff]  ;;  %v2388_v15 = vld [vmem:[#allocation9 + $0xb38] sm:$0xff] }
 0x2f6   : > { %5466 = vmatpush1.bf16.msra.mxu0 %v5465_v52  ;;  %v5481_v52 = vpack.c.bf16 %v2548_v25, %v2545_v56  ;;  %v2569_v56 = vld [vmem:[#allocation9 + $0x10e0] sm:$0xff]  ;;  %v2572_v25 = vld [vmem:[#allocation9 + $0x10f8] sm:$0xff] }
 0x2f7   : > { %5468 = vmatprep.subr.bf16.mxu0 %v5467_v20  ;;  %v5483_v20 = vpack.c.bf16 %v2555_v27, %v2552_v1  ;;  %v2576_v1 = vld [vmem:[#allocation9 + $0x1118] sm:$0xff]  ;;  %v5881_v27 = vpack.c.bf16 %v2334_v19, %v2331_v34 }
 0x2f8   : > { %5854 = vmatpush3.bf16.msra.mxu1 %v5853_v55  ;;  %v5869_v55 = vpack.c.bf16 %v2268_v37, %v2265_v40  ;;  %v2578_v37 = vld [vmem:[#allocation9 + $0x1128] sm:$0xff]  ;;  %v2596_v19 = vld [vmem:[#allocation9 + $0x11b8] sm:$0xff] }
 0x2f9   : > { %5856 = vmatprep.subr.bf16.mxu1 %v5855_v17  ;;  %v5871_v17 = vpack.c.bf16 %v2370_v53, %v2367_v63  ;;  %v2582_v63 = vld [vmem:[#allocation9 + $0x1148] sm:$0xff]  ;;  %v2585_v53 = vld [vmem:[#allocation9 + $0x1160] sm:$0xff] }
 0x2fa   : > { %5470 = vmatpush1.bf16.msra.mxu0 %v5469_v3  ;;  %v5485_v3 = vpack.c.bf16 %v2554_v41, %v2551_v57  ;;  %v2340_v57 = vld [vmem:[#allocation9 + $0x9b8] sm:$0xff]  ;;  %v2394_v41 = vld [vmem:[#allocation9 + $0xb68] sm:$0xff] }
 0x2fb   : > { %5472 = vmatprep.subr.bf16.mxu0 %v5471_v50  ;;  %v5487_v50 = vpack.c.bf16 %v2561_v21, %v2558_v45 }
 0x2fc   : > { %5858 = vmatpush3.bf16.msra.mxu1 %v5857_v48  ;;  %v5873_v48 = vpack.c.bf16 %v2322_v12, %v2319_v60  ;;  %v5503_v60 = vpack.c.bf16 %v2585_v53, %v2582_v63  ;;  %v2584_v12 = vld [vmem:[#allocation9 + $0x1158] sm:$0xff] }
 0x2fd   : > { %5860 = vmatprep.subr.bf16.mxu1 %v5859_v61  ;;  %v5875_v61 = vpack.c.bf16 %v2376_v2, %v2373_v16  ;;  %v2588_v16 = vld [vmem:[#allocation9 + $0x1178] sm:$0xff]  ;;  %v2591_v2 = vld [vmem:[#allocation9 + $0x1190] sm:$0xff] }
 0x2fe   : > { %5474 = vmatpush1.bf16.msra.mxu0 %v5473_v58  ;;  %v5489_v58 = vpack.c.bf16 %v2560_v24, %v2557_v49  ;;  %v2346_v49 = vld [vmem:[#allocation9 + $0x9e8] sm:$0xff]  ;;  %v2400_v24 = vld [vmem:[#allocation9 + $0xb98] sm:$0xff] }
 0x2ff   : > { %5476 = vmatprep.subr.bf16.mxu0 %v5475_v28  ;;  %v5491_v28 = vpack.c.bf16 %v2567_v38, %v2564_v5 }
 0x300   : > { %5862 = vmatpush3.bf16.msra.mxu1 %v5861_v9  ;;  %v5877_v9 = vpack.c.bf16 %v2328_v11, %v2325_v30  ;;  %v5507_v30 = vpack.c.bf16 %v2591_v2, %v2588_v16  ;;  %v2590_v11 = vld [vmem:[#allocation9 + $0x1188] sm:$0xff]  ;;  %v2472_v16 = vld [vmem:[#allocation9 + $0xdd8] sm:$0xff] }
 0x301   : > { %5864 = vmatprep.subr.bf16.mxu1 %v5863_v62  ;;  %v5879_v62 = vpack.c.bf16 %v2382_v26, %v2379_v33  ;;  %v2594_v33 = vld [vmem:[#allocation9 + $0x11a8] sm:$0xff]  ;;  %v2597_v26 = vld [vmem:[#allocation9 + $0x11c0] sm:$0xff] }
 0x302   : > { %5478 = vmatpush1.bf16.msra.mxu0 %v5477_v42  ;;  %v5493_v42 = vpack.c.bf16 %v2566_v51, %v2563_v47  ;;  %v2352_v47 = vld [vmem:[#allocation9 + $0xa18] sm:$0xff]  ;;  %v2406_v51 = vld [vmem:[#allocation9 + $0xbc8] sm:$0xff]  ;;  %v5511_v34 = vpack.c.bf16 %v2597_v26, %v2594_v33 }
 0x303   : > { %5480 = vmatprep.subr.bf16.mxu0 %v5479_v23  ;;  %v5495_v23 = vpack.c.bf16 %v2573_v43, %v2570_v18  ;;  %v2618_v26 = vld [vmem:[#allocation9 + $0x1268] sm:$0xff] }
 0x304   : > { %5866 = vmatpush3.bf16.msra.mxu1 %v5865_v14  ;;  %v5883_v14 = vpack.c.bf16 %v2388_v15, %v2385_v4  ;;  %v2600_v4 = vld [vmem:[#allocation9 + $0x11d8] sm:$0xff]  ;;  %v2603_v15 = vld [vmem:[#allocation9 + $0x11f0] sm:$0xff] }
 0x305   : > { %5868 = vmatprep.subr.bf16.mxu1 %v5867_v8  ;;  %v2337_v8 = vld [vmem:[#allocation9 + $0x9a0] sm:$0xff] }
 0x306   : > { %5482 = vmatpush1.bf16.msra.mxu0 %v5481_v52  ;;  %v2575_v52 = vld [vmem:[#allocation9 + $0x1110] sm:$0xff]  ;;  %v5885_v45 = vpack.c.bf16 %v2340_v57, %v2337_v8  ;;  %v5515_v8 = vpack.c.bf16 %v2603_v15, %v2600_v4  ;;  %v2602_v57 = vld [vmem:[#allocation9 + $0x11e8] sm:$0xff] }
 0x307   : > { %5484 = vmatprep.subr.bf16.mxu0 %v5483_v20  ;;  %v2391_v20 = vld [vmem:[#allocation9 + $0xb50] sm:$0xff]  ;;  %v5501_v21 = vpack.c.bf16 %v2578_v37, %v2575_v52  ;;  %v2364_v52 = vld [vmem:[#allocation9 + $0xa78] sm:$0xff]  ;;  %v2466_v37 = vld [vmem:[#allocation9 + $0xda8] sm:$0xff] }
 0x308   : > { %5870 = vmatpush3.bf16.msra.mxu1 %v5869_v55  ;;  %v5887_v55 = vpack.c.bf16 %v2394_v41, %v2391_v20  ;;  %v2606_v20 = vld [vmem:[#allocation9 + $0x1208] sm:$0xff]  ;;  %v2609_v41 = vld [vmem:[#allocation9 + $0x1220] sm:$0xff]  ;;  %v2627_v4 = vld [vmem:[#allocation9 + $0x12b0] sm:$0xff] }
 0x309   : > { %5872 = vmatprep.subr.bf16.mxu1 %v5871_v17  ;;  %v2343_v17 = vld [vmem:[#allocation9 + $0x9d0] sm:$0xff] }
 0x30a   : > { %5486 = vmatpush1.bf16.msra.mxu0 %v5485_v3  ;;  %v2581_v3 = vld [vmem:[#allocation9 + $0x1140] sm:$0xff]  ;;  %v5889_v5 = vpack.c.bf16 %v2346_v49, %v2343_v17  ;;  %v2608_v49 = vld [vmem:[#allocation9 + $0x1218] sm:$0xff] }
 0x30b   : > { %5488 = vmatprep.subr.bf16.mxu0 %v5487_v50  ;;  %4024 = vmatmul.mubr.f32.vlgmr.msra.gmra.mrb[102].mxu1 %v7315_v39  ;;  %v2579_v39 = vld [vmem:[#allocation9 + $0x1130] sm:$0xff]  ;;  %v2397_v50 = vld [vmem:[#allocation9 + $0xb80] sm:$0xff]  ;;  %v5505_v38 = vpack.c.bf16 %v2584_v12, %v2581_v3  ;;  %v5519_v3 = vpack.c.bf16 %v2609_v41, %v2606_v20 }
 0x30c   : > { %5874 = vmatpush3.bf16.msra.mxu1 %v5873_v48  ;;  %4093 = vmatprep.mubr.f32.mxu1 %v7344_v0  ;;  %v5497_v0 = vpack.c.bf16 %v2572_v25, %v2569_v56  ;;  %v5499_v40 = vpack.c.bf16 %v2579_v39, %v2576_v1  ;;  %v5891_v48 = vpack.c.bf16 %v2400_v24, %v2397_v50  ;;  %v2358_v56 = vld [vmem:[#allocation9 + $0xa48] sm:$0xff]  ;;  %v2412_v25 = vld [vmem:[#allocation9 + $0xbf8] sm:$0xff]  ;;  %v2605_v17 = vld [vmem:[#allocation9 + $0x1200] sm:$0xff] }
 0x30d   : > { %5876 = vmatprep.subr.bf16.mxu1 %v5875_v61  ;;  %v2349_v61 = vld [vmem:[#allocation9 + $0xa00] sm:$0xff]  ;;  %v2615_v12 = vld [vmem:[#allocation9 + $0x1250] sm:$0xff]  ;;  %v5521_v2 = vpack.c.bf16 %v2608_v49, %v2605_v17  ;;  %v2496_v49 = vld [vmem:[#allocation9 + $0xe98] sm:$0xff] }
 0x30e   : > { %5490 = vmatpush1.bf16.msra.mxu0 %v5489_v58  ;;  %v2587_v58 = vld [vmem:[#allocation9 + $0x1170] sm:$0xff]  ;;  %v5893_v18 = vpack.c.bf16 %v2352_v47, %v2349_v61  ;;  %v2469_v24 = vld [vmem:[#allocation9 + $0xdc0] sm:$0xff] }
 0x30f   : > { %5492 = vmatprep.subr.bf16.mxu0 %v5491_v28  ;;  %v2403_v28 = vld [vmem:[#allocation9 + $0xbb0] sm:$0xff]  ;;  %v5509_v43 = vpack.c.bf16 %v2590_v11, %v2587_v58  ;;  %v7517_v58 = vld [vmem:[#allocation2 + $0x8] sm:$0xff]  ;;  %v5907_v33 = vpack.c.bf16 %v2472_v16, %v2469_v24 }
 0x310   : > { %5878 = vmatpush3.bf16.msra.mxu1 %v5877_v9  ;;  %v5895_v9 = vpack.c.bf16 %v2406_v51, %v2403_v28  ;;  %v7521_v61 = vrot.slane %v7517_v58, %v7733_v7  ;;  %v2475_v11 = vld [vmem:[#allocation9 + $0xdf0] sm:$0xff]  ;;  %v2478_v28 = vld [vmem:[#allocation9 + $0xe08] sm:$0xff]  ;;  %v7526_v51 = vrot.slane %v7517_v58, %v6964_v36  ;;  %v2493_v17 = vld [vmem:[#allocation9 + $0xe80] sm:$0xff] }
 0x311   : > { %5880 = vmatprep.subr.bf16.mxu1 %v5879_v62  ;;  %v2355_v62 = vld [vmem:[#allocation9 + $0xa30] sm:$0xff]  ;;  %v5923_v16 = vpack.c.bf16 %v2496_v49, %v2493_v17  ;;  %v2660_v17 = vld [vmem:[#allocation9 + $0x13b8] sm:$0xff] }
 0x312   : > { %5494 = vmatpush1.bf16.msra.mxu0 %v5493_v42  ;;  %v2593_v42 = vld [vmem:[#allocation9 + $0x11a0] sm:$0xff]  ;;  %v5897_v1 = vpack.c.bf16 %v2358_v56, %v2355_v62  ;;  %v2427_v56 = vld [vmem:[#allocation9 + $0xc70] sm:$0xff] }
 0x313   : > { %5496 = vmatprep.subr.bf16.mxu0 %v5495_v23  ;;  %v2409_v23 = vld [vmem:[#allocation9 + $0xbe0] sm:$0xff]  ;;  %v5513_v39 = vpack.c.bf16 %v2596_v19, %v2593_v42  ;;  %v5911_v42 = vpack.c.bf16 %v2478_v28, %v2475_v11  ;;  %v2502_v11 = vld [vmem:[#allocation9 + $0xec8] sm:$0xff]  ;;  %v2663_v49 = vld [vmem:[#allocation9 + $0x13d0] sm:$0xff] }
 0x314   : > { %5882 = vmatpush3.bf16.msra.mxu1 %v5881_v27  ;;  %v5899_v27 = vpack.c.bf16 %v2412_v25, %v2409_v23  ;;  %v2617_v62 = vld [vmem:[#allocation9 + $0x1260] sm:$0xff]  ;;  %v2484_v23 = vld [vmem:[#allocation9 + $0xe38] sm:$0xff]  ;;  %v2642_v28 = vld [vmem:[#allocation9 + $0x1328] sm:$0xff] }
 0x315   : > { %5884 = vmatprep.subr.bf16.mxu1 %v5883_v14  ;;  %v2361_v14 = vld [vmem:[#allocation9 + $0xa60] sm:$0xff]  ;;  %v2624_v25 = vld [vmem:[#allocation9 + $0x1298] sm:$0xff] }
 0x316   : > { %5498 = vmatpush1.bf16.msra.mxu0 %v5497_v0  ;;  %v2599_v0 = vld [vmem:[#allocation9 + $0x11d0] sm:$0xff]  ;;  %v5901_v63 = vpack.c.bf16 %v2364_v52, %v2361_v14  ;;  %v2481_v19 = vld [vmem:[#allocation9 + $0xe20] sm:$0xff]  ;;  %v2436_v14 = vld [vmem:[#allocation9 + $0xcb8] sm:$0xff]  ;;  %v5531_v52 = vpack.c.bf16 %v2627_v4, %v2624_v25 }
 0x317   : > { %5500 = vmatprep.subr.bf16.mxu0 %v5499_v40  ;;  %v2463_v40 = vld [vmem:[#allocation9 + $0xd90] sm:$0xff]  ;;  %v5517_v53 = vpack.c.bf16 %v2602_v57, %v2599_v0  ;;  %v2433_v0 = vld [vmem:[#allocation9 + $0xca0] sm:$0xff]  ;;  %v2490_v57 = vld [vmem:[#allocation9 + $0xe68] sm:$0xff] }
 0x318   : > { %5886 = vmatpush3.bf16.msra.mxu1 %v5885_v45  ;;  %v5903_v45 = vpack.c.bf16 %v2466_v37, %v2463_v40  ;;  %v2630_v40 = vld [vmem:[#allocation9 + $0x12c8] sm:$0xff]  ;;  %v2633_v37 = vld [vmem:[#allocation9 + $0x12e0] sm:$0xff]  ;;  %v5917_v20 = vpack.c.bf16 %v2436_v14, %v2433_v0 }
 0x319   : > { %5888 = vmatprep.subr.bf16.mxu1 %v5887_v55  ;;  %v2418_v55 = vld [vmem:[#allocation9 + $0xc28] sm:$0xff] }
 0x31a   : > { %5502 = vmatpush1.bf16.msra.mxu0 %v5501_v21  ;;  %v2415_v21 = vld [vmem:[#allocation9 + $0xc10] sm:$0xff]  ;;  %v2650_v14 = vld [vmem:[#allocation9 + $0x1368] sm:$0xff] }
 0x31b   : > { %5504 = vmatprep.subr.bf16.mxu0 %v5503_v60  ;;  %v2612_v60 = vld [vmem:[#allocation9 + $0x1238] sm:$0xff]  ;;  %v5905_v50 = vpack.c.bf16 %v2418_v55, %v2415_v21  ;;  %v2442_v21 = vld [vmem:[#allocation9 + $0xce8] sm:$0xff]  ;;  %v5535_v55 = vpack.c.bf16 %v2633_v37, %v2630_v40 }
 0x31c   : > { %5890 = vmatpush3.bf16.msra.mxu1 %v5889_v5  ;;  %v2611_v5 = vld [vmem:[#allocation9 + $0x1230] sm:$0xff]  ;;  %v5523_v47 = vpack.c.bf16 %v2615_v12, %v2612_v60  ;;  %v2636_v60 = vld [vmem:[#allocation9 + $0x12f8] sm:$0xff] }
 0x31d   : > { %5892 = vmatprep.subr.bf16.mxu1 %v5891_v48  ;;  %v2424_v48 = vld [vmem:[#allocation9 + $0xc58] sm:$0xff]  ;;  %v2639_v12 = vld [vmem:[#allocation9 + $0x1310] sm:$0xff] }
 0x31e   : > { %5506 = vmatpush1.bf16.msra.mxu0 %v5505_v38  ;;  %v2421_v38 = vld [vmem:[#allocation9 + $0xc40] sm:$0xff] }
 0x31f   : > { %5508 = vmatprep.subr.bf16.mxu0 %v5507_v30  ;;  %v2614_v30 = vld [vmem:[#allocation9 + $0x1248] sm:$0xff] }
 0x320   : > { %5894 = vmatpush3.bf16.msra.mxu1 %v5893_v18  ;;  %v2621_v18 = vld [vmem:[#allocation9 + $0x1280] sm:$0xff] }
 0x321   : > { %5896 = vmatprep.subr.bf16.mxu1 %v5895_v9  ;;  %v5525_v9 = vpack.c.bf16 %v2614_v30, %v2611_v5  ;;  %v5527_v36 = vpack.c.bf16 %v2621_v18, %v2618_v26  ;;  %v2445_v5 = vld [vmem:[#allocation9 + $0xd00] sm:$0xff]  ;;  %v2499_v30 = vld [vmem:[#allocation9 + $0xeb0] sm:$0xff] }
 0x322   : > { %5510 = vmatpush1.bf16.msra.mxu0 %v5509_v43  ;;  %v5909_v43 = vpack.c.bf16 %v2424_v48, %v2421_v38  ;;  %v2448_v38 = vld [vmem:[#allocation9 + $0xd18] sm:$0xff]  ;;  %v5539_v48 = vpack.c.bf16 %v2639_v12, %v2636_v60 }
 0x323   : > { %5512 = vmatprep.subr.bf16.mxu0 %v5511_v34  ;;  %v2430_v34 = vld [vmem:[#allocation9 + $0xc88] sm:$0xff]  ;;  %v5925_v26 = vpack.c.bf16 %v2448_v38, %v2445_v5  ;;  %v5555_v5 = vpack.c.bf16 %v2663_v49, %v2660_v17  ;;  %v2683_v49 = vld [vmem:[#allocation9 + $0x1470] sm:$0xff] }
 0x324   : > { %5898 = vmatpush3.bf16.msra.mxu1 %v5897_v1  ;;  %v5913_v15 = vpack.c.bf16 %v2430_v34, %v2427_v56  ;;  %v2644_v34 = vld [vmem:[#allocation9 + $0x1338] sm:$0xff]  ;;  %v2662_v38 = vld [vmem:[#allocation9 + $0x13c8] sm:$0xff] }
 0x325   : > { %5900 = vmatprep.subr.bf16.mxu1 %v5899_v27  ;;  %v2623_v27 = vld [vmem:[#allocation9 + $0x1290] sm:$0xff] }
 0x326   : > { %5514 = vmatpush1.bf16.msra.mxu0 %v5513_v39  ;;  %v5915_v39 = vpack.c.bf16 %v2484_v23, %v2481_v19  ;;  %v2648_v19 = vld [vmem:[#allocation9 + $0x1358] sm:$0xff]  ;;  %v2651_v23 = vld [vmem:[#allocation9 + $0x1370] sm:$0xff] }
 0x327   : > { %5516 = vmatprep.subr.bf16.mxu0 %v5515_v8  ;;  %v2487_v8 = vld [vmem:[#allocation9 + $0xe50] sm:$0xff]  ;;  %v5547_v0 = vpack.c.bf16 %v2651_v23, %v2648_v19 }
 0x328   : > { %5902 = vmatpush3.bf16.msra.mxu1 %v5901_v63  ;;  %v5919_v63 = vpack.c.bf16 %v2490_v57, %v2487_v8  ;;  %v2654_v8 = vld [vmem:[#allocation9 + $0x1388] sm:$0xff]  ;;  %v2657_v57 = vld [vmem:[#allocation9 + $0x13a0] sm:$0xff]  ;;  %v2671_v23 = vld [vmem:[#allocation9 + $0x1410] sm:$0xff] }
 0x329   : > { %5904 = vmatprep.subr.bf16.mxu1 %v5903_v45  ;;  %v2439_v45 = vld [vmem:[#allocation9 + $0xcd0] sm:$0xff] }
 0x32a   : > { %5518 = vmatpush1.bf16.msra.mxu0 %v5517_v53  ;;  %v2629_v53 = vld [vmem:[#allocation9 + $0x12c0] sm:$0xff] }
 0x32b   : > { %5520 = vmatprep.subr.bf16.mxu0 %v5519_v3  ;;  %4094 = vmatmul.mubr.f32.vlgmr.msra.gmra.mrb[104].mxu1 %v7487_v59  ;;  %v2620_v59 = vld [vmem:[#allocation9 + $0x1278] sm:$0xff] }
 0x32c   : > { %5906 = vmatpush3.bf16.msra.mxu1 %v5905_v50  ;;  %4163 = vmatprep.mubr.f32.mxu1 %v7483_v10  ;;  %v5529_v1 = vpack.c.bf16 %v2620_v59, %v2617_v62  ;;  %v2626_v10 = vld [vmem:[#allocation9 + $0x12a8] sm:$0xff]  ;;  %v2632_v3 = vld [vmem:[#allocation9 + $0x12d8] sm:$0xff]  ;;  %v5921_v50 = vpack.c.bf16 %v2442_v21, %v2439_v45  ;;  %v5551_v45 = vpack.c.bf16 %v2657_v57, %v2654_v8  ;;  %v2677_v57 = vld [vmem:[#allocation9 + $0x1440] sm:$0xff] }
 0x32d   : > { %3529 = vmatmul.mubr.f32.vlgmr.msra.gmra.mrb[64].mxu0 %v7521_v61  ;;  %5908 = vmatprep.subr.bf16.mxu1 %v5907_v33  ;;  %v5533_v41 = vpack.c.bf16 %v2626_v10, %v2623_v27  ;;  %v5537_v24 = vpack.c.bf16 %v2632_v3, %v2629_v53  ;;  %v2645_v33 = vld [vmem:[#allocation9 + $0x1340] sm:$0xff]  ;;  %v2454_v62 = vld [vmem:[#allocation9 + $0xd48] sm:$0xff]  ;;  %v2508_v59 = vld [vmem:[#allocation9 + $0xef8] sm:$0xff] }
 0x32e   : > { %5522 = vmatpush1.bf16.msra.mxu0 %v5521_v2  ;;  %3599 = vmatprep.mubr.f32.mxu0 %v7526_v51  ;;  %v2635_v2 = vld [vmem:[#allocation9 + $0x12f0] sm:$0xff]  ;;  %v5543_v56 = vpack.c.bf16 %v2645_v33, %v2642_v28  ;;  %v2460_v27 = vld [vmem:[#allocation9 + $0xd78] sm:$0xff]  ;;  %v2562_v10 = vld [vmem:[#allocation9 + $0x10a8] sm:$0xff] }
 0x32f   : > { %5524 = vmatprep.subr.bf16.mxu0 %v5523_v47  ;;  %v2638_v47 = vld [vmem:[#allocation9 + $0x1308] sm:$0xff]  ;;  %v2656_v21 = vld [vmem:[#allocation9 + $0x1398] sm:$0xff] }
 0x330   : > { %5910 = vmatpush3.bf16.msra.mxu1 %v5909_v43  ;;  %v5541_v18 = vpack.c.bf16 %v2638_v47, %v2635_v2  ;;  %v5927_v43 = vpack.c.bf16 %v2502_v11, %v2499_v30  ;;  %v2514_v53 = vld [vmem:[#allocation9 + $0xf28] sm:$0xff]  ;;  %v2568_v3 = vld [vmem:[#allocation9 + $0x10d8] sm:$0xff]  ;;  %v2669_v11 = vld [vmem:[#allocation9 + $0x1400] sm:$0xff] }
 0x331   : > { %5912 = vmatprep.subr.bf16.mxu1 %v5911_v42  ;;  %v2451_v42 = vld [vmem:[#allocation9 + $0xd30] sm:$0xff]  ;;  %v2520_v2 = vld [vmem:[#allocation9 + $0xf58] sm:$0xff]  ;;  %v2574_v47 = vld [vmem:[#allocation9 + $0x1108] sm:$0xff] }
 0x332   : > { %5526 = vmatpush1.bf16.msra.mxu0 %v5525_v9  ;;  %v2641_v9 = vld [vmem:[#allocation9 + $0x1320] sm:$0xff]  ;;  %v5929_v25 = vpack.c.bf16 %v2454_v62, %v2451_v42  ;;  %v2666_v30 = vld [vmem:[#allocation9 + $0x13e8] sm:$0xff]  ;;  %v2668_v62 = vld [vmem:[#allocation9 + $0x13f8] sm:$0xff] }
 0x333   : > { %5528 = vmatprep.subr.bf16.mxu0 %v5527_v36  ;;  %v2505_v36 = vld [vmem:[#allocation9 + $0xee0] sm:$0xff]  ;;  %v5545_v4 = vpack.c.bf16 %v2644_v34, %v2641_v9  ;;  %v2526_v9 = vld [vmem:[#allocation9 + $0xf88] sm:$0xff]  ;;  %v5559_v42 = vpack.c.bf16 %v2669_v11, %v2666_v30  ;;  %v2580_v34 = vld [vmem:[#allocation9 + $0x1138] sm:$0xff] }
 0x334   : > { %5914 = vmatpush3.bf16.msra.mxu1 %v5913_v15  ;;  %v5931_v15 = vpack.c.bf16 %v2508_v59, %v2505_v36  ;;  %v2672_v36 = vld [vmem:[#allocation9 + $0x1418] sm:$0xff]  ;;  %v2689_v11 = vld [vmem:[#allocation9 + $0x14a0] sm:$0xff] }
 0x335   : > { %5916 = vmatprep.subr.bf16.mxu1 %v5915_v39  ;;  %v2457_v39 = vld [vmem:[#allocation9 + $0xd60] sm:$0xff] }
 0x336   : > { %5530 = vmatpush1.bf16.msra.mxu0 %v5529_v1  ;;  %v2647_v1 = vld [vmem:[#allocation9 + $0x1350] sm:$0xff]  ;;  %v5933_v40 = vpack.c.bf16 %v2460_v27, %v2457_v39  ;;  %v2586_v27 = vld [vmem:[#allocation9 + $0x1168] sm:$0xff] }
 0x337   : > { %5532 = vmatprep.subr.bf16.mxu0 %v5531_v52  ;;  %v2559_v52 = vld [vmem:[#allocation9 + $0x1090] sm:$0xff]  ;;  %v5549_v37 = vpack.c.bf16 %v2650_v14, %v2647_v1  ;;  %v2674_v1 = vld [vmem:[#allocation9 + $0x1428] sm:$0xff]  ;;  %v2681_v14 = vld [vmem:[#allocation9 + $0x1460] sm:$0xff] }
 0x338   : > { %5918 = vmatpush3.bf16.msra.mxu1 %v5917_v20  ;;  %v5935_v20 = vpack.c.bf16 %v2562_v10, %v2559_v52  ;;  %v2583_v39 = vld [vmem:[#allocation9 + $0x1150] sm:$0xff]  ;;  %v5565_v10 = vpack.c.bf16 %v2674_v1, %v2671_v23  ;;  %v2698_v23 = vld [vmem:[#allocation9 + $0x14e8] sm:$0xff]  ;;  %v2705_v1 = vld [vmem:[#allocation9 + $0x1520] sm:$0xff] }
 0x339   : > { %5920 = vmatprep.subr.bf16.mxu1 %v5919_v63  ;;  %v2511_v63 = vld [vmem:[#allocation9 + $0xf10] sm:$0xff]  ;;  %v5951_v8 = vpack.c.bf16 %v2586_v27, %v2583_v39 }
 0x33a   : > { %5534 = vmatpush1.bf16.msra.mxu0 %v5533_v41  ;;  %v2653_v41 = vld [vmem:[#allocation9 + $0x1380] sm:$0xff]  ;;  %v5937_v60 = vpack.c.bf16 %v2514_v53, %v2511_v63  ;;  %v2592_v53 = vld [vmem:[#allocation9 + $0x1198] sm:$0xff] }
 0x33b   : > { %5536 = vmatprep.subr.bf16.mxu0 %v5535_v55  ;;  %v2565_v55 = vld [vmem:[#allocation9 + $0x10c0] sm:$0xff]  ;;  %v5553_v12 = vpack.c.bf16 %v2656_v21, %v2653_v41  ;;  %v2680_v41 = vld [vmem:[#allocation9 + $0x1458] sm:$0xff]  ;;  %v2687_v21 = vld [vmem:[#allocation9 + $0x1490] sm:$0xff] }
 0x33c   : > { %5922 = vmatpush3.bf16.msra.mxu1 %v5921_v50  ;;  %v5939_v50 = vpack.c.bf16 %v2568_v3, %v2565_v55  ;;  %v2589_v63 = vld [vmem:[#allocation9 + $0x1180] sm:$0xff]  ;;  %v5569_v3 = vpack.c.bf16 %v2680_v41, %v2677_v57  ;;  %v2704_v57 = vld [vmem:[#allocation9 + $0x1518] sm:$0xff] }
 0x33d   : > { %5924 = vmatprep.subr.bf16.mxu1 %v5923_v16  ;;  %v2517_v16 = vld [vmem:[#allocation9 + $0xf40] sm:$0xff]  ;;  %v5955_v17 = vpack.c.bf16 %v2592_v53, %v2589_v63  ;;  %v2664_v63 = vld [vmem:[#allocation9 + $0x13d8] sm:$0xff] }
 0x33e   : > { %5538 = vmatpush1.bf16.msra.mxu0 %v5537_v24  ;;  %v2659_v24 = vld [vmem:[#allocation9 + $0x13b0] sm:$0xff]  ;;  %v5941_v28 = vpack.c.bf16 %v2520_v2, %v2517_v16  ;;  %v2598_v2 = vld [vmem:[#allocation9 + $0x11c8] sm:$0xff]  ;;  %v2661_v41 = vld [vmem:[#allocation9 + $0x13c0] sm:$0xff] }
 0x33f   : > { %5540 = vmatprep.subr.bf16.mxu0 %v5539_v48  ;;  %v2571_v48 = vld [vmem:[#allocation9 + $0x10f0] sm:$0xff]  ;;  %v5557_v33 = vpack.c.bf16 %v2662_v38, %v2659_v24  ;;  %v2686_v24 = vld [vmem:[#allocation9 + $0x1488] sm:$0xff]  ;;  %v2693_v38 = vld [vmem:[#allocation9 + $0x14c0] sm:$0xff] }
 0x340   : > { %5926 = vmatpush3.bf16.msra.mxu1 %v5925_v26  ;;  %v5943_v26 = vpack.c.bf16 %v2574_v47, %v2571_v48  ;;  %v2595_v16 = vld [vmem:[#allocation9 + $0x11b0] sm:$0xff]  ;;  %v5573_v47 = vpack.c.bf16 %v2686_v24, %v2683_v49  ;;  %v2710_v49 = vld [vmem:[#allocation9 + $0x1548] sm:$0xff]  ;;  %v5971_v24 = vpack.c.bf16 %v2664_v63, %v2661_v41 }
 0x341   : > { %5928 = vmatprep.subr.bf16.mxu1 %v5927_v43  ;;  %v2523_v43 = vld [vmem:[#allocation9 + $0xf70] sm:$0xff]  ;;  %v5959_v30 = vpack.c.bf16 %v2598_v2, %v2595_v16  ;;  %v2714_v16 = vld [vmem:[#allocation9 + $0x1568] sm:$0xff]  ;;  %v2717_v2 = vld [vmem:[#allocation9 + $0x1580] sm:$0xff] }
 0x342   : > { %5542 = vmatpush1.bf16.msra.mxu0 %v5541_v18  ;;  %v2665_v18 = vld [vmem:[#allocation9 + $0x13e0] sm:$0xff]  ;;  %v5945_v59 = vpack.c.bf16 %v2526_v9, %v2523_v43  ;;  %v2604_v9 = vld [vmem:[#allocation9 + $0x11f8] sm:$0xff]  ;;  %v2734_v63 = vld [vmem:[#allocation9 + $0x1608] sm:$0xff] }
 0x343   : > { %5544 = vmatprep.subr.bf16.mxu0 %v5543_v56  ;;  %v2577_v56 = vld [vmem:[#allocation9 + $0x1120] sm:$0xff] }
 0x344   : > { %5930 = vmatpush3.bf16.msra.mxu1 %v5929_v25  ;;  %v5947_v19 = vpack.c.bf16 %v2580_v34, %v2577_v56  ;;  %v2529_v25 = vld [vmem:[#allocation9 + $0xfa0] sm:$0xff] }
 0x345   : > { %5932 = vmatprep.subr.bf16.mxu1 %v5931_v15  ;;  %v2601_v43 = vld [vmem:[#allocation9 + $0x11e0] sm:$0xff] }
 0x346   : > { %5546 = vmatpush1.bf16.msra.mxu0 %v5545_v4  ;;  %v2532_v4 = vld [vmem:[#allocation9 + $0xfb8] sm:$0xff] }
 0x347   : > { %5548 = vmatprep.subr.bf16.mxu0 %v5547_v0  ;;  %v2678_v0 = vld [vmem:[#allocation9 + $0x1448] sm:$0xff]  ;;  %v5949_v52 = vpack.c.bf16 %v2532_v4, %v2529_v25  ;;  %v2655_v25 = vld [vmem:[#allocation9 + $0x1390] sm:$0xff] }
 0x348   : > { %5934 = vmatpush3.bf16.msra.mxu1 %v5933_v40  ;;  %v2535_v40 = vld [vmem:[#allocation9 + $0xfd0] sm:$0xff]  ;;  %v2658_v4 = vld [vmem:[#allocation9 + $0x13a8] sm:$0xff] }
 0x349   : > { %5936 = vmatprep.subr.bf16.mxu1 %v5935_v20  ;;  %v5567_v20 = vpack.c.bf16 %v2681_v14, %v2678_v0  ;;  %v5967_v0 = vpack.c.bf16 %v2658_v4, %v2655_v25  ;;  %v2607_v14 = vld [vmem:[#allocation9 + $0x1210] sm:$0xff]  ;;  %v2725_v25 = vld [vmem:[#allocation9 + $0x15c0] sm:$0xff] }
 0x34a   : > { %5550 = vmatpush1.bf16.msra.mxu0 %v5549_v37  ;;  %v2538_v37 = vld [vmem:[#allocation9 + $0xfe8] sm:$0xff]  ;;  %v2631_v4 = vld [vmem:[#allocation9 + $0x12d0] sm:$0xff] }
 0x34b   : > { %5552 = vmatprep.subr.bf16.mxu0 %v5551_v45  ;;  %4164 = vmatmul.mubr.f32.vlgmr.msra.gmra.mrb[106].mxu1 %v7505_v22  ;;  %v2675_v22 = vld [vmem:[#allocation9 + $0x1430] sm:$0xff]  ;;  %v2684_v45 = vld [vmem:[#allocation9 + $0x1478] sm:$0xff]  ;;  %v5953_v55 = vpack.c.bf16 %v2538_v37, %v2535_v40 }
 0x34c   : > { %5938 = vmatpush3.bf16.msra.mxu1 %v5937_v60  ;;  %4233 = vmatprep.mubr.f32.mxu1 %v7510_v46  ;;  %v5561_v46 = vpack.c.bf16 %v2668_v62, %v2665_v18  ;;  %v5563_v15 = vpack.c.bf16 %v2675_v22, %v2672_v36  ;;  %v2541_v60 = vld [vmem:[#allocation9 + $0x1000] sm:$0xff]  ;;  %v2692_v18 = vld [vmem:[#allocation9 + $0x14b8] sm:$0xff]  ;;  %v2699_v62 = vld [vmem:[#allocation9 + $0x14f0] sm:$0xff]  ;;  %v5963_v36 = vpack.c.bf16 %v2604_v9, %v2601_v43 }
 0x34d   : > { %5940 = vmatprep.subr.bf16.mxu1 %v5939_v50  ;;  %v5571_v50 = vpack.c.bf16 %v2687_v21, %v2684_v45  ;;  %v5577_v34 = vpack.c.bf16 %v2692_v18, %v2689_v11  ;;  %v2695_v22 = vld [vmem:[#allocation9 + $0x14d0] sm:$0xff]  ;;  %v2708_v40 = vld [vmem:[#allocation9 + $0x1538] sm:$0xff]  ;;  %v2613_v21 = vld [vmem:[#allocation9 + $0x1240] sm:$0xff] }
 0x34e   : > { %5554 = vmatpush1.bf16.msra.mxu0 %v5553_v12  ;;  %v2544_v12 = vld [vmem:[#allocation9 + $0x1018] sm:$0xff]  ;;  %v5581_v27 = vpack.c.bf16 %v2698_v23, %v2695_v22  ;;  %v2711_v37 = vld [vmem:[#allocation9 + $0x1550] sm:$0xff]  ;;  %v2726_v22 = vld [vmem:[#allocation9 + $0x15c8] sm:$0xff] }
 0x34f   : > { %5556 = vmatprep.subr.bf16.mxu0 %v5555_v5  ;;  %v2690_v5 = vld [vmem:[#allocation9 + $0x14a8] sm:$0xff]  ;;  %v5957_v48 = vpack.c.bf16 %v2544_v12, %v2541_v60  ;;  %v2707_v45 = vld [vmem:[#allocation9 + $0x1530] sm:$0xff]  ;;  %v2676_v11 = vld [vmem:[#allocation9 + $0x1438] sm:$0xff] }
 0x350   : > { %5942 = vmatpush3.bf16.msra.mxu1 %v5941_v28  ;;  %v2547_v28 = vld [vmem:[#allocation9 + $0x1030] sm:$0xff]  ;;  %v2670_v12 = vld [vmem:[#allocation9 + $0x1408] sm:$0xff] }
 0x351   : > { %5944 = vmatprep.subr.bf16.mxu1 %v5943_v26  ;;  %v5575_v26 = vpack.c.bf16 %v2693_v38, %v2690_v5  ;;  %v2667_v60 = vld [vmem:[#allocation9 + $0x13f0] sm:$0xff] }
 0x352   : > { %5558 = vmatpush1.bf16.msra.mxu0 %v5557_v33  ;;  %v2550_v33 = vld [vmem:[#allocation9 + $0x1048] sm:$0xff]  ;;  %v5975_v38 = vpack.c.bf16 %v2670_v12, %v2667_v60  ;;  %v2719_v9 = vld [vmem:[#allocation9 + $0x1590] sm:$0xff]  ;;  %v2737_v12 = vld [vmem:[#allocation9 + $0x1620] sm:$0xff] }
 0x353   : > { %5560 = vmatprep.subr.bf16.mxu0 %v5559_v42  ;;  %v2696_v42 = vld [vmem:[#allocation9 + $0x14d8] sm:$0xff]  ;;  %v5961_v56 = vpack.c.bf16 %v2550_v33, %v2547_v28  ;;  %v2723_v33 = vld [vmem:[#allocation9 + $0x15b0] sm:$0xff] }
 0x354   : > { %5946 = vmatpush3.bf16.msra.mxu1 %v5945_v59  ;;  %v2553_v59 = vld [vmem:[#allocation9 + $0x1060] sm:$0xff]  ;;  %v2720_v28 = vld [vmem:[#allocation9 + $0x1598] sm:$0xff] }
 0x355   : > { %5948 = vmatprep.subr.bf16.mxu1 %v5947_v19  ;;  %v5579_v19 = vpack.c.bf16 %v2699_v62, %v2696_v42  ;;  %v2625_v42 = vld [vmem:[#allocation9 + $0x12a0] sm:$0xff]  ;;  %v2628_v62 = vld [vmem:[#allocation9 + $0x12b8] sm:$0xff] }
 0x356   : > { %5562 = vmatpush1.bf16.msra.mxu0 %v5561_v46  ;;  %v2556_v46 = vld [vmem:[#allocation9 + $0x1078] sm:$0xff] }
 0x357   : > { %5564 = vmatprep.subr.bf16.mxu0 %v5563_v15  ;;  %v2702_v15 = vld [vmem:[#allocation9 + $0x1508] sm:$0xff]  ;;  %v5965_v39 = vpack.c.bf16 %v2556_v46, %v2553_v59  ;;  %v2729_v59 = vld [vmem:[#allocation9 + $0x15e0] sm:$0xff]  ;;  %v5981_v46 = vpack.c.bf16 %v2628_v62, %v2625_v42 }
 0x358   : > { %5950 = vmatpush3.bf16.msra.mxu1 %v5949_v52  ;;  %v2610_v52 = vld [vmem:[#allocation9 + $0x1228] sm:$0xff] }
 0x359   : > { %5952 = vmatprep.subr.bf16.mxu1 %v5951_v8  ;;  %v2701_v8 = vld [vmem:[#allocation9 + $0x1500] sm:$0xff]  ;;  %v2754_v42 = vld [vmem:[#allocation9 + $0x16a8] sm:$0xff] }
 0x35a   : > { %5566 = vmatpush1.bf16.msra.mxu0 %v5565_v10  ;;  %v5583_v10 = vpack.c.bf16 %v2705_v1, %v2702_v15  ;;  %v5585_v53 = vpack.c.bf16 %v2704_v57, %v2701_v8  ;;  %v2634_v15 = vld [vmem:[#allocation9 + $0x12e8] sm:$0xff]  ;;  %v5599_v1 = vpack.c.bf16 %v2729_v59, %v2726_v22  ;;  %v2749_v22 = vld [vmem:[#allocation9 + $0x1680] sm:$0xff]  ;;  %v2703_v59 = vld [vmem:[#allocation9 + $0x1510] sm:$0xff] }
 0x35b   : > { %5568 = vmatprep.subr.bf16.mxu0 %v5567_v20  ;;  %v5969_v20 = vpack.c.bf16 %v2610_v52, %v2607_v14  ;;  %v2732_v14 = vld [vmem:[#allocation9 + $0x15f8] sm:$0xff]  ;;  %v2735_v52 = vld [vmem:[#allocation9 + $0x1610] sm:$0xff]  ;;  %v2750_v62 = vld [vmem:[#allocation9 + $0x1688] sm:$0xff] }
 0x35c   : > { %5954 = vmatpush3.bf16.msra.mxu1 %v5953_v55  ;;  %v2616_v55 = vld [vmem:[#allocation9 + $0x1258] sm:$0xff]  ;;  %v5603_v41 = vpack.c.bf16 %v2735_v52, %v2732_v14  ;;  %v2755_v14 = vld [vmem:[#allocation9 + $0x16b0] sm:$0xff]  ;;  %v2709_v52 = vld [vmem:[#allocation9 + $0x1540] sm:$0xff] }
 0x35d   : > { %5956 = vmatprep.subr.bf16.mxu1 %v5955_v17  ;;  %v5587_v17 = vpack.c.bf16 %v2711_v37, %v2708_v40  ;;  %v5973_v5 = vpack.c.bf16 %v2616_v55, %v2613_v21  ;;  %v2731_v40 = vld [vmem:[#allocation9 + $0x15f0] sm:$0xff]  ;;  %v2637_v37 = vld [vmem:[#allocation9 + $0x1300] sm:$0xff]  ;;  %v2738_v21 = vld [vmem:[#allocation9 + $0x1628] sm:$0xff] }
 0x35e   : > { %5570 = vmatpush1.bf16.msra.mxu0 %v5569_v3  ;;  %v7535_v3 = vrot.slane %v7517_v58, %v6956_v32  ;;  %v5589_v32 = vpack.c.bf16 %v2710_v49, %v2707_v45  ;;  %v2694_v45 = vld [vmem:[#allocation9 + $0x14c8] sm:$0xff]  ;;  %v2741_v55 = vld [vmem:[#allocation9 + $0x1640] sm:$0xff]  ;;  %v5605_v49 = vpack.c.bf16 %v2734_v63, %v2731_v40  ;;  %v2763_v40 = vld [vmem:[#allocation9 + $0x16f0] sm:$0xff] }
 0x35f   : > { %5572 = vmatprep.subr.bf16.mxu0 %v5571_v50  ;;  %v7540_v50 = vrot.slane %v7517_v58, %v7044_v13  ;;  %v5591_v13 = vpack.c.bf16 %v2717_v2, %v2714_v16  ;;  %v2716_v58 = vld [vmem:[#allocation9 + $0x1578] sm:$0xff]  ;;  %v2646_v16 = vld [vmem:[#allocation9 + $0x1348] sm:$0xff] }
 0x360   : > { %5958 = vmatpush3.bf16.msra.mxu1 %v5957_v48  ;;  %v2713_v48 = vld [vmem:[#allocation9 + $0x1560] sm:$0xff] }
 0x361   : > { %5960 = vmatprep.subr.bf16.mxu1 %v5959_v30  ;;  %v2622_v30 = vld [vmem:[#allocation9 + $0x1288] sm:$0xff]  ;;  %v5593_v18 = vpack.c.bf16 %v2716_v58, %v2713_v48  ;;  %v2700_v48 = vld [vmem:[#allocation9 + $0x14f8] sm:$0xff] }
 0x362   : > { %5574 = vmatpush1.bf16.msra.mxu0 %v5573_v47  ;;  %v2619_v47 = vld [vmem:[#allocation9 + $0x1270] sm:$0xff] }
 0x363   : > { %5576 = vmatprep.subr.bf16.mxu0 %v5575_v26  ;;  %v5977_v26 = vpack.c.bf16 %v2622_v30, %v2619_v47  ;;  %v2744_v30 = vld [vmem:[#allocation9 + $0x1658] sm:$0xff] }
 0x364   : > { %5962 = vmatpush3.bf16.msra.mxu1 %v5961_v56  ;;  %v5595_v56 = vpack.c.bf16 %v2723_v33, %v2720_v28  ;;  %v2743_v28 = vld [vmem:[#allocation9 + $0x1650] sm:$0xff]  ;;  %v2649_v33 = vld [vmem:[#allocation9 + $0x1360] sm:$0xff] }
 0x365   : > { %5964 = vmatprep.subr.bf16.mxu1 %v5963_v36  ;;  %v2682_v36 = vld [vmem:[#allocation9 + $0x1468] sm:$0xff] }
 0x366   : > { %5578 = vmatpush1.bf16.msra.mxu0 %v5577_v34  ;;  %v2679_v34 = vld [vmem:[#allocation9 + $0x1450] sm:$0xff] }
 0x367   : > { %5580 = vmatprep.subr.bf16.mxu0 %v5579_v19  ;;  %v5983_v23 = vpack.c.bf16 %v2682_v36, %v2679_v34 }
 0x368   : > { %5966 = vmatpush3.bf16.msra.mxu1 %v5965_v39  ;;  %v2728_v39 = vld [vmem:[#allocation9 + $0x15d8] sm:$0xff] }
 0x369   : > { %5968 = vmatprep.subr.bf16.mxu1 %v5967_v0  ;;  %v2688_v0 = vld [vmem:[#allocation9 + $0x1498] sm:$0xff]  ;;  %v5601_v8 = vpack.c.bf16 %v2728_v39, %v2725_v25  ;;  %v2757_v25 = vld [vmem:[#allocation9 + $0x16c0] sm:$0xff] }
 0x36a   : > { %5582 = vmatpush1.bf16.msra.mxu0 %v5581_v27  ;;  %v2685_v27 = vld [vmem:[#allocation9 + $0x1480] sm:$0xff] }
 0x36b   : > { %5584 = vmatprep.subr.bf16.mxu0 %v5583_v10  ;;  %4234 = vmatmul.mubr.f32.vlgmr.msra.gmra.mrb[108].mxu1 %v7521_v61  ;;  %v2673_v61 = vld [vmem:[#allocation9 + $0x1420] sm:$0xff]  ;;  %v5985_v10 = vpack.c.bf16 %v2634_v15, %v2631_v4  ;;  %v5987_v57 = vpack.c.bf16 %v2688_v0, %v2685_v27  ;;  %v2760_v4 = vld [vmem:[#allocation9 + $0x16d8] sm:$0xff] }
 0x36c   : > { %5970 = vmatpush3.bf16.msra.mxu1 %v5969_v20  ;;  %4303 = vmatprep.mubr.f32.mxu1 %v7526_v51  ;;  %v5979_v43 = vpack.c.bf16 %v2676_v11, %v2673_v61  ;;  %v2722_v51 = vld [vmem:[#allocation9 + $0x15a8] sm:$0xff]  ;;  %v2640_v20 = vld [vmem:[#allocation9 + $0x1318] sm:$0xff]  ;;  %v6003_v0 = vpack.c.bf16 %v2760_v4, %v2757_v25  ;;  %v2779_v25 = vld [vmem:[#allocation9 + $0x1770] sm:$0xff] }
 0x36d   : > { %3600 = vmatmul.mubr.f32.vlgmr.msra.gmra.mrb[64].mxu0 %v7535_v3  ;;  %5972 = vmatprep.subr.bf16.mxu1 %v5971_v24  ;;  %v5597_v19 = vpack.c.bf16 %v2722_v51, %v2719_v9  ;;  %v2643_v24 = vld [vmem:[#allocation9 + $0x1330] sm:$0xff]  ;;  %v2756_v15 = vld [vmem:[#allocation9 + $0x16b8] sm:$0xff]  ;;  %v2733_v4 = vld [vmem:[#allocation9 + $0x1600] sm:$0xff] }
 0x36e   : > { %5586 = vmatpush1.bf16.msra.mxu0 %v5585_v53  ;;  %3670 = vmatprep.mubr.f32.mxu0 %v7540_v50  ;;  %v2691_v53 = vld [vmem:[#allocation9 + $0x14b0] sm:$0xff]  ;;  %v5993_v58 = vpack.c.bf16 %v2646_v16, %v2643_v24  ;;  %v2772_v24 = vld [vmem:[#allocation9 + $0x1738] sm:$0xff] }
 0x36f   : > { %5588 = vmatprep.subr.bf16.mxu0 %v5587_v17  ;;  %v5989_v17 = vpack.c.bf16 %v2640_v20, %v2637_v37  ;;  %v5991_v60 = vpack.c.bf16 %v2694_v45, %v2691_v53  ;;  %v2751_v9 = vld [vmem:[#allocation9 + $0x1690] sm:$0xff]  ;;  %v2766_v37 = vld [vmem:[#allocation9 + $0x1708] sm:$0xff]  ;;  %v2768_v16 = vld [vmem:[#allocation9 + $0x1718] sm:$0xff] }
 0x370   : > { %5974 = vmatpush3.bf16.msra.mxu1 %v5973_v5  ;;  %v5607_v5 = vpack.c.bf16 %v2741_v55, %v2738_v21  ;;  %v5999_v36 = vpack.c.bf16 %v2754_v42, %v2751_v9  ;;  %v2762_v20 = vld [vmem:[#allocation9 + $0x16e8] sm:$0xff]  ;;  %v6007_v45 = vpack.c.bf16 %v2766_v37, %v2763_v40  ;;  %v2761_v21 = vld [vmem:[#allocation9 + $0x16e0] sm:$0xff]  ;;  %v2715_v55 = vld [vmem:[#allocation9 + $0x1570] sm:$0xff] }
 0x371   : > { %5976 = vmatprep.subr.bf16.mxu1 %v5975_v38  ;;  %v2697_v38 = vld [vmem:[#allocation9 + $0x14e0] sm:$0xff]  ;;  %v2727_v42 = vld [vmem:[#allocation9 + $0x15d0] sm:$0xff] }
 0x372   : > { %5590 = vmatpush1.bf16.msra.mxu0 %v5589_v32  ;;  %v2740_v32 = vld [vmem:[#allocation9 + $0x1638] sm:$0xff]  ;;  %v5995_v11 = vpack.c.bf16 %v2700_v48, %v2697_v38  ;;  %v2767_v38 = vld [vmem:[#allocation9 + $0x1710] sm:$0xff]  ;;  %v2721_v48 = vld [vmem:[#allocation9 + $0x15a0] sm:$0xff] }
 0x373   : > { %5592 = vmatprep.subr.bf16.mxu0 %v5591_v13  ;;  %v2747_v13 = vld [vmem:[#allocation9 + $0x1670] sm:$0xff]  ;;  %v5609_v61 = vpack.c.bf16 %v2740_v32, %v2737_v12  ;;  %v2769_v12 = vld [vmem:[#allocation9 + $0x1720] sm:$0xff] }
 0x374   : > { %5978 = vmatpush3.bf16.msra.mxu1 %v5977_v26  ;;  %v2652_v26 = vld [vmem:[#allocation9 + $0x1378] sm:$0xff]  ;;  %v6011_v32 = vpack.c.bf16 %v2772_v24, %v2769_v12  ;;  %v2773_v9 = vld [vmem:[#allocation9 + $0x1740] sm:$0xff]  ;;  %v2739_v37 = vld [vmem:[#allocation9 + $0x1630] sm:$0xff] }
 0x375   : > { %5980 = vmatprep.subr.bf16.mxu1 %v5979_v43  ;;  %v2746_v43 = vld [vmem:[#allocation9 + $0x1668] sm:$0xff]  ;;  %v5997_v51 = vpack.c.bf16 %v2652_v26, %v2649_v33  ;;  %v2777_v33 = vld [vmem:[#allocation9 + $0x1760] sm:$0xff] }
 0x376   : > { %5594 = vmatpush1.bf16.msra.mxu0 %v5593_v18  ;;  %v5611_v18 = vpack.c.bf16 %v2747_v13, %v2744_v30  ;;  %v5613_v34 = vpack.c.bf16 %v2746_v43, %v2743_v28  ;;  %v2724_v30 = vld [vmem:[#allocation9 + $0x15b8] sm:$0xff]  ;;  %v2774_v28 = vld [vmem:[#allocation9 + $0x1748] sm:$0xff]  ;;  %v2785_v40 = vld [vmem:[#allocation9 + $0x17a0] sm:$0xff] }
 0x377   : > { %5596 = vmatprep.subr.bf16.mxu0 %v5595_v56  ;;  %v2753_v56 = vld [vmem:[#allocation9 + $0x16a0] sm:$0xff]  ;;  %v6013_v26 = vpack.c.bf16 %v2724_v30, %v2721_v48  ;;  %v2847_v48 = vld [vmem:[#allocation9 + $0x1990] sm:$0xff]  ;;  %v2850_v30 = vld [vmem:[#allocation9 + $0x19a8] sm:$0xff] }
 0x378   : > { %5982 = vmatpush3.bf16.msra.mxu1 %v5981_v46  ;;  %v2706_v46 = vld [vmem:[#allocation9 + $0x1528] sm:$0xff] }
 0x379   : > { %5984 = vmatprep.subr.bf16.mxu1 %v5983_v23  ;;  %v2752_v23 = vld [vmem:[#allocation9 + $0x1698] sm:$0xff]  ;;  %v6001_v39 = vpack.c.bf16 %v2706_v46, %v2703_v59  ;;  %v2783_v59 = vld [vmem:[#allocation9 + $0x1790] sm:$0xff] }
 0x37a   : > { %5598 = vmatpush1.bf16.msra.mxu0 %v5597_v19  ;;  %v5615_v19 = vpack.c.bf16 %v2753_v56, %v2750_v62  ;;  %v5617_v27 = vpack.c.bf16 %v2752_v23, %v2749_v22  ;;  %v2730_v62 = vld [vmem:[#allocation9 + $0x15e8] sm:$0xff]  ;;  %v5631_v56 = vpack.c.bf16 %v2777_v33, %v2774_v28  ;;  %v2780_v22 = vld [vmem:[#allocation9 + $0x1778] sm:$0xff]  ;;  %v6031_v28 = vpack.c.bf16 %v2850_v30, %v2847_v48  ;;  %v2799_v33 = vld [vmem:[#allocation9 + $0x1810] sm:$0xff] }
 0x37b   : > { %5600 = vmatprep.subr.bf16.mxu0 %v5599_v1  ;;  %v2759_v1 = vld [vmem:[#allocation9 + $0x16d0] sm:$0xff]  ;;  %v6017_v46 = vpack.c.bf16 %v2730_v62, %v2727_v42  ;;  %v2804_v42 = vld [vmem:[#allocation9 + $0x1838] sm:$0xff]  ;;  %v2825_v48 = vld [vmem:[#allocation9 + $0x18e0] sm:$0xff] }
 0x37c   : > { %5986 = vmatpush3.bf16.msra.mxu1 %v5985_v10  ;;  %v2712_v10 = vld [vmem:[#allocation9 + $0x1558] sm:$0xff]  ;;  %v2807_v62 = vld [vmem:[#allocation9 + $0x1850] sm:$0xff] }
 0x37d   : > { %5988 = vmatprep.subr.bf16.mxu1 %v5987_v57  ;;  %v2758_v57 = vld [vmem:[#allocation9 + $0x16c8] sm:$0xff]  ;;  %v6005_v63 = vpack.c.bf16 %v2712_v10, %v2709_v52  ;;  %v2789_v52 = vld [vmem:[#allocation9 + $0x17c0] sm:$0xff] }
 0x37e   : > { %5602 = vmatpush1.bf16.msra.mxu0 %v5601_v8  ;;  %v7545_v2 = vpop.f32.mrb[96].mxu1  ;;  %v5619_v8 = vpack.c.bf16 %v2759_v1, %v2756_v15  ;;  %v5621_v53 = vpack.c.bf16 %v2758_v57, %v2755_v14  ;;  %v2736_v15 = vld [vmem:[#allocation9 + $0x1618] sm:$0xff]  ;;  %v5635_v1 = vpack.c.bf16 %v2783_v59, %v2780_v22  ;;  %v2786_v14 = vld [vmem:[#allocation9 + $0x17a8] sm:$0xff]  ;;  %v6293_v22 = vld [vmem:[#allocation2 + $0x8] sm:$0xff] }
 0x37f   : > { %5604 = vmatprep.subr.bf16.mxu0 %v5603_v41  ;;  %v7547_v47 = vpop.f32.mrb[97].mxu1  ;;  %v2765_v41 = vld [vmem:[#allocation9 + $0x1700] sm:$0xff]  ;;  %v6021_v10 = vpack.c.bf16 %v2736_v15, %v2733_v4  ;;  %v3052_v59 = vrot.slane %v6293_v22, %v7734_v54  ;;  %v5651_v4 = vpack.c.bf16 %v2807_v62, %v2804_v42  ;;  %v2806_v15 = vld [vmem:[#allocation9 + $0x1848] sm:$0xff]  ;;  %v2831_v42 = vld [vmem:[#allocation9 + $0x1910] sm:$0xff] }
 0x380   : > { %5990 = vmatpush3.bf16.msra.mxu1 %v5989_v17  ;;  %v2718_v17 = vld [vmem:[#allocation9 + $0x1588] sm:$0xff]  ;;  %v2829_v22 = vld [vmem:[#allocation9 + $0x1900] sm:$0xff] }
 0x381   : > { %5992 = vmatprep.subr.bf16.mxu1 %v5991_v60  ;;  %v2764_v60 = vld [vmem:[#allocation9 + $0x16f8] sm:$0xff] }
 0x382   : > { %5606 = vmatpush1.bf16.msra.mxu0 %v5605_v49  ;;  %v5623_v49 = vpack.c.bf16 %v2765_v41, %v2762_v20  ;;  %v2742_v20 = vld [vmem:[#allocation9 + $0x1648] sm:$0xff] }
 0x383   : > { %5608 = vmatprep.subr.bf16.mxu0 %v5607_v5  ;;  %v6009_v5 = vpack.c.bf16 %v2718_v17, %v2715_v55  ;;  %v2792_v17 = vld [vmem:[#allocation9 + $0x17d8] sm:$0xff]  ;;  %v6025_v12 = vpack.c.bf16 %v2742_v20, %v2739_v37  ;;  %v2814_v37 = vld [vmem:[#allocation9 + $0x1888] sm:$0xff] }
 0x384   : > { %5994 = vmatpush3.bf16.msra.mxu1 %v5993_v58  ;;  %v2770_v58 = vld [vmem:[#allocation9 + $0x1728] sm:$0xff] }
 0x385   : > { %5996 = vmatprep.subr.bf16.mxu1 %v5995_v11  ;;  %v2778_v11 = vld [vmem:[#allocation9 + $0x1768] sm:$0xff] }
 0x386   : > { %5610 = vmatpush1.bf16.msra.mxu0 %v5609_v61  ;;  %v2775_v61 = vld [vmem:[#allocation9 + $0x1750] sm:$0xff] }
 0x387   : > { %5612 = vmatprep.subr.bf16.mxu0 %v5611_v18  ;;  %v5629_v18 = vpack.c.bf16 %v2770_v58, %v2767_v38  ;;  %v6015_v43 = vpack.c.bf16 %v2778_v11, %v2775_v61  ;;  %v2794_v38 = vld [vmem:[#allocation9 + $0x17e8] sm:$0xff]  ;;  %v2801_v58 = vld [vmem:[#allocation9 + $0x1820] sm:$0xff] }
 0x388   : > { %5998 = vmatpush3.bf16.msra.mxu1 %v5997_v51  ;;  %v2776_v51 = vld [vmem:[#allocation9 + $0x1758] sm:$0xff] }
 0x389   : > { %6000 = vmatprep.subr.bf16.mxu1 %v5999_v36  ;;  %v2784_v36 = vld [vmem:[#allocation9 + $0x1798] sm:$0xff] }
 0x38a   : > { %5614 = vmatpush1.bf16.msra.mxu0 %v5613_v34  ;;  %v2781_v34 = vld [vmem:[#allocation9 + $0x1780] sm:$0xff] }
 0x38b   : > { %5616 = vmatprep.subr.bf16.mxu0 %v5615_v19  ;;  %4304 = vmatmul.mubr.f32.vlgmr.msra.gmra.mrb[110].mxu1 %v7535_v3  ;;  %v2771_v3 = vld [vmem:[#allocation9 + $0x1730] sm:$0xff]  ;;  %v5633_v19 = vpack.c.bf16 %v2776_v51, %v2773_v9  ;;  %v6019_v23 = vpack.c.bf16 %v2784_v36, %v2781_v34  ;;  %v2800_v9 = vld [vmem:[#allocation9 + $0x1818] sm:$0xff]  ;;  %v2853_v34 = vld [vmem:[#allocation9 + $0x19c0] sm:$0xff] }
 0x38c   : > { %6002 = vmatpush3.bf16.msra.mxu1 %v6001_v39  ;;  %4373 = vmatprep.mubr.f32.mxu1 %v7540_v50  ;;  %v5625_v50 = vpack.c.bf16 %v2764_v60, %v2761_v21  ;;  %v5627_v13 = vpack.c.bf16 %v2771_v3, %v2768_v16  ;;  %v2782_v39 = vld [vmem:[#allocation9 + $0x1788] sm:$0xff]  ;;  %v2796_v21 = vld [vmem:[#allocation9 + $0x17f8] sm:$0xff]  ;;  %v2791_v3 = vld [vmem:[#allocation9 + $0x17d0] sm:$0xff] }
 0x38d   : > { %6004 = vmatprep.subr.bf16.mxu1 %v6003_v0  ;;  %v2790_v0 = vld [vmem:[#allocation9 + $0x17c8] sm:$0xff]  ;;  %v5645_v11 = vpack.c.bf16 %v2794_v38, %v2791_v3  ;;  %v2856_v36 = vld [vmem:[#allocation9 + $0x19d8] sm:$0xff] }
 0x38e   : > { %5618 = vmatpush1.bf16.msra.mxu0 %v5617_v27  ;;  %v2787_v27 = vld [vmem:[#allocation9 + $0x17b0] sm:$0xff]  ;;  %v2822_v38 = vld [vmem:[#allocation9 + $0x18c8] sm:$0xff] }
 0x38f   : > { %5620 = vmatprep.subr.bf16.mxu0 %v5619_v8  ;;  %v5637_v8 = vpack.c.bf16 %v2782_v39, %v2779_v25  ;;  %v6023_v57 = vpack.c.bf16 %v2790_v0, %v2787_v27  ;;  %v2808_v25 = vld [vmem:[#allocation9 + $0x1858] sm:$0xff]  ;;  %v2862_v39 = vld [vmem:[#allocation9 + $0x1a08] sm:$0xff]  ;;  %v6035_v0 = vpack.c.bf16 %v2856_v36, %v2853_v34  ;;  %v2827_v36 = vld [vmem:[#allocation9 + $0x18f0] sm:$0xff] }
 0x390   : > { %6006 = vmatpush3.bf16.msra.mxu1 %v6005_v63  ;;  %v5639_v63 = vpack.c.bf16 %v2789_v52, %v2786_v14  ;;  %v2810_v14 = vld [vmem:[#allocation9 + $0x1868] sm:$0xff]  ;;  %v2813_v52 = vld [vmem:[#allocation9 + $0x1880] sm:$0xff] }
 0x391   : > { %6008 = vmatprep.subr.bf16.mxu1 %v6007_v45  ;;  %v2793_v45 = vld [vmem:[#allocation9 + $0x17e0] sm:$0xff]  ;;  %v5655_v20 = vpack.c.bf16 %v2813_v52, %v2810_v14 }
 0x392   : > { %5622 = vmatpush1.bf16.msra.mxu0 %v5621_v53  ;;  %v2788_v53 = vld [vmem:[#allocation9 + $0x17b8] sm:$0xff]  ;;  %v6027_v16 = vpack.c.bf16 %v2796_v21, %v2793_v45  ;;  %v2819_v21 = vld [vmem:[#allocation9 + $0x18b0] sm:$0xff]  ;;  %v2833_v52 = vld [vmem:[#allocation9 + $0x1920] sm:$0xff] }
 0x393   : > { %5624 = vmatprep.subr.bf16.mxu0 %v5623_v49  ;;  %v2795_v49 = vld [vmem:[#allocation9 + $0x17f0] sm:$0xff]  ;;  %v5641_v24 = vpack.c.bf16 %v2788_v53, %v2785_v40  ;;  %v2868_v53 = vld [vmem:[#allocation9 + $0x1a38] sm:$0xff] }
 0x394   : > { %6010 = vmatpush3.bf16.msra.mxu1 %v6009_v5  ;;  %v2745_v5 = vld [vmem:[#allocation9 + $0x1660] sm:$0xff]  ;;  %v2811_v40 = vld [vmem:[#allocation9 + $0x1870] sm:$0xff]  ;;  %v2816_v45 = vld [vmem:[#allocation9 + $0x1898] sm:$0xff] }
 0x395   : > { %6012 = vmatprep.subr.bf16.mxu1 %v6011_v32  ;;  %v5643_v32 = vpack.c.bf16 %v2795_v49, %v2792_v17  ;;  %v5659_v3 = vpack.c.bf16 %v2819_v21, %v2816_v45 }
 0x396   : > { %5626 = vmatpush1.bf16.msra.mxu0 %v5625_v50  ;;  %v2748_v50 = vld [vmem:[#allocation9 + $0x1678] sm:$0xff] }
 0x397   : > { %5628 = vmatprep.subr.bf16.mxu0 %v5627_v13  ;;  %v2798_v13 = vld [vmem:[#allocation9 + $0x1808] sm:$0xff]  ;;  %v6029_v61 = vpack.c.bf16 %v2748_v50, %v2745_v5  ;;  %v2871_v50 = vld [vmem:[#allocation9 + $0x1a50] sm:$0xff] }
 0x398   : > { %6014 = vmatpush3.bf16.msra.mxu1 %v6013_v26  ;;  %v2802_v26 = vld [vmem:[#allocation9 + $0x1828] sm:$0xff] }
 0x399   : > { %6016 = vmatprep.subr.bf16.mxu1 %v6015_v43  ;;  %v2797_v43 = vld [vmem:[#allocation9 + $0x1800] sm:$0xff]  ;;  %v6033_v51 = vpack.c.bf16 %v2802_v26, %v2799_v33  ;;  %v2818_v5 = vld [vmem:[#allocation9 + $0x18a8] sm:$0xff]  ;;  %v5663_v33 = vpack.c.bf16 %v2825_v48, %v2822_v38  ;;  %v2824_v26 = vld [vmem:[#allocation9 + $0x18d8] sm:$0xff] }
 0x39a   : > { %5630 = vmatpush1.bf16.msra.mxu0 %v5629_v18  ;;  %v5647_v18 = vpack.c.bf16 %v2801_v58, %v2798_v13  ;;  %v2946_v38 = vld [vmem:[#allocation9 + $0x1ca8] sm:$0xff] }
 0x39b   : > { %5632 = vmatprep.subr.bf16.mxu0 %v5631_v56  ;;  %v7553_v56 = vld [vmem:[#allocation2 + $0x10] sm:$0xf] }
 0x39c   : > { %6018 = vmatpush3.bf16.msra.mxu1 %v6017_v46  ;;  %v5649_v46 = vpack.c.bf16 %v2800_v9, %v2797_v43  ;;  %v3064_v27 = vrot.slane %v7553_v56, %v6961_v35  ;;  %v2880_v43 = vld [vmem:[#allocation9 + $0x1a98] sm:$0xff]  ;;  %v2846_v48 = vld [vmem:[#allocation9 + $0x1988] sm:$0xff] }
 0x39d   : > { %6020 = vmatprep.subr.bf16.mxu1 %v6019_v23  ;;  %v2805_v23 = vld [vmem:[#allocation9 + $0x1840] sm:$0xff]  ;;  %v2828_v9 = vld [vmem:[#allocation9 + $0x18f8] sm:$0xff] }
 0x39e   : > { %5634 = vmatpush1.bf16.msra.mxu0 %v5633_v19  ;;  %v4817_v41 = vpop.f32.mrb[98].mxu1  ;;  %v2803_v19 = vld [vmem:[#allocation9 + $0x1830] sm:$0xff]  ;;  %v6037_v54 = vpack.c.bf16 %v2808_v25, %v2805_v23  ;;  %v2886_v25 = vld [vmem:[#allocation9 + $0x1ac8] sm:$0xff] }
 0x39f   : > { %5636 = vmatprep.subr.bf16.mxu0 %v5635_v1  ;;  %v4818_v55 = vpop.f32.mrb[99].mxu1  ;;  %v2859_v1 = vld [vmem:[#allocation9 + $0x19f0] sm:$0xff] }
 0x3a0   : > { %v7551_v60 = vadd.f32 %v4818_v55, %v4817_v41  ;;  %6022 = vmatpush3.bf16.msra.mxu1 %v6021_v10  ;;  %v5653_v10 = vpack.c.bf16 %v2806_v15, %v2803_v19  ;;  %v2812_v41 = vld [vmem:[#allocation9 + $0x1878] sm:$0xff]  ;;  %v6041_v55 = vpack.c.bf16 %v2814_v37, %v2811_v40  ;;  %v2830_v19 = vld [vmem:[#allocation9 + $0x1908] sm:$0xff]  ;;  %v2883_v23 = vld [vmem:[#allocation9 + $0x1ab0] sm:$0xff] }
 0x3a1   : > { %6024 = vmatprep.subr.bf16.mxu1 %v6023_v57  ;;  %v2809_v57 = vld [vmem:[#allocation9 + $0x1860] sm:$0xff]  ;;  %v2834_v15 = vld [vmem:[#allocation9 + $0x1928] sm:$0xff]  ;;  %v6055_v14 = vpack.c.bf16 %v2886_v25, %v2883_v23  ;;  %v2836_v40 = vld [vmem:[#allocation9 + $0x1938] sm:$0xff] }
 0x3a2   : > { %5638 = vmatpush1.bf16.msra.mxu0 %v5637_v8  ;;  %v6039_v8 = vpack.c.bf16 %v2862_v39, %v2859_v1  ;;  %v5657_v17 = vpack.c.bf16 %v2812_v41, %v2809_v57  ;;  %v2837_v1 = vld [vmem:[#allocation9 + $0x1940] sm:$0xff]  ;;  %v2854_v25 = vld [vmem:[#allocation9 + $0x19c8] sm:$0xff] }
 0x3a3   : > { %5640 = vmatprep.subr.bf16.mxu0 %v5639_v63  ;;  %v2865_v63 = vld [vmem:[#allocation9 + $0x1a20] sm:$0xff]  ;;  %v5671_v57 = vpack.c.bf16 %v2837_v1, %v2834_v15  ;;  %v2955_v15 = vld [vmem:[#allocation9 + $0x1cf0] sm:$0xff]  ;;  %v2958_v1 = vld [vmem:[#allocation9 + $0x1d08] sm:$0xff] }
 0x3a4   : > { %6026 = vmatpush3.bf16.msra.mxu1 %v6025_v12  ;;  %v6043_v49 = vpack.c.bf16 %v2868_v53, %v2865_v63  ;;  %v2815_v12 = vld [vmem:[#allocation9 + $0x1890] sm:$0xff]  ;;  %v2889_v37 = vld [vmem:[#allocation9 + $0x1ae0] sm:$0xff]  ;;  %v2840_v63 = vld [vmem:[#allocation9 + $0x1958] sm:$0xff] }
 0x3a5   : > { %6028 = vmatprep.subr.bf16.mxu1 %v6027_v16  ;;  %v2820_v16 = vld [vmem:[#allocation9 + $0x18b8] sm:$0xff]  ;;  %v5661_v13 = vpack.c.bf16 %v2818_v5, %v2815_v12  ;;  %v2843_v53 = vld [vmem:[#allocation9 + $0x1970] sm:$0xff] }
 0x3a6   : > { %5642 = vmatpush1.bf16.msra.mxu0 %v5641_v24  ;;  %v2817_v24 = vld [vmem:[#allocation9 + $0x18a0] sm:$0xff]  ;;  %v2839_v12 = vld [vmem:[#allocation9 + $0x1950] sm:$0xff]  ;;  %v5675_v5 = vpack.c.bf16 %v2843_v53, %v2840_v63 }
 0x3a7   : > { %5644 = vmatprep.subr.bf16.mxu0 %v5643_v32  ;;  %v2874_v32 = vld [vmem:[#allocation9 + $0x1a68] sm:$0xff]  ;;  %v6045_v30 = vpack.c.bf16 %v2820_v16, %v2817_v24  ;;  %v2841_v24 = vld [vmem:[#allocation9 + $0x1960] sm:$0xff]  ;;  %v2844_v16 = vld [vmem:[#allocation9 + $0x1978] sm:$0xff] }
 0x3a8   : > { %6030 = vmatpush3.bf16.msra.mxu1 %v6029_v61  ;;  %v6047_v58 = vpack.c.bf16 %v2874_v32, %v2871_v50  ;;  %v2821_v61 = vld [vmem:[#allocation9 + $0x18c0] sm:$0xff]  ;;  %v2842_v50 = vld [vmem:[#allocation9 + $0x1968] sm:$0xff]  ;;  %v2943_v32 = vld [vmem:[#allocation9 + $0x1c90] sm:$0xff] }
 0x3a9   : > { %6032 = vmatprep.subr.bf16.mxu1 %v6031_v28  ;;  %v2826_v28 = vld [vmem:[#allocation9 + $0x18e8] sm:$0xff] }
 0x3aa   : > { %5646 = vmatpush1.bf16.msra.mxu0 %v5645_v11  ;;  %v2823_v11 = vld [vmem:[#allocation9 + $0x18d0] sm:$0xff] }
 0x3ab   : > { %5648 = vmatprep.subr.bf16.mxu0 %v5647_v18  ;;  %4374 = vmatmul.mubr.f32.vlgmr.msra.gmra.mrb[112].mxu1 %v3052_v59  ;;  %v2877_v18 = vld [vmem:[#allocation9 + $0x1a80] sm:$0xff]  ;;  %v6049_v62 = vpack.c.bf16 %v2826_v28, %v2823_v11  ;;  %v2895_v11 = vld [vmem:[#allocation9 + $0x1b10] sm:$0xff]  ;;  %v2898_v28 = vld [vmem:[#allocation9 + $0x1b28] sm:$0xff] }
 0x3ac   : > { %6034 = vmatpush3.bf16.msra.mxu1 %v6033_v51  ;;  %4443 = vmatprep.mubr.f32.mxu1 %v3064_v27  ;;  %v5665_v51 = vpack.c.bf16 %v2824_v26, %v2821_v61  ;;  %v6051_v34 = vpack.c.bf16 %v2880_v43, %v2877_v18  ;;  %v2845_v61 = vld [vmem:[#allocation9 + $0x1980] sm:$0xff]  ;;  %v2848_v26 = vld [vmem:[#allocation9 + $0x1998] sm:$0xff] }
 0x3ad   : > { %3671 = vmatmul.mubr.f32.vlgmr.msra.gmra.mrb[64].mxu0 %v3052_v59  ;;  %6036 = vmatprep.subr.bf16.mxu1 %v6035_v0  ;;  %v2832_v59 = vld [vmem:[#allocation9 + $0x1918] sm:$0xff]  ;;  %v5669_v0 = vpack.c.bf16 %v2830_v19, %v2827_v36  ;;  %v2949_v18 = vld [vmem:[#allocation9 + $0x1cc0] sm:$0xff]  ;;  %v7571_v19 = vrot.slane %v7553_v56, %v7009_v29  ;;  %v2910_v29 = vld [vmem:[#allocation9 + $0x1b88] sm:$0xff] }
 0x3ae   : > { %5650 = vmatpush1.bf16.msra.mxu0 %v5649_v46  ;;  %3741 = vmatprep.mubr.f32.mxu0 %v3064_v27  ;;  %v5667_v46 = vpack.c.bf16 %v2831_v42, %v2828_v9  ;;  %v6053_v27 = vpack.c.bf16 %v2832_v59, %v2829_v22  ;;  %v2952_v43 = vld [vmem:[#allocation9 + $0x1cd8] sm:$0xff]  ;;  %v2855_v42 = vld [vmem:[#allocation9 + $0x19d0] sm:$0xff]  ;;  %v2901_v59 = vld [vmem:[#allocation9 + $0x1b40] sm:$0xff] }
 0x3af   : > { %5652 = vmatprep.subr.bf16.mxu0 %v5651_v4  ;;  %v7558_v4 = vld [vmem:[#allocation11] sm:$0x7]  ;;  %v2852_v9 = vld [vmem:[#allocation9 + $0x19b8] sm:$0xff]  ;;  %v6067_v36 = vpack.c.bf16 %v2952_v43, %v2949_v18  ;;  %v2851_v22 = vld [vmem:[#allocation9 + $0x19b0] sm:$0xff] }
 0x3b0   : > { %6038 = vmatpush3.bf16.msra.mxu1 %v6037_v54  ;;  %v3105_v39 = vrot.slane %v7558_v4, %v7733_v7  ;;  %v2835_v54 = vld [vmem:[#allocation9 + $0x1930] sm:$0xff]  ;;  %v5683_v23 = vpack.c.bf16 %v2855_v42, %v2852_v9 }
 0x3b1   : > { %6040 = vmatprep.subr.bf16.mxu1 %v6039_v8  ;;  %v2875_v42 = vld [vmem:[#allocation9 + $0x1a70] sm:$0xff] }
 0x3b2   : > { %5654 = vmatpush1.bf16.msra.mxu0 %v5653_v10  ;;  %v2838_v10 = vld [vmem:[#allocation9 + $0x1948] sm:$0xff]  ;;  %v3886_v45 = vadd.f32 %v7551_v60, %v3105_v39  ;;  %v6061_v60 = vpack.c.bf16 %v2844_v16, %v2841_v24  ;;  %v2967_v24 = vld [vmem:[#allocation9 + $0x1d50] sm:$0xff] }
 0x3b3   : > { %5656 = vmatprep.subr.bf16.mxu0 %v5655_v20  ;;  %v2892_v20 = vld [vmem:[#allocation9 + $0x1af8] sm:$0xff]  ;;  %v2858_v39 = vld [vmem:[#allocation9 + $0x19e8] sm:$0xff] }
 0x3b4   : > { %6042 = vmatpush3.bf16.msra.mxu1 %v6041_v55  ;;  %v6057_v55 = vpack.c.bf16 %v2838_v10, %v2835_v54  ;;  %v2857_v54 = vld [vmem:[#allocation9 + $0x19e0] sm:$0xff]  ;;  %v2907_v10 = vld [vmem:[#allocation9 + $0x1b70] sm:$0xff]  ;;  %v2970_v16 = vld [vmem:[#allocation9 + $0x1d68] sm:$0xff] }
 0x3b5   : > { %6044 = vmatprep.subr.bf16.mxu1 %v6043_v49  ;;  %v6059_v49 = vpack.c.bf16 %v2892_v20, %v2889_v37  ;;  %v2964_v37 = vld [vmem:[#allocation9 + $0x1d38] sm:$0xff]  ;;  %v6073_v63 = vpack.c.bf16 %v2910_v29, %v2907_v10  ;;  %v2985_v29 = vld [vmem:[#allocation9 + $0x1de0] sm:$0xff] }
 0x3b6   : > { %5658 = vmatpush1.bf16.msra.mxu0 %v5657_v17  ;;  %v5673_v17 = vpack.c.bf16 %v2836_v40, %v2833_v52  ;;  %v6071_v52 = vpack.c.bf16 %v2958_v1, %v2955_v15  ;;  %v2961_v40 = vld [vmem:[#allocation9 + $0x1d20] sm:$0xff]  ;;  %v2864_v20 = vld [vmem:[#allocation9 + $0x1a18] sm:$0xff] }
 0x3b7   : > { %5660 = vmatprep.subr.bf16.mxu0 %v5659_v3  ;;  %v2884_v10 = vld [vmem:[#allocation9 + $0x1ab8] sm:$0xff] }
 0x3b8   : > { %6046 = vmatpush3.bf16.msra.mxu1 %v6045_v30  ;;  %v2849_v30 = vld [vmem:[#allocation9 + $0x19a0] sm:$0xff] }
 0x3b9   : > { %6048 = vmatprep.subr.bf16.mxu1 %v6047_v58  ;;  %v6063_v58 = vpack.c.bf16 %v2946_v38, %v2943_v32 }
 0x3ba   : > { %5662 = vmatpush1.bf16.msra.mxu0 %v5661_v13  ;;  %v5677_v13 = vpack.c.bf16 %v2842_v50, %v2839_v12  ;;  %v2866_v12 = vld [vmem:[#allocation9 + $0x1a28] sm:$0xff]  ;;  %v2873_v50 = vld [vmem:[#allocation9 + $0x1a60] sm:$0xff] }
 0x3bb   : > { %5664 = vmatprep.subr.bf16.mxu0 %v5663_v33  ;;  %v5679_v33 = vpack.c.bf16 %v2849_v30, %v2846_v48  ;;  %v6079_v48 = vpack.c.bf16 %v2970_v16, %v2967_v24  ;;  %v2869_v30 = vld [vmem:[#allocation9 + $0x1a40] sm:$0xff]  ;;  %v2894_v24 = vld [vmem:[#allocation9 + $0x1b08] sm:$0xff] }
 0x3bc   : > { %6050 = vmatpush3.bf16.msra.mxu1 %v6049_v62  ;;  %v6065_v62 = vpack.c.bf16 %v2898_v28, %v2895_v11  ;;  %v2973_v11 = vld [vmem:[#allocation9 + $0x1d80] sm:$0xff]  ;;  %v2976_v28 = vld [vmem:[#allocation9 + $0x1d98] sm:$0xff] }
 0x3bd   : > { %6052 = vmatprep.subr.bf16.mxu1 %v6051_v34  ;;  %v5681_v34 = vpack.c.bf16 %v2848_v26, %v2845_v61  ;;  %v2872_v61 = vld [vmem:[#allocation9 + $0x1a58] sm:$0xff]  ;;  %v2879_v26 = vld [vmem:[#allocation9 + $0x1a90] sm:$0xff]  ;;  %v6083_v9 = vpack.c.bf16 %v2976_v28, %v2973_v11  ;;  %v2897_v16 = vld [vmem:[#allocation9 + $0x1b20] sm:$0xff] }
 0x3be   : > { %5666 = vmatpush1.bf16.msra.mxu0 %v5665_v51  ;;  %v4852_v8 = vpop.f32.mrb[100].mxu1  ;;  %v7567_v51 = vrot.slane %v7553_v56, %v6953_v31  ;;  %v5697_v43 = vpack.c.bf16 %v2872_v61, %v2869_v30  ;;  %v2900_v30 = vld [vmem:[#allocation9 + $0x1b38] sm:$0xff]  ;;  %v2899_v61 = vld [vmem:[#allocation9 + $0x1b30] sm:$0xff]  ;;  %v2902_v11 = vld [vmem:[#allocation9 + $0x1b48] sm:$0xff] }
 0x3bf   : > { %5668 = vmatprep.subr.bf16.mxu0 %v5667_v46  ;;  %v4853_v41 = vpop.f32.mrb[101].mxu1  ;;  %v2904_v46 = vld [vmem:[#allocation9 + $0x1b58] sm:$0xff]  ;;  %v2906_v28 = vld [vmem:[#allocation9 + $0x1b68] sm:$0xff] }
 0x3c0   : > { %v4854_v21 = vadd.f32 %v4853_v41, %v4852_v8  ;;  %6054 = vmatpush3.bf16.msra.mxu1 %v6053_v27  ;;  %v2861_v27 = vld [vmem:[#allocation9 + $0x1a00] sm:$0xff]  ;;  %v2867_v41 = vld [vmem:[#allocation9 + $0x1a30] sm:$0xff] }
 0x3c1   : > { %6056 = vmatprep.subr.bf16.mxu1 %v6055_v14  ;;  %v5685_v14 = vpack.c.bf16 %v2854_v25, %v2851_v22  ;;  %v5687_v8 = vpack.c.bf16 %v2861_v27, %v2858_v39  ;;  %v2878_v22 = vld [vmem:[#allocation9 + $0x1a88] sm:$0xff]  ;;  %v2885_v25 = vld [vmem:[#allocation9 + $0x1ac0] sm:$0xff] }
 0x3c2   : > { %5670 = vmatpush1.bf16.msra.mxu0 %v5669_v0  ;;  %v7563_v3 = vadd.f32 %v4854_v21, %v3886_v45  ;;  %v6069_v0 = vpack.c.bf16 %v2904_v46, %v2901_v59  ;;  %v6075_v45 = vpack.c.bf16 %v2964_v37, %v2961_v40  ;;  %v2863_v21 = vld [vmem:[#allocation9 + $0x1a10] sm:$0xff]  ;;  %v2982_v46 = vld [vmem:[#allocation9 + $0x1dc8] sm:$0xff]  ;;  %v5701_v1 = vpack.c.bf16 %v2878_v22, %v2875_v42  ;;  %v2881_v27 = vld [vmem:[#allocation9 + $0x1aa0] sm:$0xff] }
 0x3c3   : > { %5672 = vmatprep.subr.bf16.mxu0 %v5671_v57  ;;  %v2860_v57 = vld [vmem:[#allocation9 + $0x19f8] sm:$0xff]  ;;  %v5693_v38 = vpack.c.bf16 %v2866_v12, %v2863_v21  ;;  %v2979_v59 = vld [vmem:[#allocation9 + $0x1db0] sm:$0xff]  ;;  %v2890_v12 = vld [vmem:[#allocation9 + $0x1ae8] sm:$0xff] }
 0x3c4   : > { %6058 = vmatpush3.bf16.msra.mxu1 %v6057_v55  ;;  %v5689_v53 = vpack.c.bf16 %v2860_v57, %v2857_v54  ;;  %v2913_v55 = vld [vmem:[#allocation9 + $0x1ba0] sm:$0xff]  ;;  %v6087_v39 = vpack.c.bf16 %v2982_v46, %v2979_v59  ;;  %v2888_v40 = vld [vmem:[#allocation9 + $0x1ad8] sm:$0xff]  ;;  %v2891_v37 = vld [vmem:[#allocation9 + $0x1af0] sm:$0xff] }
 0x3c5   : > { %6060 = vmatprep.subr.bf16.mxu1 %v6059_v49  ;;  %v5691_v49 = vpack.c.bf16 %v2867_v41, %v2864_v20  ;;  %v2940_v21 = vld [vmem:[#allocation9 + $0x1c78] sm:$0xff]  ;;  %v2918_v22 = vld [vmem:[#allocation9 + $0x1bc8] sm:$0xff]  ;;  %v2921_v59 = vld [vmem:[#allocation9 + $0x1be0] sm:$0xff] }
 0x3c6   : > { %5674 = vmatpush1.bf16.msra.mxu0 %v5673_v17  ;;  %v2916_v17 = vld [vmem:[#allocation9 + $0x1bb8] sm:$0xff]  ;;  %v5727_v46 = vpack.c.bf16 %v2921_v59, %v2918_v22  ;;  %v2965_v22 = vld [vmem:[#allocation9 + $0x1d40] sm:$0xff] }
 0x3c7   : > { %5676 = vmatprep.subr.bf16.mxu0 %v5675_v5  ;;  %v2870_v5 = vld [vmem:[#allocation9 + $0x1a48] sm:$0xff]  ;;  %v6077_v32 = vpack.c.bf16 %v2916_v17, %v2913_v55  ;;  %v5707_v17 = vpack.c.bf16 %v2891_v37, %v2888_v40  ;;  %v2936_v37 = vld [vmem:[#allocation9 + $0x1c58] sm:$0xff] }
 0x3c8   : > { %6062 = vmatpush3.bf16.msra.mxu1 %v6061_v60  ;;  %v2919_v60 = vld [vmem:[#allocation9 + $0x1bd0] sm:$0xff]  ;;  %v2968_v59 = vld [vmem:[#allocation9 + $0x1d58] sm:$0xff] }
 0x3c9   : > { %6064 = vmatprep.subr.bf16.mxu1 %v6063_v58  ;;  %v5695_v58 = vpack.c.bf16 %v2873_v50, %v2870_v5 }
 0x3ca   : > { %5678 = vmatpush1.bf16.msra.mxu0 %v5677_v13  ;;  %v2922_v13 = vld [vmem:[#allocation9 + $0x1be8] sm:$0xff] }
 0x3cb   : > { %5680 = vmatprep.subr.bf16.mxu0 %v5679_v33  ;;  %4444 = vmatmul.mubr.f32.vlgmr.msra.gmra.mrb[114].mxu1 %v7567_v51  ;;  %v2876_v33 = vld [vmem:[#allocation9 + $0x1a78] sm:$0xff]  ;;  %v6081_v18 = vpack.c.bf16 %v2922_v13, %v2919_v60  ;;  %v2903_v60 = vld [vmem:[#allocation9 + $0x1b50] sm:$0xff] }
 0x3cc   : > { %6066 = vmatpush3.bf16.msra.mxu1 %v6065_v62  ;;  %4513 = vmatprep.mubr.f32.mxu1 %v7571_v19  ;;  %v2925_v62 = vld [vmem:[#allocation9 + $0x1c00] sm:$0xff] }
 0x3cd   : > { %6068 = vmatprep.subr.bf16.mxu1 %v6067_v36  ;;  %v5699_v36 = vpack.c.bf16 %v2879_v26, %v2876_v33  ;;  %v2909_v33 = vld [vmem:[#allocation9 + $0x1b80] sm:$0xff]  ;;  %v5717_v26 = vpack.c.bf16 %v2902_v11, %v2899_v61 }
 0x3ce   : > { %5682 = vmatpush1.bf16.msra.mxu0 %v5681_v34  ;;  %v2928_v34 = vld [vmem:[#allocation9 + $0x1c18] sm:$0xff] }
 0x3cf   : > { %5684 = vmatprep.subr.bf16.mxu0 %v5683_v23  ;;  %v2882_v23 = vld [vmem:[#allocation9 + $0x1aa8] sm:$0xff]  ;;  %v6085_v15 = vpack.c.bf16 %v2928_v34, %v2925_v62  ;;  %v2911_v34 = vld [vmem:[#allocation9 + $0x1b90] sm:$0xff] }
 0x3d0   : > { %6070 = vmatpush3.bf16.msra.mxu1 %v6069_v0  ;;  %v2931_v0 = vld [vmem:[#allocation9 + $0x1c30] sm:$0xff]  ;;  %v5703_v54 = vpack.c.bf16 %v2885_v25, %v2882_v23  ;;  %v2920_v23 = vld [vmem:[#allocation9 + $0x1bd8] sm:$0xff] }
 0x3d1   : > { %6072 = vmatprep.subr.bf16.mxu1 %v6071_v52  ;;  %v2924_v25 = vld [vmem:[#allocation9 + $0x1bf8] sm:$0xff] }
 0x3d2   : > { %5686 = vmatpush1.bf16.msra.mxu0 %v5685_v14  ;;  %v2934_v14 = vld [vmem:[#allocation9 + $0x1c48] sm:$0xff] }
 0x3d3   : > { %5688 = vmatprep.subr.bf16.mxu0 %v5687_v8  ;;  %v2988_v8 = vld [vmem:[#allocation9 + $0x1df8] sm:$0xff]  ;;  %v6089_v41 = vpack.c.bf16 %v2934_v14, %v2931_v0  ;;  %v2926_v0 = vld [vmem:[#allocation9 + $0x1c08] sm:$0xff] }
 0x3d4   : > { %6074 = vmatpush3.bf16.msra.mxu1 %v6073_v63  ;;  %v5705_v63 = vpack.c.bf16 %v2884_v10, %v2881_v27  ;;  %v2923_v27 = vld [vmem:[#allocation9 + $0x1bf0] sm:$0xff]  ;;  %v2930_v14 = vld [vmem:[#allocation9 + $0x1c28] sm:$0xff] }
 0x3d5   : > { %6076 = vmatprep.subr.bf16.mxu1 %v6075_v45  ;;  %v2937_v45 = vld [vmem:[#allocation9 + $0x1c60] sm:$0xff] }
 0x3d6   : > { %5690 = vmatpush1.bf16.msra.mxu0 %v5689_v53  ;;  %v6091_v53 = vpack.c.bf16 %v2988_v8, %v2985_v29  ;;  %v6093_v5 = vpack.c.bf16 %v2940_v21, %v2937_v45  ;;  %v2929_v8 = vld [vmem:[#allocation9 + $0x1c20] sm:$0xff]  ;;  %v2935_v21 = vld [vmem:[#allocation9 + $0x1c50] sm:$0xff] }
 0x3d7   : > { %5692 = vmatprep.subr.bf16.mxu0 %v5691_v49  ;;  %v2887_v49 = vld [vmem:[#allocation9 + $0x1ad0] sm:$0xff] }
 0x3d8   : > { %6078 = vmatpush3.bf16.msra.mxu1 %v6077_v32  ;;  %v5709_v50 = vpack.c.bf16 %v2890_v12, %v2887_v49  ;;  %v5711_v32 = vpack.c.bf16 %v2897_v16, %v2894_v24  ;;  %v2942_v49 = vld [vmem:[#allocation9 + $0x1c88] sm:$0xff]  ;;  %v2945_v12 = vld [vmem:[#allocation9 + $0x1ca0] sm:$0xff] }
 0x3d9   : > { %6080 = vmatprep.subr.bf16.mxu1 %v6079_v48  ;;  %v2896_v48 = vld [vmem:[#allocation9 + $0x1b18] sm:$0xff]  ;;  %v5743_v16 = vpack.c.bf16 %v2945_v12, %v2942_v49 }
 0x3da   : > { %5694 = vmatpush1.bf16.msra.mxu0 %v5693_v38  ;;  %v2893_v38 = vld [vmem:[#allocation9 + $0x1b00] sm:$0xff] }
 0x3db   : > { %5696 = vmatprep.subr.bf16.mxu0 %v5695_v58  ;;  %v5713_v13 = vpack.c.bf16 %v2896_v48, %v2893_v38  ;;  %v5715_v58 = vpack.c.bf16 %v2903_v60, %v2900_v30  ;;  %v2951_v38 = vld [vmem:[#allocation9 + $0x1cd0] sm:$0xff]  ;;  %v2950_v60 = vld [vmem:[#allocation9 + $0x1cc8] sm:$0xff] }
 0x3dc   : > { %6082 = vmatpush3.bf16.msra.mxu1 %v6081_v18  ;;  %v5719_v18 = vpack.c.bf16 %v2909_v33, %v2906_v28  ;;  %v2953_v28 = vld [vmem:[#allocation9 + $0x1ce0] sm:$0xff]  ;;  %v2956_v33 = vld [vmem:[#allocation9 + $0x1cf8] sm:$0xff] }
 0x3dd   : > { %6084 = vmatprep.subr.bf16.mxu1 %v6083_v9  ;;  %v2915_v9 = vld [vmem:[#allocation9 + $0x1bb0] sm:$0xff] }
 0x3de   : > { %5698 = vmatpush1.bf16.msra.mxu0 %v5697_v43  ;;  %v4887_v52 = vpop.f32.mrb[102].mxu1  ;;  %v2905_v43 = vld [vmem:[#allocation9 + $0x1b60] sm:$0xff] }
 0x3df   : > { %5700 = vmatprep.subr.bf16.mxu0 %v5699_v36  ;;  %v4888_v57 = vpop.f32.mrb[103].mxu1  ;;  %v2914_v36 = vld [vmem:[#allocation9 + $0x1ba8] sm:$0xff] }
 0x3e0   : > { %v4889_v20 = vadd.f32 %v4888_v57, %v4887_v52  ;;  %6086 = vmatpush3.bf16.msra.mxu1 %v6085_v15  ;;  %v2927_v15 = vld [vmem:[#allocation9 + $0x1c10] sm:$0xff]  ;;  %v2933_v52 = vld [vmem:[#allocation9 + $0x1c40] sm:$0xff]  ;;  %v2932_v57 = vld [vmem:[#allocation9 + $0x1c38] sm:$0xff] }
 0x3e1   : > { %6088 = vmatprep.subr.bf16.mxu1 %v6087_v39  ;;  %v5731_v39 = vpack.c.bf16 %v2927_v15, %v2924_v25  ;;  %v5735_v29 = vpack.c.bf16 %v2933_v52, %v2930_v14  ;;  %v2971_v25 = vld [vmem:[#allocation9 + $0x1d70] sm:$0xff]  ;;  %v2974_v15 = vld [vmem:[#allocation9 + $0x1d88] sm:$0xff]  ;;  %v2977_v52 = vld [vmem:[#allocation9 + $0x1da0] sm:$0xff] }
 0x3e2   : > { %5702 = vmatpush1.bf16.msra.mxu0 %v5701_v1  ;;  %v7576_v55 = vadd.f32 %v4889_v20, %v7563_v3  ;;  %v7580_v3 = vrot.slane %v7553_v56, %v7733_v7  ;;  %v2908_v7 = vld [vmem:[#allocation9 + $0x1b78] sm:$0xff]  ;;  %v2939_v20 = vld [vmem:[#allocation9 + $0x1c70] sm:$0xff] }
 0x3e3   : > { %5704 = vmatprep.subr.bf16.mxu0 %v5703_v54  ;;  %v2912_v56 = vld [vmem:[#allocation9 + $0x1b98] sm:$0xff]  ;;  %v5721_v42 = vpack.c.bf16 %v2908_v7, %v2905_v43  ;;  %v5733_v54 = vpack.c.bf16 %v2926_v0, %v2923_v27  ;;  %v5739_v45 = vpack.c.bf16 %v2939_v20, %v2936_v37  ;;  %v5753_v43 = vpack.c.bf16 %v2956_v33, %v2953_v28 }
 0x3e4   : > { %6090 = vmatpush3.bf16.msra.mxu1 %v6089_v41  ;;  %v5723_v62 = vpack.c.bf16 %v2915_v9, %v2912_v56  ;;  %v2959_v56 = vld [vmem:[#allocation9 + $0x1d10] sm:$0xff]  ;;  %v2962_v9 = vld [vmem:[#allocation9 + $0x1d28] sm:$0xff]  ;;  %v5765_v27 = vpack.c.bf16 %v2974_v15, %v2971_v25  ;;  %v3097_v28 = vrot.slane %v7558_v4, %v6953_v31  ;;  %v3101_v33 = vrot.slane %v7558_v4, %v6961_v35 }
 0x3e5   : > { %6092 = vmatprep.subr.bf16.mxu1 %v6091_v53 }
 0x3e6   : > { %5706 = vmatpush1.bf16.msra.mxu0 %v5705_v63  ;;  %v5737_v63 = vpack.c.bf16 %v2932_v57, %v2929_v8  ;;  %v2987_v8 = vld [vmem:[#allocation9 + $0x1df0] sm:$0xff] }
 0x3e7   : > { %5708 = vmatprep.subr.bf16.mxu0 %v5707_v17  ;;  %v2938_v17 = vld [vmem:[#allocation9 + $0x1c68] sm:$0xff] }
 0x3e8   : > { %6094 = vmatpush3.bf16.msra.mxu1 %v6093_v5  ;;  %v5741_v24 = vpack.c.bf16 %v2938_v17, %v2935_v21  ;;  %v2941_v5 = vld [vmem:[#allocation9 + $0x1c80] sm:$0xff] }
 0x3ea   : > { %5710 = vmatpush1.bf16.msra.mxu0 %v5709_v50  ;;  %v2944_v50 = vld [vmem:[#allocation9 + $0x1c98] sm:$0xff] }
 0x3eb   : > { %5712 = vmatprep.subr.bf16.mxu0 %v5711_v32  ;;  %4514 = vmatmul.mubr.f32.vlgmr.msra.gmra.mrb[116].mxu1 %v7580_v3  ;;  %v2948_v32 = vld [vmem:[#allocation9 + $0x1cb8] sm:$0xff]  ;;  %v5745_v48 = vpack.c.bf16 %v2944_v50, %v2941_v5 }
 0x3ec   : > { %v5747_v30 = vpack.c.bf16 %v2951_v38, %v2948_v32 }
 0x3ed   : > { %3742 = vmatmul.mubr.f32.vlgmr.msra.gmra.mrb[64].mxu0 %v7567_v51  ;;  %v5725_v51 = vpack.c.bf16 %v2914_v36, %v2911_v34  ;;  %v5757_v34 = vpack.c.bf16 %v2962_v9, %v2959_v56 }
 0x3ee   : > { %5714 = vmatpush1.bf16.msra.mxu0 %v5713_v13  ;;  %3812 = vmatprep.mubr.f32.mxu0 %v7571_v19  ;;  %v2917_v19 = vld [vmem:[#allocation9 + $0x1bc0] sm:$0xff]  ;;  %v2954_v13 = vld [vmem:[#allocation9 + $0x1ce8] sm:$0xff] }
 0x3ef   : > { %5716 = vmatprep.subr.bf16.mxu0 %v5715_v58  ;;  %v5729_v1 = vpack.c.bf16 %v2920_v23, %v2917_v19  ;;  %v2957_v58 = vld [vmem:[#allocation9 + $0x1d00] sm:$0xff]  ;;  %v5761_v19 = vpack.c.bf16 %v2968_v59, %v2965_v22 }
 0x3f0   : > { %v5751_v11 = vpack.c.bf16 %v2957_v58, %v2954_v13 }
 0x3f2   : > { %5718 = vmatpush1.bf16.msra.mxu0 %v5717_v26  ;;  %v2960_v26 = vld [vmem:[#allocation9 + $0x1d18] sm:$0xff] }
 0x3f3   : > { %5720 = vmatprep.subr.bf16.mxu0 %v5719_v18  ;;  %v2963_v18 = vld [vmem:[#allocation9 + $0x1d30] sm:$0xff] }
 0x3f4   : > { %v5755_v7 = vpack.c.bf16 %v2963_v18, %v2960_v26  ;;  %v6095_v26 = vadd.f32 %v7545_v2, %v3097_v28  ;;  %v6097_v18 = vadd.f32 %v7547_v47, %v3101_v33 }
 0x3f6   : > { %5722 = vmatpush1.bf16.msra.mxu0 %v5721_v42  ;;  %v2966_v42 = vld [vmem:[#allocation9 + $0x1d48] sm:$0xff] }
 0x3f7   : > { %5724 = vmatprep.subr.bf16.mxu0 %v5723_v62  ;;  %v2969_v62 = vld [vmem:[#allocation9 + $0x1d60] sm:$0xff] }
 0x3f8   : > { %v5759_v36 = vpack.c.bf16 %v2969_v62, %v2966_v42 }
 0x3fa   : > { %5726 = vmatpush1.bf16.msra.mxu0 %v5725_v51  ;;  %v2972_v51 = vld [vmem:[#allocation9 + $0x1d78] sm:$0xff] }
 0x3fb   : > { %5728 = vmatprep.subr.bf16.mxu0 %v5727_v46  ;;  %v2975_v46 = vld [vmem:[#allocation9 + $0x1d90] sm:$0xff] }
 0x3fc   : > { %v5763_v23 = vpack.c.bf16 %v2975_v46, %v2972_v51 }
 0x3fe   : > { %5730 = vmatpush1.bf16.msra.mxu0 %v5729_v1  ;;  %v4922_v10 = vpop.f32.mrb[104].mxu1  ;;  %v2978_v1 = vld [vmem:[#allocation9 + $0x1da8] sm:$0xff] }
 0x3ff   : > { %5732 = vmatprep.subr.bf16.mxu0 %v5731_v39  ;;  %v4923_v40 = vpop.f32.mrb[105].mxu1  ;;  %v2981_v39 = vld [vmem:[#allocation9 + $0x1dc0] sm:$0xff] }
 0x400   : > { %v4924_v41 = vadd.f32 %v4923_v40, %v4922_v10  ;;  %v5767_v14 = vpack.c.bf16 %v2981_v39, %v2978_v1 }
 0x402   : > { %5734 = vmatpush1.bf16.msra.mxu0 %v5733_v54  ;;  %v7586_v53 = vadd.f32 %v4924_v41, %v7576_v55  ;;  %v2947_v55 = vld [vmem:[#allocation9 + $0x1cb0] sm:$0xff]  ;;  %v2980_v54 = vld [vmem:[#allocation9 + $0x1db8] sm:$0xff] }
 0x403   : > { %5736 = vmatprep.subr.bf16.mxu0 %v5735_v29  ;;  %v5749_v61 = vpack.c.bf16 %v2950_v60, %v2947_v55  ;;  %v2984_v29 = vld [vmem:[#allocation9 + $0x1dd8] sm:$0xff]  ;;  %v5769_v40 = vpack.c.bf16 %v2980_v54, %v2977_v52  ;;  %v2983_v41 = vld [vmem:[#allocation9 + $0x1dd0] sm:$0xff] }
 0x404   : > { %v5771_v20 = vpack.c.bf16 %v2987_v8, %v2984_v29 }
 0x406   : > { %5738 = vmatpush1.bf16.msra.mxu0 %v5737_v63  ;;  %v2986_v63 = vld [vmem:[#allocation9 + $0x1de8] sm:$0xff] }
 0x407   : > { %5740 = vmatprep.subr.bf16.mxu0 %v5739_v45  ;;  %v5773_v45 = vpack.c.bf16 %v2986_v63, %v2983_v41 }
 0x40a   : > { %5742 = vmatpush1.bf16.msra.mxu0 %v5741_v24 }
 0x40b   : > { %5744 = vmatprep.subr.bf16.mxu0 %v5743_v16 }
 0x40e   : > { %5746 = vmatpush1.bf16.msra.mxu0 %v5745_v48 }
 0x40f   : > { %5748 = vmatprep.subr.bf16.mxu0 %v5747_v30 }
 0x412   : > { %5750 = vmatpush1.bf16.msra.mxu0 %v5749_v61 }
 0x413   : > { %5752 = vmatprep.subr.bf16.mxu0 %v5751_v11 }
 0x416   : > { %5754 = vmatpush1.bf16.msra.mxu0 %v5753_v43 }
 0x417   : > { %5756 = vmatprep.subr.bf16.mxu0 %v5755_v7 }
 0x41a   : > { %5758 = vmatpush1.bf16.msra.mxu0 %v5757_v34 }
 0x41b   : > { %5760 = vmatprep.subr.bf16.mxu0 %v5759_v36 }
 0x41e   : > { %5762 = vmatpush1.bf16.msra.mxu0 %v5761_v19  ;;  %v4957_v0 = vpop.f32.mrb[106].mxu1 }
 0x41f   : > { %5764 = vmatprep.subr.bf16.mxu0 %v5763_v23  ;;  %v4958_v10 = vpop.f32.mrb[107].mxu1 }
 0x420   : > { %v4959_v57 = vadd.f32 %v4958_v10, %v4957_v0 }
 0x422   : > { %5766 = vmatpush1.bf16.msra.mxu0 %v5765_v27  ;;  %v4166_v37 = vadd.f32 %v4959_v57, %v7586_v53 }
 0x423   : > { %5768 = vmatprep.subr.bf16.mxu0 %v5767_v14 }
 0x426   : > { %5770 = vmatpush1.bf16.msra.mxu0 %v5769_v40 }
 0x427   : > { %5772 = vmatprep.subr.bf16.mxu0 %v5771_v20 }
 0x42a   : > { %5774 = vmatpush1.bf16.msra.mxu0 %v5773_v45 }
 0x42d   : > { %3813 = vmatmul.mubr.f32.vlgmr.msra.gmra.mrb[64].mxu0 %v7580_v3 }
 0x43e   : > { %v4992_v21 = vpop.f32.mrb[108].mxu1 }
 0x43f   : > { %v4993_v17 = vpop.f32.mrb[109].mxu1 }
 0x440   : > { %v4994_v49 = vadd.f32 %v4993_v17, %v4992_v21 }
 0x442   : > { %v4236_v12 = vadd.f32 %v4994_v49, %v4166_v37 }
 0x45e   : > { %v5027_v24 = vpop.f32.mrb[110].mxu1 }
 0x45f   : > { %v5028_v16 = vpop.f32.mrb[111].mxu1 }
 0x460   : > { %v5029_v5 = vadd.f32 %v5028_v16, %v5027_v24 }
 0x462   : > { %v4306_v50 = vadd.f32 %v5029_v5, %v4236_v12 }
 0x47e   : > { %v5062_v32 = vpop.f32.mrb[112].mxu1 }
 0x47f   : > { %v5063_v53 = vpop.f32.mrb[113].mxu1 }
 0x480   : > { %v5064_v38 = vadd.f32 %v5063_v53, %v5062_v32 }
 0x482   : > { %v4376_v48 = vadd.f32 %v5064_v38, %v4306_v50 }
 0x49e   : > { %v5097_v30 = vpop.f32.mrb[114].mxu1 }
 0x49f   : > { %v5098_v55 = vpop.f32.mrb[115].mxu1 }
 0x4a0   : > { %v5099_v60 = vadd.f32 %v5098_v55, %v5097_v30 }
 0x4a2   : > { %v4446_v13 = vadd.f32 %v5099_v60, %v4376_v48 }
 0x4be   : > { %v5132_v58 = vpop.f32.mrb[116].mxu1 }
 0x4bf   : > { %v5133_v3 = vpop.f32.mrb[117].mxu1 }
 0x4c0   : > { %v5134_v61 = vadd.f32 %v5133_v3, %v5132_v58 }
 0x4c2   : > { %v4516_v11 = vadd.f32 %v5134_v61, %v4446_v13 }
 0x4c4   : > { %v4536_v62 = vrot.slane %v4516_v11, %v7032_v6 }
 0x500   : > { %v3814_v43 = vpop.f32.mrb[64].mxu0 }
 0x501   : > { %v6096_v7 = vadd.f32 %v6095_v26, %v3814_v43  ;;  %v3816_v56 = vpop.f32.mrb[65].mxu0 }
 0x502   : > { %v6098_v9 = vadd.f32 %v6097_v18, %v3816_v56 }
 0x504   : > { %v4522_v42 = vcombine.low %v6096_v7, %v6098_v9 }
 0x506   : > { %v4529_v34 = vrot.slane %v4522_v42, %v7032_v6 }
 0x508   : > { %v4537_v31 = vcombine.low %v4529_v34, %v4536_v62 }
 0x50a   : > { %v4544_v35 = vrot.slane %v4537_v31, %v7032_v6 }
 0x50c   : > { %4548 = vst.msk [vmem:[%s311_s30] sm:$0x7] %vm4546_vm2, %v4544_v35 }
 0x50d   : > { %6449 = shalt.err (!%p6446_p0)
}
 0x50e   : > { %s6450_s10 = scalar_lea.hbm %s7605_s9, 48  ;;  %s6454_s29 = scalar_lea.hbm %s7659_s5, 96 }
 0x50f   : > { %p6451_p4 = scmp.ne.s32.totalorder %s7605_s9, %s6450_s10  ;;  %p6455_p12 = scmp.lt.u32.totalorder %s7605_s9, %s7659_s5 }
 0x510   : > { %p6456_p1 = scmp.lt.u32.totalorder %s6454_s29, %s6450_s10  ;;  %p6458_p11 = scmp.lt.u32.totalorder %s6450_s10, %s7605_s9 }
 0x511   : > { %p6452_p13 = pnand %p6451_p4, %p6750_p5 }
 0x512   : > { %p6457_p10 = por %p6456_p1, %p6455_p12 }
 0x513   : > { %p6453_p6 = pneg %p6452_p13 }
 0x514   : > { %p6459_p3 = por %p6458_p11, %p6457_p10 }
 0x516   : > { %p6460_p2 = pnand %p6459_p3, %p6453_p6 }
 0x518   : > { %6463 = shalt.err (!%p6460_p2)
}
 0x519   : > { %6135 = dma.vmem_to_hbm [thread:$0]  (%p6750_p5), %s7607_s25, 48, %s7605_s9, %s4550_s11  }
 0x51a PF: > { %s7735_s26 = sld [smem:[#allocation17_spill]]  ;;  %s4576_s28 = sand.u32 1, %s6506_s18  }
 0x51b   : > { %p7737_p7 = scmp.ge.s32.totalorder %s6526_s23, 2  ;;  %s4577_s30 = scalar_lea.sflag [#allocation5], %s4576_s28 }
 0x520   : > { %p7736_p8 = scmp.ne.s32.totalorder %s7735_s26, 0 }
 0x522   : > { %p6155_p9 = pnand %p7737_p7, %p7736_p8 }
 0x524   : > { %6501 = dma.done.wait (!%p6155_p9), %s4577_s30, 48  }
 0x525   : > { %6503 = vsyncadd (!%p6155_p9), %s4577_s30, 4294967248  ;;  %s23_s23 = sadd.s32 1, %s6526_s23   ;;  %s7738_s18 = smov %s6510_s19 }
 0x526   : > { %p20_p0 = scmp.ge.s32.totalorder %s23_s23, 4   ;;  %s7739_s19 = smov %s6514_s20 }
 0x527   : > { %s7740_s20 = smov %s6759_s14  ;;  %s7741_s21 = smov %s6522_s22 }
 0x528   : > { %s7742_s22 = smov %s7744_s16  ;;  %22 = sbr.rel (!%p20_p0) target bundleno = 10 (0xa), region = 109 }
 0x52f   :  { %4582 = vsyncpa [#allocation4], 1 }
 0x530   :  { %4584 = vsyncpa [#allocation4 + $0x1], 1 }
 0x531   :  { %4585 = vsyncpa [#allocation7], 1 }
 0x532   :  { %4586 = vsyncpa [#allocation10], 1 }
 0x533   :  { %4587 = vsyncpa [#allocation5], 1 }
 0x534   :  { %4589 = vsyncpa [#allocation5 + $0x1], 1 }

</bundles_post_ra>
